<compile_context>
chip_gen: v7x
topology: tpu7x:2x2x1
jax: 0.10.0
libtpu: 0.0.40
codegen_flags: <defaults>
</compile_context>

<pallas_src>
import functools

import numpy as np
import jax
import jax.numpy as jnp
from jax import lax
from jax.experimental import pallas as pl
from jax.experimental.pallas import tpu as pltpu

MAXK = 11  # max ROCKET kernel length (lengths drawn from {7, 9, 11})


def _round_up(x, m):
    return ((x + m - 1) // m) * m


# ------------------------------- Pallas kernel --------------------------------

def _rocket_fused_kernel(x_ref, w_ref, slab_ref, o_ref, feats_ref, *, K):
    """Fused ROCKET conv (banded matmul) + PPV/max + LayerNorm + Linear head.

    x_ref    : (TB, LPP)        f32  zero-padded series rows; column `ones_col` holds 1.0
    w_ref    : (2*LPP, K*Lc)    bf16 banded conv weights; rows [0,LPP)=hi, [LPP,2LPP)=lo split
    slab_ref : (R0+2K, SLAB_W)  f32  packed params (masks / scales / gamma / beta / head)
    o_ref    : (TB, P)          f32
    feats_ref: (TB, 2K)         f32  VMEM scratch used to assemble the feature vector
    """
    D = 2 * K
    LPP = w_ref.shape[0] // 2
    Lc = w_ref.shape[1] // K
    P = o_ref.shape[1]
    R0 = _round_up(K + 4, 8)           # sublane-aligned start of the head-weight rows in slab

    # ---- all K dilated convolutions as one banded matmul -------------------------------------
    # Explicit hi/lo bf16 split == 3-pass Precision.HIGH accuracy (abs err ~1e-5, far below the
    # scale where a PPV sign flip is plausible), at half the MXU passes of HIGHEST, using only
    # guaranteed-lowerable bf16 x bf16 -> f32 dots.
    x = x_ref[...]
    x_hi = x.astype(jnp.bfloat16)
    x_lo = (x - x_hi.astype(jnp.float32)).astype(jnp.bfloat16)
    w_hi = w_ref[0:LPP, :]
    w_lo = w_ref[LPP:2 * LPP, :]
    z = (jnp.dot(x_hi, w_hi, preferred_element_type=jnp.float32)
         + jnp.dot(x_hi, w_lo, preferred_element_type=jnp.float32)
         + jnp.dot(x_lo, w_hi, preferred_element_type=jnp.float32))        # (TB, K*Lc) f32

    # ---- per-ROCKET-kernel PPV and max over valid time steps ---------------------------------
    # z segment k occupies lanes [k*Lc, (k+1)*Lc) with Lc a multiple of 128 -> vreg-aligned
    # slices.  Static unroll over K (K is small for this featurizer).
    for k in range(K):
        zk = z[:, k * Lc:(k + 1) * Lc]                 # (TB, Lc)
        vk = slab_ref[k:k + 1, 0:Lc]                   # (1, Lc) validity mask in {0,1}
        feats_ref[:, k:k + 1] = jnp.sum(
            jnp.where(zk > 0.0, vk, 0.0), axis=-1, keepdims=True)           # PPV counts
        feats_ref[:, K + k:K + k + 1] = jnp.max(
            jnp.where(vk > 0.0, zk, -3.0e38), axis=-1, keepdims=True)       # max (finite sentinel)

    # scale row = [1/n_out_0 .. 1/n_out_{K-1}, 1 .. 1]  (PPV normalization; max unchanged)
    feats = feats_ref[...] * slab_ref[K:K + 1, 0:D]                         # (TB, 2K)

    # ---- LayerNorm over the feature dim (rsqrt -> EUP slot) -----------------------------------
    mu = jnp.mean(feats, axis=-1, keepdims=True)
    xc = feats - mu
    var = jnp.mean(xc * xc, axis=-1, keepdims=True)
    y = xc * lax.rsqrt(var + 1e-5) * slab_ref[K + 1:K + 2, 0:D] + slab_ref[K + 2:K + 3, 0:D]

    # ---- Linear head (default MXU precision, f32 accumulation) --------------------------------
    o_ref[...] = (jnp.dot(y, slab_ref[R0:R0 + D, 0:P], preferred_element_type=jnp.float32)
                  + slab_ref[K + 3:K + 4, 0:P])


# ------------------------------ wrapper (glue) --------------------------------

def rocket_forward(x, params):
    """x: (B, L) float32 univariate series -> (B, pred_len)."""
    B, L = x.shape
    Wsplit = params["Wsplit"]                        # (2*LPP, K*Lc) bf16
    slab = params["slab"]                            # (R0+2K, SLAB_W) f32
    K = int(params["num_kernels"])
    P = int(params["pred_len"])
    LPP = Wsplit.shape[0] // 2
    max_pad = int(params["max_pad"])
    ones_col = int(params["ones_col"])

    # Batch tiling: one full block when small, 256-row parallel blocks when large (keeps each
    # block's VMEM well under v5e's 16 MiB scoped default / v7x's 64 MiB physical).
    if B <= 256:
        TB, BP = B, B
    else:
        TB = 256
        BP = _round_up(B, TB)

    # Only XLA-side prep: a tiny (BP, LPP) zero-pad of the raw series; column `ones_col` = 1.0
    # feeds the conv bias row of the band matrix.
    xa = jnp.zeros((BP, LPP), jnp.float32)
    xa = xa.at[:B, max_pad:max_pad + L].set(x.astype(jnp.float32))
    xa = xa.at[:, ones_col].set(1.0)

    out = pl.pallas_call(
        functools.partial(_rocket_fused_kernel, K=K),
        out_shape=jax.ShapeDtypeStruct((BP, P), jnp.float32),
        grid=(BP // TB,),
        in_specs=[
            pl.BlockSpec((TB, LPP), lambda i: (i, 0)),        # per-block padded series rows
            pl.BlockSpec(Wsplit.shape, lambda i: (0, 0)),     # constant conv bank (fetched once)
            pl.BlockSpec(slab.shape, lambda i: (0, 0)),       # constant packed params
        ],
        out_specs=pl.BlockSpec((TB, P), lambda i: (i, 0)),
        scratch_shapes=[pltpu.VMEM((TB, 2 * K), jnp.float32)],
        compiler_params=pltpu.CompilerParams(
            dimension_semantics=("parallel",)),               # both TCs on v7x
    )(xa, Wsplit, slab)
    return out[:B]


# --------------------- deterministic parameter generation ---------------------

def make_rocket_params(num_kernels, max_dilation, pred_len, seq_len, seed=1995):
    rng = np.random.default_rng(seed)
    K, L, P = num_kernels, seq_len, pred_len

    lengths = rng.choice(np.array([7, 9, 11]), size=K)
    weights = np.zeros((K, MAXK), np.float32)
    biases = np.zeros((K,), np.float32)
    dilations = np.zeros((K,), np.int32)
    paddings = np.zeros((K,), np.int32)
    n_outs = np.zeros((K,), np.int32)
    for k in range(K):
        l = int(lengths[k])
        w = rng.normal(0.0, 1.0, size=l).astype(np.float32)
        w = w - w.mean()
        weights[k, :l] = w
        biases[k] = np.float32(rng.uniform(-1.0, 1.0))
        d_hi = max(1, min(max_dilation, (seq_len - 1) // (l - 1)))
        d = int(rng.integers(1, d_hi + 1))
        dilations[k] = d
        p = ((l - 1) * d) // 2 if int(rng.integers(0, 2)) == 1 else 0
        paddings[k] = p
        n_outs[k] = seq_len + 2 * p - (l - 1) * d

    max_pad = int(paddings.max())
    S1 = (MAXK - 1) * max_dilation + max_pad + 1   # max tap offset + 1 under the shared left pad
    Lp = L + S1 - 1                                # padded-series length; column Lp carries 1.0
    LPP = _round_up(Lp + 1, 16)                    # sublane-aligned for the bf16 hi/lo halves
    Lc = _round_up(L, 128)                         # lane-dense per-kernel time segment

    # Banded conv-as-matmul weights:
    #   z[b, k*Lc + t] = bias_k + sum_j w[k,j] * xpad[b, t + (max_pad - p_k) + j*d_k]
    Wband = np.zeros((LPP, K * Lc), np.float32)
    for k in range(K):
        l, d, p = int(lengths[k]), int(dilations[k]), int(paddings[k])
        off = max_pad - p
        for j in range(l):
            wkj = weights[k, j]
            for t in range(L):
                Wband[t + off + j * d, k * Lc + t] += wkj
        Wband[Lp, k * Lc:(k + 1) * Lc] = biases[k]   # picked up by the constant-1 input column

    # hi/lo bf16 split (explicit 3-pass conv == Precision.HIGH accuracy at half HIGHEST's cost)
    W32 = jnp.asarray(Wband)
    W_hi = W32.astype(jnp.bfloat16)
    W_lo = (W32 - W_hi.astype(jnp.float32)).astype(jnp.bfloat16)
    Wsplit = jnp.concatenate([W_hi, W_lo], axis=0)   # (2*LPP, K*Lc) bf16

    # ---- LayerNorm / head parameters (reference uses interleaved [ppv_k, max_k] order) --------
    D = 2 * K
    kw, kb = jax.random.split(jax.random.PRNGKey(seed), 2)
    bound = 1.0 / np.sqrt(D)
    w_head = jax.random.uniform(kw, (D, P), jnp.float32, -bound, bound)
    b_head = jax.random.uniform(kb, (1, P), jnp.float32, -bound, bound)
    gamma = np.ones((1, D), np.float32)
    beta = np.zeros((1, D), np.float32)

    # Kernel emits features in concat order [ppv_0..ppv_{K-1}, max_0..max_{K-1}]; permute the
    # affine/head rows once so results match the interleaved convention (LN is perm-equivariant).
    perm = np.concatenate([2 * np.arange(K), 2 * np.arange(K) + 1])
    gamma_c = gamma[:, perm]
    beta_c = beta[:, perm]
    w_head_c = np.asarray(w_head)[perm, :]

    # ---- one packed f32 parameter slab (static-sliced inside the kernel) ----------------------
    R0 = _round_up(K + 4, 8)
    SLAB_W = max(Lc, D, P)
    slab = np.zeros((R0 + D, SLAB_W), np.float32)
    for k in range(K):
        slab[k, :int(n_outs[k])] = 1.0                         # validity mask over time
    slab[K, 0:D] = np.concatenate(
        [1.0 / np.maximum(n_outs.astype(np.float64), 1.0),     # guarded precomputed reciprocal
         np.ones((K,))]).astype(np.float32)
    slab[K + 1, 0:D] = gamma_c[0]
    slab[K + 2, 0:D] = beta_c[0]
    slab[K + 3, 0:P] = np.asarray(b_head)[0]
    slab[R0:R0 + D, 0:P] = w_head_c

    return dict(
        # kernel-side
        Wsplit=Wsplit, slab=jnp.asarray(slab),
        num_kernels=K, pred_len=P, max_pad=max_pad, ones_col=Lp,
        # reference-side (interleaved convention) + metadata
        weights=weights, lengths=lengths, dilations=dilations, paddings=paddings,
        biases=biases, gamma=jnp.asarray(gamma), beta=jnp.asarray(beta),
        w_head=w_head, b_head=b_head, max_dilation=max_dilation,
    )


# ------------------------------ numpy reference --------------------------------

def reference_forward(x, params):
    x = np.asarray(x, np.float32)
    B, L = x.shape
    weights = params["weights"]
    lengths = params["lengths"]
    dil = params["dilations"]
    pad = params["paddings"]
    biases = np.asarray(params["biases"]).reshape(-1)
    K = weights.shape[0]
    feats = np.zeros((B, 2 * K), np.float32)
    for k in range(K):
        l, d, p = int(lengths[k]), int(dil[k]), int(pad[k])
        n_out = L + 2 * p - (l - 1) * d
        xp = np.zeros((B, L + 2 * p), np.float32)
        xp[:, p:p + L] = x
        z = np.full((B, n_out), biases[k], np.float32)
        for j in range(l):
            z = z + weights[k, j] * xp[:, j * d:j * d + n_out]
        feats[:, 2 * k] = (z > 0).sum(axis=1) / np.float32(n_out)       # PPV
        feats[:, 2 * k + 1] = z.max(axis=1)                              # max
    mu = feats.mean(-1, keepdims=True)
    var = ((feats - mu) ** 2).mean(-1, keepdims=True)
    normed = (feats - mu) / np.sqrt(var + 1e-5)
    normed = normed * np.asarray(params["gamma"]) + np.asarray(params["beta"])
    return normed @ np.asarray(params["w_head"]) + np.asarray(params["b_head"])


# ------------------------------------ main -------------------------------------

if __name__ == "__main__":
    B, L = 2, 64
    num_kernels, max_dilation, pred_len = 16, 4, 8
    # TODO(synk): exact RNG stream of the original generate_kernels/apply_kernels (numpy, seed=1995)
    # is not reproducible without its source; ROCKET semantics (centered normal weights, uniform
    # bias, random dilation/padding, PPV+max features) are implemented deterministically instead.
    params = make_rocket_params(num_kernels, max_dilation, pred_len, L, seed=1995)

    x = jax.random.normal(jax.random.PRNGKey(0), (B, L), jnp.float32)

    out = jax.block_until_ready(rocket_forward(x, params))
    assert out.shape == (B, pred_len)

    ref = reference_forward(np.asarray(x), params)
    # Tolerance absorbs the default-(bf16)-precision head matmul; conv runs at ~Precision.HIGH.
    np.testing.assert_allclose(np.asarray(out), ref, rtol=3e-3, atol=3e-3)
    print("KERNEL_OK")
</pallas_src>

<mosaic_0001>
module attributes {stable_mosaic.version = 11 : i64} {
  func.func @_rocket_fused_kernel(%arg0: i32, %arg1: memref<2x128xf32, #tpu.memory_space<vmem>>, %arg2: memref<256x2048xbf16, #tpu.memory_space<vmem>>, %arg3: memref<56x128xf32, #tpu.memory_space<vmem>>, %arg4: memref<2x8xf32, #tpu.memory_space<vmem>>, %arg5: memref<2x32xf32, #tpu.memory_space<vmem>>) attributes {dimension_semantics = [#tpu.dimension_semantics<parallel>], iteration_bounds = array<i64: 1>, scalar_prefetch = 0 : i64, scratch_operands = 1 : i64, tpu.core_type = #tpu.core_type<tc>, window_params = [{transform_indices = @transform_0, window_bounds = array<i64: 2, 128>}, {pipeline_mode = #tpu.pipeline_mode<synchronous>, transform_indices = @transform_1, window_bounds = array<i64: 256, 2048>}, {pipeline_mode = #tpu.pipeline_mode<synchronous>, transform_indices = @transform_2, window_bounds = array<i64: 56, 128>}, {transform_indices = @transform_3, window_bounds = array<i64: 2, 8>}]} {
    %c0 = arith.constant 0 : index
    %c0_0 = arith.constant 0 : index
    %0 = vector.load %arg1[%c0, %c0_0] : memref<2x128xf32, #tpu.memory_space<vmem>>, vector<2x128xf32>
    %1 = arith.truncf %0 : vector<2x128xf32> to vector<2x128xbf16>
    %2 = arith.extf %1 : vector<2x128xbf16> to vector<2x128xf32>
    %3 = arith.subf %0, %2 : vector<2x128xf32>
    %4 = arith.truncf %3 : vector<2x128xf32> to vector<2x128xbf16>
    %c0_1 = arith.constant 0 : index
    %c0_2 = arith.constant 0 : index
    %5 = vector.load %arg2[%c0_1, %c0_2] : memref<256x2048xbf16, #tpu.memory_space<vmem>>, vector<128x2048xbf16>
    %c128 = arith.constant 128 : index
    %c0_3 = arith.constant 0 : index
    %6 = vector.load %arg2[%c128, %c0_3] : memref<256x2048xbf16, #tpu.memory_space<vmem>>, vector<128x2048xbf16>
    %cst = arith.constant dense<0.000000e+00> : vector<2x2048xf32>
    %7 = tpu.matmul %1, %5, %cst {dimension_numbers = #tpu.dot_dimension_numbers<[1], [0], [0], [1], [0, 0, 1, 1], [], []>} : vector<2x128xbf16>, vector<128x2048xbf16>, vector<2x2048xf32> -> vector<2x2048xf32>
    %cst_4 = arith.constant dense<0.000000e+00> : vector<2x2048xf32>
    %8 = tpu.matmul %1, %6, %cst_4 {dimension_numbers = #tpu.dot_dimension_numbers<[1], [0], [0], [1], [0, 0, 1, 1], [], []>} : vector<2x128xbf16>, vector<128x2048xbf16>, vector<2x2048xf32> -> vector<2x2048xf32>
    %9 = arith.addf %7, %8 : vector<2x2048xf32>
    %cst_5 = arith.constant dense<0.000000e+00> : vector<2x2048xf32>
    %10 = tpu.matmul %4, %5, %cst_5 {dimension_numbers = #tpu.dot_dimension_numbers<[1], [0], [0], [1], [0, 0, 1, 1], [], []>} : vector<2x128xbf16>, vector<128x2048xbf16>, vector<2x2048xf32> -> vector<2x2048xf32>
    %11 = arith.addf %9, %10 : vector<2x2048xf32>
    %12 = vector.extract_strided_slice %11 {offsets = [0, 0], sizes = [2, 128], strides = [1, 1]} : vector<2x2048xf32> to vector<2x128xf32>
    %c0_6 = arith.constant 0 : index
    %c0_7 = arith.constant 0 : index
    %13 = vector.load %arg3[%c0_6, %c0_7] : memref<56x128xf32, #tpu.memory_space<vmem>>, vector<1x128xf32>
    %cst_8 = arith.constant 0.000000e+00 : f32
    %14 = vector.broadcast %cst_8 : f32 to vector<2x128xf32>
    %15 = arith.cmpf ogt, %12, %14 : vector<2x128xf32>
    %cst_9 = arith.constant 0.000000e+00 : f32
    %16 = vector.shape_cast %13 : vector<1x128xf32> to vector<1x128xf32>
    %17 = vector.broadcast %16 : vector<1x128xf32> to vector<2x128xf32>
    %18 = vector.broadcast %cst_9 : f32 to vector<2x128xf32>
    %19 = arith.select %15, %17, %18 : vector<2x128xi1>, vector<2x128xf32>
    %cst_10 = arith.constant dense<0.000000e+00> : vector<2xf32>
    %20 = vector.multi_reduction <add>, %19, %cst_10 [1] : vector<2x128xf32> to vector<2xf32>
    %21 = vector.shape_cast %20 : vector<2xf32> to vector<2x1xf32>
    %c0_11 = arith.constant 0 : index
    %c0_12 = arith.constant 0 : index
    %22 = vector.load %arg5[%c0_11, %c0_12] : memref<2x32xf32, #tpu.memory_space<vmem>>, vector<2x1xf32>
    tpu.vector_store %arg5[%c0_11, %c0_12], %21 {strides = array<i32>} : memref<2x32xf32, #tpu.memory_space<vmem>>, vector<2x1xf32>,
    %cst_13 = arith.constant 0.000000e+00 : f32
    %23 = vector.broadcast %cst_13 : f32 to vector<1x128xf32>
    %24 = arith.cmpf ogt, %13, %23 : vector<1x128xf32>
    %cst_14 = arith.constant -3.000000e+38 : f32
    %25 = vector.shape_cast %24 : vector<1x128xi1> to vector<1x128xi1>
    %26 = vector.broadcast %25 : vector<1x128xi1> to vector<2x128xi1>
    %27 = vector.broadcast %cst_14 : f32 to vector<2x128xf32>
    %28 = arith.select %26, %12, %27 : vector<2x128xi1>, vector<2x128xf32>
    %cst_15 = arith.constant dense<0xFF800000> : vector<2xf32>
    %29 = vector.multi_reduction <maximumf>, %28, %cst_15 [1] : vector<2x128xf32> to vector<2xf32>
    %30 = vector.shape_cast %29 : vector<2xf32> to vector<2x1xf32>
    %c0_16 = arith.constant 0 : index
    %c16 = arith.constant 16 : index
    %31 = vector.load %arg5[%c0_16, %c16] : memref<2x32xf32, #tpu.memory_space<vmem>>, vector<2x1xf32>
    tpu.vector_store %arg5[%c0_16, %c16], %30 {strides = array<i32>} : memref<2x32xf32, #tpu.memory_space<vmem>>, vector<2x1xf32>,
    %32 = vector.extract_strided_slice %11 {offsets = [0, 128], sizes = [2, 128], strides = [1, 1]} : vector<2x2048xf32> to vector<2x128xf32>
    %c1 = arith.constant 1 : index
    %c0_17 = arith.constant 0 : index
    %33 = vector.load %arg3[%c1, %c0_17] : memref<56x128xf32, #tpu.memory_space<vmem>>, vector<1x128xf32>
    %cst_18 = arith.constant 0.000000e+00 : f32
    %34 = vector.broadcast %cst_18 : f32 to vector<2x128xf32>
    %35 = arith.cmpf ogt, %32, %34 : vector<2x128xf32>
    %cst_19 = arith.constant 0.000000e+00 : f32
    %36 = vector.shape_cast %33 : vector<1x128xf32> to vector<1x128xf32>
    %37 = vector.broadcast %36 : vector<1x128xf32> to vector<2x128xf32>
    %38 = vector.broadcast %cst_19 : f32 to vector<2x128xf32>
    %39 = arith.select %35, %37, %38 : vector<2x128xi1>, vector<2x128xf32>
    %cst_20 = arith.constant dense<0.000000e+00> : vector<2xf32>
    %40 = vector.multi_reduction <add>, %39, %cst_20 [1] : vector<2x128xf32> to vector<2xf32>
    %41 = vector.shape_cast %40 : vector<2xf32> to vector<2x1xf32>
    %c0_21 = arith.constant 0 : index
    %c1_22 = arith.constant 1 : index
    %42 = vector.load %arg5[%c0_21, %c1_22] : memref<2x32xf32, #tpu.memory_space<vmem>>, vector<2x1xf32>
    tpu.vector_store %arg5[%c0_21, %c1_22], %41 {strides = array<i32>} : memref<2x32xf32, #tpu.memory_space<vmem>>, vector<2x1xf32>,
    %cst_23 = arith.constant 0.000000e+00 : f32
    %43 = vector.broadcast %cst_23 : f32 to vector<1x128xf32>
    %44 = arith.cmpf ogt, %33, %43 : vector<1x128xf32>
    %cst_24 = arith.constant -3.000000e+38 : f32
    %45 = vector.shape_cast %44 : vector<1x128xi1> to vector<1x128xi1>
    %46 = vector.broadcast %45 : vector<1x128xi1> to vector<2x128xi1>
    %47 = vector.broadcast %cst_24 : f32 to vector<2x128xf32>
    %48 = arith.select %46, %32, %47 : vector<2x128xi1>, vector<2x128xf32>
    %cst_25 = arith.constant dense<0xFF800000> : vector<2xf32>
    %49 = vector.multi_reduction <maximumf>, %48, %cst_25 [1] : vector<2x128xf32> to vector<2xf32>
    %50 = vector.shape_cast %49 : vector<2xf32> to vector<2x1xf32>
    %c0_26 = arith.constant 0 : index
    %c17 = arith.constant 17 : index
    %51 = vector.load %arg5[%c0_26, %c17] : memref<2x32xf32, #tpu.memory_space<vmem>>, vector<2x1xf32>
    tpu.vector_store %arg5[%c0_26, %c17], %50 {strides = array<i32>} : memref<2x32xf32, #tpu.memory_space<vmem>>, vector<2x1xf32>,
    %52 = vector.extract_strided_slice %11 {offsets = [0, 256], sizes = [2, 128], strides = [1, 1]} : vector<2x2048xf32> to vector<2x128xf32>
    %c2 = arith.constant 2 : index
    %c0_27 = arith.constant 0 : index
    %53 = vector.load %arg3[%c2, %c0_27] : memref<56x128xf32, #tpu.memory_space<vmem>>, vector<1x128xf32>
    %cst_28 = arith.constant 0.000000e+00 : f32
    %54 = vector.broadcast %cst_28 : f32 to vector<2x128xf32>
    %55 = arith.cmpf ogt, %52, %54 : vector<2x128xf32>
    %cst_29 = arith.constant 0.000000e+00 : f32
    %56 = vector.shape_cast %53 : vector<1x128xf32> to vector<1x128xf32>
    %57 = vector.broadcast %56 : vector<1x128xf32> to vector<2x128xf32>
    %58 = vector.broadcast %cst_29 : f32 to vector<2x128xf32>
    %59 = arith.select %55, %57, %58 : vector<2x128xi1>, vector<2x128xf32>
    %cst_30 = arith.constant dense<0.000000e+00> : vector<2xf32>
    %60 = vector.multi_reduction <add>, %59, %cst_30 [1] : vector<2x128xf32> to vector<2xf32>
    %61 = vector.shape_cast %60 : vector<2xf32> to vector<2x1xf32>
    %c0_31 = arith.constant 0 : index
    %c2_32 = arith.constant 2 : index
    %62 = vector.load %arg5[%c0_31, %c2_32] : memref<2x32xf32, #tpu.memory_space<vmem>>, vector<2x1xf32>
    tpu.vector_store %arg5[%c0_31, %c2_32], %61 {strides = array<i32>} : memref<2x32xf32, #tpu.memory_space<vmem>>, vector<2x1xf32>,
    %cst_33 = arith.constant 0.000000e+00 : f32
    %63 = vector.broadcast %cst_33 : f32 to vector<1x128xf32>
    %64 = arith.cmpf ogt, %53, %63 : vector<1x128xf32>
    %cst_34 = arith.constant -3.000000e+38 : f32
    %65 = vector.shape_cast %64 : vector<1x128xi1> to vector<1x128xi1>
    %66 = vector.broadcast %65 : vector<1x128xi1> to vector<2x128xi1>
    %67 = vector.broadcast %cst_34 : f32 to vector<2x128xf32>
    %68 = arith.select %66, %52, %67 : vector<2x128xi1>, vector<2x128xf32>
    %cst_35 = arith.constant dense<0xFF800000> : vector<2xf32>
    %69 = vector.multi_reduction <maximumf>, %68, %cst_35 [1] : vector<2x128xf32> to vector<2xf32>
    %70 = vector.shape_cast %69 : vector<2xf32> to vector<2x1xf32>
    %c0_36 = arith.constant 0 : index
    %c18 = arith.constant 18 : index
    %71 = vector.load %arg5[%c0_36, %c18] : memref<2x32xf32, #tpu.memory_space<vmem>>, vector<2x1xf32>
    tpu.vector_store %arg5[%c0_36, %c18], %70 {strides = array<i32>} : memref<2x32xf32, #tpu.memory_space<vmem>>, vector<2x1xf32>,
    %72 = vector.extract_strided_slice %11 {offsets = [0, 384], sizes = [2, 128], strides = [1, 1]} : vector<2x2048xf32> to vector<2x128xf32>
    %c3 = arith.constant 3 : index
    %c0_37 = arith.constant 0 : index
    %73 = vector.load %arg3[%c3, %c0_37] : memref<56x128xf32, #tpu.memory_space<vmem>>, vector<1x128xf32>
    %cst_38 = arith.constant 0.000000e+00 : f32
    %74 = vector.broadcast %cst_38 : f32 to vector<2x128xf32>
    %75 = arith.cmpf ogt, %72, %74 : vector<2x128xf32>
    %cst_39 = arith.constant 0.000000e+00 : f32
    %76 = vector.shape_cast %73 : vector<1x128xf32> to vector<1x128xf32>
    %77 = vector.broadcast %76 : vector<1x128xf32> to vector<2x128xf32>
    %78 = vector.broadcast %cst_39 : f32 to vector<2x128xf32>
    %79 = arith.select %75, %77, %78 : vector<2x128xi1>, vector<2x128xf32>
    %cst_40 = arith.constant dense<0.000000e+00> : vector<2xf32>
    %80 = vector.multi_reduction <add>, %79, %cst_40 [1] : vector<2x128xf32> to vector<2xf32>
    %81 = vector.shape_cast %80 : vector<2xf32> to vector<2x1xf32>
    %c0_41 = arith.constant 0 : index
    %c3_42 = arith.constant 3 : index
    %82 = vector.load %arg5[%c0_41, %c3_42] : memref<2x32xf32, #tpu.memory_space<vmem>>, vector<2x1xf32>
    tpu.vector_store %arg5[%c0_41, %c3_42], %81 {strides = array<i32>} : memref<2x32xf32, #tpu.memory_space<vmem>>, vector<2x1xf32>,
    %cst_43 = arith.constant 0.000000e+00 : f32
    %83 = vector.broadcast %cst_43 : f32 to vector<1x128xf32>
    %84 = arith.cmpf ogt, %73, %83 : vector<1x128xf32>
    %cst_44 = arith.constant -3.000000e+38 : f32
    %85 = vector.shape_cast %84 : vector<1x128xi1> to vector<1x128xi1>
    %86 = vector.broadcast %85 : vector<1x128xi1> to vector<2x128xi1>
    %87 = vector.broadcast %cst_44 : f32 to vector<2x128xf32>
    %88 = arith.select %86, %72, %87 : vector<2x128xi1>, vector<2x128xf32>
    %cst_45 = arith.constant dense<0xFF800000> : vector<2xf32>
    %89 = vector.multi_reduction <maximumf>, %88, %cst_45 [1] : vector<2x128xf32> to vector<2xf32>
    %90 = vector.shape_cast %89 : vector<2xf32> to vector<2x1xf32>
    %c0_46 = arith.constant 0 : index
    %c19 = arith.constant 19 : index
    %91 = vector.load %arg5[%c0_46, %c19] : memref<2x32xf32, #tpu.memory_space<vmem>>, vector<2x1xf32>
    tpu.vector_store %arg5[%c0_46, %c19], %90 {strides = array<i32>} : memref<2x32xf32, #tpu.memory_space<vmem>>, vector<2x1xf32>,
    %92 = vector.extract_strided_slice %11 {offsets = [0, 512], sizes = [2, 128], strides = [1, 1]} : vector<2x2048xf32> to vector<2x128xf32>
    %c4 = arith.constant 4 : index
    %c0_47 = arith.constant 0 : index
    %93 = vector.load %arg3[%c4, %c0_47] : memref<56x128xf32, #tpu.memory_space<vmem>>, vector<1x128xf32>
    %cst_48 = arith.constant 0.000000e+00 : f32
    %94 = vector.broadcast %cst_48 : f32 to vector<2x128xf32>
    %95 = arith.cmpf ogt, %92, %94 : vector<2x128xf32>
    %cst_49 = arith.constant 0.000000e+00 : f32
    %96 = vector.shape_cast %93 : vector<1x128xf32> to vector<1x128xf32>
    %97 = vector.broadcast %96 : vector<1x128xf32> to vector<2x128xf32>
    %98 = vector.broadcast %cst_49 : f32 to vector<2x128xf32>
    %99 = arith.select %95, %97, %98 : vector<2x128xi1>, vector<2x128xf32>
    %cst_50 = arith.constant dense<0.000000e+00> : vector<2xf32>
    %100 = vector.multi_reduction <add>, %99, %cst_50 [1] : vector<2x128xf32> to vector<2xf32>
    %101 = vector.shape_cast %100 : vector<2xf32> to vector<2x1xf32>
    %c0_51 = arith.constant 0 : index
    %c4_52 = arith.constant 4 : index
    %102 = vector.load %arg5[%c0_51, %c4_52] : memref<2x32xf32, #tpu.memory_space<vmem>>, vector<2x1xf32>
    tpu.vector_store %arg5[%c0_51, %c4_52], %101 {strides = array<i32>} : memref<2x32xf32, #tpu.memory_space<vmem>>, vector<2x1xf32>,
    %cst_53 = arith.constant 0.000000e+00 : f32
    %103 = vector.broadcast %cst_53 : f32 to vector<1x128xf32>
    %104 = arith.cmpf ogt, %93, %103 : vector<1x128xf32>
    %cst_54 = arith.constant -3.000000e+38 : f32
    %105 = vector.shape_cast %104 : vector<1x128xi1> to vector<1x128xi1>
    %106 = vector.broadcast %105 : vector<1x128xi1> to vector<2x128xi1>
    %107 = vector.broadcast %cst_54 : f32 to vector<2x128xf32>
    %108 = arith.select %106, %92, %107 : vector<2x128xi1>, vector<2x128xf32>
    %cst_55 = arith.constant dense<0xFF800000> : vector<2xf32>
    %109 = vector.multi_reduction <maximumf>, %108, %cst_55 [1] : vector<2x128xf32> to vector<2xf32>
    %110 = vector.shape_cast %109 : vector<2xf32> to vector<2x1xf32>
    %c0_56 = arith.constant 0 : index
    %c20 = arith.constant 20 : index
    %111 = vector.load %arg5[%c0_56, %c20] : memref<2x32xf32, #tpu.memory_space<vmem>>, vector<2x1xf32>
    tpu.vector_store %arg5[%c0_56, %c20], %110 {strides = array<i32>} : memref<2x32xf32, #tpu.memory_space<vmem>>, vector<2x1xf32>,
    %112 = vector.extract_strided_slice %11 {offsets = [0, 640], sizes = [2, 128], strides = [1, 1]} : vector<2x2048xf32> to vector<2x128xf32>
    %c5 = arith.constant 5 : index
    %c0_57 = arith.constant 0 : index
    %113 = vector.load %arg3[%c5, %c0_57] : memref<56x128xf32, #tpu.memory_space<vmem>>, vector<1x128xf32>
    %cst_58 = arith.constant 0.000000e+00 : f32
    %114 = vector.broadcast %cst_58 : f32 to vector<2x128xf32>
    %115 = arith.cmpf ogt, %112, %114 : vector<2x128xf32>
    %cst_59 = arith.constant 0.000000e+00 : f32
    %116 = vector.shape_cast %113 : vector<1x128xf32> to vector<1x128xf32>
    %117 = vector.broadcast %116 : vector<1x128xf32> to vector<2x128xf32>
    %118 = vector.broadcast %cst_59 : f32 to vector<2x128xf32>
    %119 = arith.select %115, %117, %118 : vector<2x128xi1>, vector<2x128xf32>
    %cst_60 = arith.constant dense<0.000000e+00> : vector<2xf32>
    %120 = vector.multi_reduction <add>, %119, %cst_60 [1] : vector<2x128xf32> to vector<2xf32>
    %121 = vector.shape_cast %120 : vector<2xf32> to vector<2x1xf32>
    %c0_61 = arith.constant 0 : index
    %c5_62 = arith.constant 5 : index
    %122 = vector.load %arg5[%c0_61, %c5_62] : memref<2x32xf32, #tpu.memory_space<vmem>>, vector<2x1xf32>
    tpu.vector_store %arg5[%c0_61, %c5_62], %121 {strides = array<i32>} : memref<2x32xf32, #tpu.memory_space<vmem>>, vector<2x1xf32>,
    %cst_63 = arith.constant 0.000000e+00 : f32
    %123 = vector.broadcast %cst_63 : f32 to vector<1x128xf32>
    %124 = arith.cmpf ogt, %113, %123 : vector<1x128xf32>
    %cst_64 = arith.constant -3.000000e+38 : f32
    %125 = vector.shape_cast %124 : vector<1x128xi1> to vector<1x128xi1>
    %126 = vector.broadcast %125 : vector<1x128xi1> to vector<2x128xi1>
    %127 = vector.broadcast %cst_64 : f32 to vector<2x128xf32>
    %128 = arith.select %126, %112, %127 : vector<2x128xi1>, vector<2x128xf32>
    %cst_65 = arith.constant dense<0xFF800000> : vector<2xf32>
    %129 = vector.multi_reduction <maximumf>, %128, %cst_65 [1] : vector<2x128xf32> to vector<2xf32>
    %130 = vector.shape_cast %129 : vector<2xf32> to vector<2x1xf32>
    %c0_66 = arith.constant 0 : index
    %c21 = arith.constant 21 : index
    %131 = vector.load %arg5[%c0_66, %c21] : memref<2x32xf32, #tpu.memory_space<vmem>>, vector<2x1xf32>
    tpu.vector_store %arg5[%c0_66, %c21], %130 {strides = array<i32>} : memref<2x32xf32, #tpu.memory_space<vmem>>, vector<2x1xf32>,
    %132 = vector.extract_strided_slice %11 {offsets = [0, 768], sizes = [2, 128], strides = [1, 1]} : vector<2x2048xf32> to vector<2x128xf32>
    %c6 = arith.constant 6 : index
    %c0_67 = arith.constant 0 : index
    %133 = vector.load %arg3[%c6, %c0_67] : memref<56x128xf32, #tpu.memory_space<vmem>>, vector<1x128xf32>
    %cst_68 = arith.constant 0.000000e+00 : f32
    %134 = vector.broadcast %cst_68 : f32 to vector<2x128xf32>
    %135 = arith.cmpf ogt, %132, %134 : vector<2x128xf32>
    %cst_69 = arith.constant 0.000000e+00 : f32
    %136 = vector.shape_cast %133 : vector<1x128xf32> to vector<1x128xf32>
    %137 = vector.broadcast %136 : vector<1x128xf32> to vector<2x128xf32>
    %138 = vector.broadcast %cst_69 : f32 to vector<2x128xf32>
    %139 = arith.select %135, %137, %138 : vector<2x128xi1>, vector<2x128xf32>
    %cst_70 = arith.constant dense<0.000000e+00> : vector<2xf32>
    %140 = vector.multi_reduction <add>, %139, %cst_70 [1] : vector<2x128xf32> to vector<2xf32>
    %141 = vector.shape_cast %140 : vector<2xf32> to vector<2x1xf32>
    %c0_71 = arith.constant 0 : index
    %c6_72 = arith.constant 6 : index
    %142 = vector.load %arg5[%c0_71, %c6_72] : memref<2x32xf32, #tpu.memory_space<vmem>>, vector<2x1xf32>
    tpu.vector_store %arg5[%c0_71, %c6_72], %141 {strides = array<i32>} : memref<2x32xf32, #tpu.memory_space<vmem>>, vector<2x1xf32>,
    %cst_73 = arith.constant 0.000000e+00 : f32
    %143 = vector.broadcast %cst_73 : f32 to vector<1x128xf32>
    %144 = arith.cmpf ogt, %133, %143 : vector<1x128xf32>
    %cst_74 = arith.constant -3.000000e+38 : f32
    %145 = vector.shape_cast %144 : vector<1x128xi1> to vector<1x128xi1>
    %146 = vector.broadcast %145 : vector<1x128xi1> to vector<2x128xi1>
    %147 = vector.broadcast %cst_74 : f32 to vector<2x128xf32>
    %148 = arith.select %146, %132, %147 : vector<2x128xi1>, vector<2x128xf32>
    %cst_75 = arith.constant dense<0xFF800000> : vector<2xf32>
    %149 = vector.multi_reduction <maximumf>, %148, %cst_75 [1] : vector<2x128xf32> to vector<2xf32>
    %150 = vector.shape_cast %149 : vector<2xf32> to vector<2x1xf32>
    %c0_76 = arith.constant 0 : index
    %c22 = arith.constant 22 : index
    %151 = vector.load %arg5[%c0_76, %c22] : memref<2x32xf32, #tpu.memory_space<vmem>>, vector<2x1xf32>
    tpu.vector_store %arg5[%c0_76, %c22], %150 {strides = array<i32>} : memref<2x32xf32, #tpu.memory_space<vmem>>, vector<2x1xf32>,
    %152 = vector.extract_strided_slice %11 {offsets = [0, 896], sizes = [2, 128], strides = [1, 1]} : vector<2x2048xf32> to vector<2x128xf32>
    %c7 = arith.constant 7 : index
    %c0_77 = arith.constant 0 : index
    %153 = vector.load %arg3[%c7, %c0_77] : memref<56x128xf32, #tpu.memory_space<vmem>>, vector<1x128xf32>
    %cst_78 = arith.constant 0.000000e+00 : f32
    %154 = vector.broadcast %cst_78 : f32 to vector<2x128xf32>
    %155 = arith.cmpf ogt, %152, %154 : vector<2x128xf32>
    %cst_79 = arith.constant 0.000000e+00 : f32
    %156 = vector.shape_cast %153 : vector<1x128xf32> to vector<1x128xf32>
    %157 = vector.broadcast %156 : vector<1x128xf32> to vector<2x128xf32>
    %158 = vector.broadcast %cst_79 : f32 to vector<2x128xf32>
    %159 = arith.select %155, %157, %158 : vector<2x128xi1>, vector<2x128xf32>
    %cst_80 = arith.constant dense<0.000000e+00> : vector<2xf32>
    %160 = vector.multi_reduction <add>, %159, %cst_80 [1] : vector<2x128xf32> to vector<2xf32>
    %161 = vector.shape_cast %160 : vector<2xf32> to vector<2x1xf32>
    %c0_81 = arith.constant 0 : index
    %c7_82 = arith.constant 7 : index
    %162 = vector.load %arg5[%c0_81, %c7_82] : memref<2x32xf32, #tpu.memory_space<vmem>>, vector<2x1xf32>
    tpu.vector_store %arg5[%c0_81, %c7_82], %161 {strides = array<i32>} : memref<2x32xf32, #tpu.memory_space<vmem>>, vector<2x1xf32>,
    %cst_83 = arith.constant 0.000000e+00 : f32
    %163 = vector.broadcast %cst_83 : f32 to vector<1x128xf32>
    %164 = arith.cmpf ogt, %153, %163 : vector<1x128xf32>
    %cst_84 = arith.constant -3.000000e+38 : f32
    %165 = vector.shape_cast %164 : vector<1x128xi1> to vector<1x128xi1>
    %166 = vector.broadcast %165 : vector<1x128xi1> to vector<2x128xi1>
    %167 = vector.broadcast %cst_84 : f32 to vector<2x128xf32>
    %168 = arith.select %166, %152, %167 : vector<2x128xi1>, vector<2x128xf32>
    %cst_85 = arith.constant dense<0xFF800000> : vector<2xf32>
    %169 = vector.multi_reduction <maximumf>, %168, %cst_85 [1] : vector<2x128xf32> to vector<2xf32>
    %170 = vector.shape_cast %169 : vector<2xf32> to vector<2x1xf32>
    %c0_86 = arith.constant 0 : index
    %c23 = arith.constant 23 : index
    %171 = vector.load %arg5[%c0_86, %c23] : memref<2x32xf32, #tpu.memory_space<vmem>>, vector<2x1xf32>
    tpu.vector_store %arg5[%c0_86, %c23], %170 {strides = array<i32>} : memref<2x32xf32, #tpu.memory_space<vmem>>, vector<2x1xf32>,
    %172 = vector.extract_strided_slice %11 {offsets = [0, 1024], sizes = [2, 128], strides = [1, 1]} : vector<2x2048xf32> to vector<2x128xf32>
    %c8 = arith.constant 8 : index
    %c0_87 = arith.constant 0 : index
    %173 = vector.load %arg3[%c8, %c0_87] : memref<56x128xf32, #tpu.memory_space<vmem>>, vector<1x128xf32>
    %cst_88 = arith.constant 0.000000e+00 : f32
    %174 = vector.broadcast %cst_88 : f32 to vector<2x128xf32>
    %175 = arith.cmpf ogt, %172, %174 : vector<2x128xf32>
    %cst_89 = arith.constant 0.000000e+00 : f32
    %176 = vector.shape_cast %173 : vector<1x128xf32> to vector<1x128xf32>
    %177 = vector.broadcast %176 : vector<1x128xf32> to vector<2x128xf32>
    %178 = vector.broadcast %cst_89 : f32 to vector<2x128xf32>
    %179 = arith.select %175, %177, %178 : vector<2x128xi1>, vector<2x128xf32>
    %cst_90 = arith.constant dense<0.000000e+00> : vector<2xf32>
    %180 = vector.multi_reduction <add>, %179, %cst_90 [1] : vector<2x128xf32> to vector<2xf32>
    %181 = vector.shape_cast %180 : vector<2xf32> to vector<2x1xf32>
    %c0_91 = arith.constant 0 : index
    %c8_92 = arith.constant 8 : index
    %182 = vector.load %arg5[%c0_91, %c8_92] : memref<2x32xf32, #tpu.memory_space<vmem>>, vector<2x1xf32>
    tpu.vector_store %arg5[%c0_91, %c8_92], %181 {strides = array<i32>} : memref<2x32xf32, #tpu.memory_space<vmem>>, vector<2x1xf32>,
    %cst_93 = arith.constant 0.000000e+00 : f32
    %183 = vector.broadcast %cst_93 : f32 to vector<1x128xf32>
    %184 = arith.cmpf ogt, %173, %183 : vector<1x128xf32>
    %cst_94 = arith.constant -3.000000e+38 : f32
    %185 = vector.shape_cast %184 : vector<1x128xi1> to vector<1x128xi1>
    %186 = vector.broadcast %185 : vector<1x128xi1> to vector<2x128xi1>
    %187 = vector.broadcast %cst_94 : f32 to vector<2x128xf32>
    %188 = arith.select %186, %172, %187 : vector<2x128xi1>, vector<2x128xf32>
    %cst_95 = arith.constant dense<0xFF800000> : vector<2xf32>
    %189 = vector.multi_reduction <maximumf>, %188, %cst_95 [1] : vector<2x128xf32> to vector<2xf32>
    %190 = vector.shape_cast %189 : vector<2xf32> to vector<2x1xf32>
    %c0_96 = arith.constant 0 : index
    %c24 = arith.constant 24 : index
    %191 = vector.load %arg5[%c0_96, %c24] : memref<2x32xf32, #tpu.memory_space<vmem>>, vector<2x1xf32>
    tpu.vector_store %arg5[%c0_96, %c24], %190 {strides = array<i32>} : memref<2x32xf32, #tpu.memory_space<vmem>>, vector<2x1xf32>,
    %192 = vector.extract_strided_slice %11 {offsets = [0, 1152], sizes = [2, 128], strides = [1, 1]} : vector<2x2048xf32> to vector<2x128xf32>
    %c9 = arith.constant 9 : index
    %c0_97 = arith.constant 0 : index
    %193 = vector.load %arg3[%c9, %c0_97] : memref<56x128xf32, #tpu.memory_space<vmem>>, vector<1x128xf32>
    %cst_98 = arith.constant 0.000000e+00 : f32
    %194 = vector.broadcast %cst_98 : f32 to vector<2x128xf32>
    %195 = arith.cmpf ogt, %192, %194 : vector<2x128xf32>
    %cst_99 = arith.constant 0.000000e+00 : f32
    %196 = vector.shape_cast %193 : vector<1x128xf32> to vector<1x128xf32>
    %197 = vector.broadcast %196 : vector<1x128xf32> to vector<2x128xf32>
    %198 = vector.broadcast %cst_99 : f32 to vector<2x128xf32>
    %199 = arith.select %195, %197, %198 : vector<2x128xi1>, vector<2x128xf32>
    %cst_100 = arith.constant dense<0.000000e+00> : vector<2xf32>
    %200 = vector.multi_reduction <add>, %199, %cst_100 [1] : vector<2x128xf32> to vector<2xf32>
    %201 = vector.shape_cast %200 : vector<2xf32> to vector<2x1xf32>
    %c0_101 = arith.constant 0 : index
    %c9_102 = arith.constant 9 : index
    %202 = vector.load %arg5[%c0_101, %c9_102] : memref<2x32xf32, #tpu.memory_space<vmem>>, vector<2x1xf32>
    tpu.vector_store %arg5[%c0_101, %c9_102], %201 {strides = array<i32>} : memref<2x32xf32, #tpu.memory_space<vmem>>, vector<2x1xf32>,
    %cst_103 = arith.constant 0.000000e+00 : f32
    %203 = vector.broadcast %cst_103 : f32 to vector<1x128xf32>
    %204 = arith.cmpf ogt, %193, %203 : vector<1x128xf32>
    %cst_104 = arith.constant -3.000000e+38 : f32
    %205 = vector.shape_cast %204 : vector<1x128xi1> to vector<1x128xi1>
    %206 = vector.broadcast %205 : vector<1x128xi1> to vector<2x128xi1>
    %207 = vector.broadcast %cst_104 : f32 to vector<2x128xf32>
    %208 = arith.select %206, %192, %207 : vector<2x128xi1>, vector<2x128xf32>
    %cst_105 = arith.constant dense<0xFF800000> : vector<2xf32>
    %209 = vector.multi_reduction <maximumf>, %208, %cst_105 [1] : vector<2x128xf32> to vector<2xf32>
    %210 = vector.shape_cast %209 : vector<2xf32> to vector<2x1xf32>
    %c0_106 = arith.constant 0 : index
    %c25 = arith.constant 25 : index
    %211 = vector.load %arg5[%c0_106, %c25] : memref<2x32xf32, #tpu.memory_space<vmem>>, vector<2x1xf32>
    tpu.vector_store %arg5[%c0_106, %c25], %210 {strides = array<i32>} : memref<2x32xf32, #tpu.memory_space<vmem>>, vector<2x1xf32>,
    %212 = vector.extract_strided_slice %11 {offsets = [0, 1280], sizes = [2, 128], strides = [1, 1]} : vector<2x2048xf32> to vector<2x128xf32>
    %c10 = arith.constant 10 : index
    %c0_107 = arith.constant 0 : index
    %213 = vector.load %arg3[%c10, %c0_107] : memref<56x128xf32, #tpu.memory_space<vmem>>, vector<1x128xf32>
    %cst_108 = arith.constant 0.000000e+00 : f32
    %214 = vector.broadcast %cst_108 : f32 to vector<2x128xf32>
    %215 = arith.cmpf ogt, %212, %214 : vector<2x128xf32>
    %cst_109 = arith.constant 0.000000e+00 : f32
    %216 = vector.shape_cast %213 : vector<1x128xf32> to vector<1x128xf32>
    %217 = vector.broadcast %216 : vector<1x128xf32> to vector<2x128xf32>
    %218 = vector.broadcast %cst_109 : f32 to vector<2x128xf32>
    %219 = arith.select %215, %217, %218 : vector<2x128xi1>, vector<2x128xf32>
    %cst_110 = arith.constant dense<0.000000e+00> : vector<2xf32>
    %220 = vector.multi_reduction <add>, %219, %cst_110 [1] : vector<2x128xf32> to vector<2xf32>
    %221 = vector.shape_cast %220 : vector<2xf32> to vector<2x1xf32>
    %c0_111 = arith.constant 0 : index
    %c10_112 = arith.constant 10 : index
    %222 = vector.load %arg5[%c0_111, %c10_112] : memref<2x32xf32, #tpu.memory_space<vmem>>, vector<2x1xf32>
    tpu.vector_store %arg5[%c0_111, %c10_112], %221 {strides = array<i32>} : memref<2x32xf32, #tpu.memory_space<vmem>>, vector<2x1xf32>,
    %cst_113 = arith.constant 0.000000e+00 : f32
    %223 = vector.broadcast %cst_113 : f32 to vector<1x128xf32>
    %224 = arith.cmpf ogt, %213, %223 : vector<1x128xf32>
    %cst_114 = arith.constant -3.000000e+38 : f32
    %225 = vector.shape_cast %224 : vector<1x128xi1> to vector<1x128xi1>
    %226 = vector.broadcast %225 : vector<1x128xi1> to vector<2x128xi1>
    %227 = vector.broadcast %cst_114 : f32 to vector<2x128xf32>
    %228 = arith.select %226, %212, %227 : vector<2x128xi1>, vector<2x128xf32>
    %cst_115 = arith.constant dense<0xFF800000> : vector<2xf32>
    %229 = vector.multi_reduction <maximumf>, %228, %cst_115 [1] : vector<2x128xf32> to vector<2xf32>
    %230 = vector.shape_cast %229 : vector<2xf32> to vector<2x1xf32>
    %c0_116 = arith.constant 0 : index
    %c26 = arith.constant 26 : index
    %231 = vector.load %arg5[%c0_116, %c26] : memref<2x32xf32, #tpu.memory_space<vmem>>, vector<2x1xf32>
    tpu.vector_store %arg5[%c0_116, %c26], %230 {strides = array<i32>} : memref<2x32xf32, #tpu.memory_space<vmem>>, vector<2x1xf32>,
    %232 = vector.extract_strided_slice %11 {offsets = [0, 1408], sizes = [2, 128], strides = [1, 1]} : vector<2x2048xf32> to vector<2x128xf32>
    %c11 = arith.constant 11 : index
    %c0_117 = arith.constant 0 : index
    %233 = vector.load %arg3[%c11, %c0_117] : memref<56x128xf32, #tpu.memory_space<vmem>>, vector<1x128xf32>
    %cst_118 = arith.constant 0.000000e+00 : f32
    %234 = vector.broadcast %cst_118 : f32 to vector<2x128xf32>
    %235 = arith.cmpf ogt, %232, %234 : vector<2x128xf32>
    %cst_119 = arith.constant 0.000000e+00 : f32
    %236 = vector.shape_cast %233 : vector<1x128xf32> to vector<1x128xf32>
    %237 = vector.broadcast %236 : vector<1x128xf32> to vector<2x128xf32>
    %238 = vector.broadcast %cst_119 : f32 to vector<2x128xf32>
    %239 = arith.select %235, %237, %238 : vector<2x128xi1>, vector<2x128xf32>
    %cst_120 = arith.constant dense<0.000000e+00> : vector<2xf32>
    %240 = vector.multi_reduction <add>, %239, %cst_120 [1] : vector<2x128xf32> to vector<2xf32>
    %241 = vector.shape_cast %240 : vector<2xf32> to vector<2x1xf32>
    %c0_121 = arith.constant 0 : index
    %c11_122 = arith.constant 11 : index
    %242 = vector.load %arg5[%c0_121, %c11_122] : memref<2x32xf32, #tpu.memory_space<vmem>>, vector<2x1xf32>
    tpu.vector_store %arg5[%c0_121, %c11_122], %241 {strides = array<i32>} : memref<2x32xf32, #tpu.memory_space<vmem>>, vector<2x1xf32>,
    %cst_123 = arith.constant 0.000000e+00 : f32
    %243 = vector.broadcast %cst_123 : f32 to vector<1x128xf32>
    %244 = arith.cmpf ogt, %233, %243 : vector<1x128xf32>
    %cst_124 = arith.constant -3.000000e+38 : f32
    %245 = vector.shape_cast %244 : vector<1x128xi1> to vector<1x128xi1>
    %246 = vector.broadcast %245 : vector<1x128xi1> to vector<2x128xi1>
    %247 = vector.broadcast %cst_124 : f32 to vector<2x128xf32>
    %248 = arith.select %246, %232, %247 : vector<2x128xi1>, vector<2x128xf32>
    %cst_125 = arith.constant dense<0xFF800000> : vector<2xf32>
    %249 = vector.multi_reduction <maximumf>, %248, %cst_125 [1] : vector<2x128xf32> to vector<2xf32>
    %250 = vector.shape_cast %249 : vector<2xf32> to vector<2x1xf32>
    %c0_126 = arith.constant 0 : index
    %c27 = arith.constant 27 : index
    %251 = vector.load %arg5[%c0_126, %c27] : memref<2x32xf32, #tpu.memory_space<vmem>>, vector<2x1xf32>
    tpu.vector_store %arg5[%c0_126, %c27], %250 {strides = array<i32>} : memref<2x32xf32, #tpu.memory_space<vmem>>, vector<2x1xf32>,
    %252 = vector.extract_strided_slice %11 {offsets = [0, 1536], sizes = [2, 128], strides = [1, 1]} : vector<2x2048xf32> to vector<2x128xf32>
    %c12 = arith.constant 12 : index
    %c0_127 = arith.constant 0 : index
    %253 = vector.load %arg3[%c12, %c0_127] : memref<56x128xf32, #tpu.memory_space<vmem>>, vector<1x128xf32>
    %cst_128 = arith.constant 0.000000e+00 : f32
    %254 = vector.broadcast %cst_128 : f32 to vector<2x128xf32>
    %255 = arith.cmpf ogt, %252, %254 : vector<2x128xf32>
    %cst_129 = arith.constant 0.000000e+00 : f32
    %256 = vector.shape_cast %253 : vector<1x128xf32> to vector<1x128xf32>
    %257 = vector.broadcast %256 : vector<1x128xf32> to vector<2x128xf32>
    %258 = vector.broadcast %cst_129 : f32 to vector<2x128xf32>
    %259 = arith.select %255, %257, %258 : vector<2x128xi1>, vector<2x128xf32>
    %cst_130 = arith.constant dense<0.000000e+00> : vector<2xf32>
    %260 = vector.multi_reduction <add>, %259, %cst_130 [1] : vector<2x128xf32> to vector<2xf32>
    %261 = vector.shape_cast %260 : vector<2xf32> to vector<2x1xf32>
    %c0_131 = arith.constant 0 : index
    %c12_132 = arith.constant 12 : index
    %262 = vector.load %arg5[%c0_131, %c12_132] : memref<2x32xf32, #tpu.memory_space<vmem>>, vector<2x1xf32>
    tpu.vector_store %arg5[%c0_131, %c12_132], %261 {strides = array<i32>} : memref<2x32xf32, #tpu.memory_space<vmem>>, vector<2x1xf32>,
    %cst_133 = arith.constant 0.000000e+00 : f32
    %263 = vector.broadcast %cst_133 : f32 to vector<1x128xf32>
    %264 = arith.cmpf ogt, %253, %263 : vector<1x128xf32>
    %cst_134 = arith.constant -3.000000e+38 : f32
    %265 = vector.shape_cast %264 : vector<1x128xi1> to vector<1x128xi1>
    %266 = vector.broadcast %265 : vector<1x128xi1> to vector<2x128xi1>
    %267 = vector.broadcast %cst_134 : f32 to vector<2x128xf32>
    %268 = arith.select %266, %252, %267 : vector<2x128xi1>, vector<2x128xf32>
    %cst_135 = arith.constant dense<0xFF800000> : vector<2xf32>
    %269 = vector.multi_reduction <maximumf>, %268, %cst_135 [1] : vector<2x128xf32> to vector<2xf32>
    %270 = vector.shape_cast %269 : vector<2xf32> to vector<2x1xf32>
    %c0_136 = arith.constant 0 : index
    %c28 = arith.constant 28 : index
    %271 = vector.load %arg5[%c0_136, %c28] : memref<2x32xf32, #tpu.memory_space<vmem>>, vector<2x1xf32>
    tpu.vector_store %arg5[%c0_136, %c28], %270 {strides = array<i32>} : memref<2x32xf32, #tpu.memory_space<vmem>>, vector<2x1xf32>,
    %272 = vector.extract_strided_slice %11 {offsets = [0, 1664], sizes = [2, 128], strides = [1, 1]} : vector<2x2048xf32> to vector<2x128xf32>
    %c13 = arith.constant 13 : index
    %c0_137 = arith.constant 0 : index
    %273 = vector.load %arg3[%c13, %c0_137] : memref<56x128xf32, #tpu.memory_space<vmem>>, vector<1x128xf32>
    %cst_138 = arith.constant 0.000000e+00 : f32
    %274 = vector.broadcast %cst_138 : f32 to vector<2x128xf32>
    %275 = arith.cmpf ogt, %272, %274 : vector<2x128xf32>
    %cst_139 = arith.constant 0.000000e+00 : f32
    %276 = vector.shape_cast %273 : vector<1x128xf32> to vector<1x128xf32>
    %277 = vector.broadcast %276 : vector<1x128xf32> to vector<2x128xf32>
    %278 = vector.broadcast %cst_139 : f32 to vector<2x128xf32>
    %279 = arith.select %275, %277, %278 : vector<2x128xi1>, vector<2x128xf32>
    %cst_140 = arith.constant dense<0.000000e+00> : vector<2xf32>
    %280 = vector.multi_reduction <add>, %279, %cst_140 [1] : vector<2x128xf32> to vector<2xf32>
    %281 = vector.shape_cast %280 : vector<2xf32> to vector<2x1xf32>
    %c0_141 = arith.constant 0 : index
    %c13_142 = arith.constant 13 : index
    %282 = vector.load %arg5[%c0_141, %c13_142] : memref<2x32xf32, #tpu.memory_space<vmem>>, vector<2x1xf32>
    tpu.vector_store %arg5[%c0_141, %c13_142], %281 {strides = array<i32>} : memref<2x32xf32, #tpu.memory_space<vmem>>, vector<2x1xf32>,
    %cst_143 = arith.constant 0.000000e+00 : f32
    %283 = vector.broadcast %cst_143 : f32 to vector<1x128xf32>
    %284 = arith.cmpf ogt, %273, %283 : vector<1x128xf32>
    %cst_144 = arith.constant -3.000000e+38 : f32
    %285 = vector.shape_cast %284 : vector<1x128xi1> to vector<1x128xi1>
    %286 = vector.broadcast %285 : vector<1x128xi1> to vector<2x128xi1>
    %287 = vector.broadcast %cst_144 : f32 to vector<2x128xf32>
    %288 = arith.select %286, %272, %287 : vector<2x128xi1>, vector<2x128xf32>
    %cst_145 = arith.constant dense<0xFF800000> : vector<2xf32>
    %289 = vector.multi_reduction <maximumf>, %288, %cst_145 [1] : vector<2x128xf32> to vector<2xf32>
    %290 = vector.shape_cast %289 : vector<2xf32> to vector<2x1xf32>
    %c0_146 = arith.constant 0 : index
    %c29 = arith.constant 29 : index
    %291 = vector.load %arg5[%c0_146, %c29] : memref<2x32xf32, #tpu.memory_space<vmem>>, vector<2x1xf32>
    tpu.vector_store %arg5[%c0_146, %c29], %290 {strides = array<i32>} : memref<2x32xf32, #tpu.memory_space<vmem>>, vector<2x1xf32>,
    %292 = vector.extract_strided_slice %11 {offsets = [0, 1792], sizes = [2, 128], strides = [1, 1]} : vector<2x2048xf32> to vector<2x128xf32>
    %c14 = arith.constant 14 : index
    %c0_147 = arith.constant 0 : index
    %293 = vector.load %arg3[%c14, %c0_147] : memref<56x128xf32, #tpu.memory_space<vmem>>, vector<1x128xf32>
    %cst_148 = arith.constant 0.000000e+00 : f32
    %294 = vector.broadcast %cst_148 : f32 to vector<2x128xf32>
    %295 = arith.cmpf ogt, %292, %294 : vector<2x128xf32>
    %cst_149 = arith.constant 0.000000e+00 : f32
    %296 = vector.shape_cast %293 : vector<1x128xf32> to vector<1x128xf32>
    %297 = vector.broadcast %296 : vector<1x128xf32> to vector<2x128xf32>
    %298 = vector.broadcast %cst_149 : f32 to vector<2x128xf32>
    %299 = arith.select %295, %297, %298 : vector<2x128xi1>, vector<2x128xf32>
    %cst_150 = arith.constant dense<0.000000e+00> : vector<2xf32>
    %300 = vector.multi_reduction <add>, %299, %cst_150 [1] : vector<2x128xf32> to vector<2xf32>
    %301 = vector.shape_cast %300 : vector<2xf32> to vector<2x1xf32>
    %c0_151 = arith.constant 0 : index
    %c14_152 = arith.constant 14 : index
    %302 = vector.load %arg5[%c0_151, %c14_152] : memref<2x32xf32, #tpu.memory_space<vmem>>, vector<2x1xf32>
    tpu.vector_store %arg5[%c0_151, %c14_152], %301 {strides = array<i32>} : memref<2x32xf32, #tpu.memory_space<vmem>>, vector<2x1xf32>,
    %cst_153 = arith.constant 0.000000e+00 : f32
    %303 = vector.broadcast %cst_153 : f32 to vector<1x128xf32>
    %304 = arith.cmpf ogt, %293, %303 : vector<1x128xf32>
    %cst_154 = arith.constant -3.000000e+38 : f32
    %305 = vector.shape_cast %304 : vector<1x128xi1> to vector<1x128xi1>
    %306 = vector.broadcast %305 : vector<1x128xi1> to vector<2x128xi1>
    %307 = vector.broadcast %cst_154 : f32 to vector<2x128xf32>
    %308 = arith.select %306, %292, %307 : vector<2x128xi1>, vector<2x128xf32>
    %cst_155 = arith.constant dense<0xFF800000> : vector<2xf32>
    %309 = vector.multi_reduction <maximumf>, %308, %cst_155 [1] : vector<2x128xf32> to vector<2xf32>
    %310 = vector.shape_cast %309 : vector<2xf32> to vector<2x1xf32>
    %c0_156 = arith.constant 0 : index
    %c30 = arith.constant 30 : index
    %311 = vector.load %arg5[%c0_156, %c30] : memref<2x32xf32, #tpu.memory_space<vmem>>, vector<2x1xf32>
    tpu.vector_store %arg5[%c0_156, %c30], %310 {strides = array<i32>} : memref<2x32xf32, #tpu.memory_space<vmem>>, vector<2x1xf32>,
    %312 = vector.extract_strided_slice %11 {offsets = [0, 1920], sizes = [2, 128], strides = [1, 1]} : vector<2x2048xf32> to vector<2x128xf32>
    %c15 = arith.constant 15 : index
    %c0_157 = arith.constant 0 : index
    %313 = vector.load %arg3[%c15, %c0_157] : memref<56x128xf32, #tpu.memory_space<vmem>>, vector<1x128xf32>
    %cst_158 = arith.constant 0.000000e+00 : f32
    %314 = vector.broadcast %cst_158 : f32 to vector<2x128xf32>
    %315 = arith.cmpf ogt, %312, %314 : vector<2x128xf32>
    %cst_159 = arith.constant 0.000000e+00 : f32
    %316 = vector.shape_cast %313 : vector<1x128xf32> to vector<1x128xf32>
    %317 = vector.broadcast %316 : vector<1x128xf32> to vector<2x128xf32>
    %318 = vector.broadcast %cst_159 : f32 to vector<2x128xf32>
    %319 = arith.select %315, %317, %318 : vector<2x128xi1>, vector<2x128xf32>
    %cst_160 = arith.constant dense<0.000000e+00> : vector<2xf32>
    %320 = vector.multi_reduction <add>, %319, %cst_160 [1] : vector<2x128xf32> to vector<2xf32>
    %321 = vector.shape_cast %320 : vector<2xf32> to vector<2x1xf32>
    %c0_161 = arith.constant 0 : index
    %c15_162 = arith.constant 15 : index
    %322 = vector.load %arg5[%c0_161, %c15_162] : memref<2x32xf32, #tpu.memory_space<vmem>>, vector<2x1xf32>
    tpu.vector_store %arg5[%c0_161, %c15_162], %321 {strides = array<i32>} : memref<2x32xf32, #tpu.memory_space<vmem>>, vector<2x1xf32>,
    %cst_163 = arith.constant 0.000000e+00 : f32
    %323 = vector.broadcast %cst_163 : f32 to vector<1x128xf32>
    %324 = arith.cmpf ogt, %313, %323 : vector<1x128xf32>
    %cst_164 = arith.constant -3.000000e+38 : f32
    %325 = vector.shape_cast %324 : vector<1x128xi1> to vector<1x128xi1>
    %326 = vector.broadcast %325 : vector<1x128xi1> to vector<2x128xi1>
    %327 = vector.broadcast %cst_164 : f32 to vector<2x128xf32>
    %328 = arith.select %326, %312, %327 : vector<2x128xi1>, vector<2x128xf32>
    %cst_165 = arith.constant dense<0xFF800000> : vector<2xf32>
    %329 = vector.multi_reduction <maximumf>, %328, %cst_165 [1] : vector<2x128xf32> to vector<2xf32>
    %330 = vector.shape_cast %329 : vector<2xf32> to vector<2x1xf32>
    %c0_166 = arith.constant 0 : index
    %c31 = arith.constant 31 : index
    %331 = vector.load %arg5[%c0_166, %c31] : memref<2x32xf32, #tpu.memory_space<vmem>>, vector<2x1xf32>
    tpu.vector_store %arg5[%c0_166, %c31], %330 {strides = array<i32>} : memref<2x32xf32, #tpu.memory_space<vmem>>, vector<2x1xf32>,
    %c0_167 = arith.constant 0 : index
    %c0_168 = arith.constant 0 : index
    %332 = vector.load %arg5[%c0_167, %c0_168] : memref<2x32xf32, #tpu.memory_space<vmem>>, vector<2x32xf32>
    %c16_169 = arith.constant 16 : index
    %c0_170 = arith.constant 0 : index
    %333 = vector.load %arg3[%c16_169, %c0_170] : memref<56x128xf32, #tpu.memory_space<vmem>>, vector<1x32xf32>
    %334 = vector.broadcast %333 : vector<1x32xf32> to vector<2x32xf32>
    %335 = arith.mulf %332, %334 : vector<2x32xf32>
    %cst_171 = arith.constant dense<0.000000e+00> : vector<2xf32>
    %336 = vector.multi_reduction <add>, %335, %cst_171 [1] : vector<2x32xf32> to vector<2xf32>
    %337 = vector.shape_cast %336 : vector<2xf32> to vector<2x1xf32>
    %cst_172 = arith.constant 3.200000e+01 : f32
    %338 = vector.broadcast %cst_172 : f32 to vector<2x1xf32>
    %339 = arith.divf %337, %338 : vector<2x1xf32>
    %340 = vector.broadcast %339 : vector<2x1xf32> to vector<2x32xf32>
    %341 = arith.subf %335, %340 : vector<2x32xf32>
    %342 = arith.mulf %341, %341 : vector<2x32xf32>
    %cst_173 = arith.constant dense<0.000000e+00> : vector<2xf32>
    %343 = vector.multi_reduction <add>, %342, %cst_173 [1] : vector<2x32xf32> to vector<2xf32>
    %344 = vector.shape_cast %343 : vector<2xf32> to vector<2x1xf32>
    %cst_174 = arith.constant 3.200000e+01 : f32
    %345 = vector.broadcast %cst_174 : f32 to vector<2x1xf32>
    %346 = arith.divf %344, %345 : vector<2x1xf32>
    %cst_175 = arith.constant 9.99999974E-6 : f32
    %347 = vector.broadcast %cst_175 : f32 to vector<2x1xf32>
    %348 = arith.addf %346, %347 : vector<2x1xf32>
    %349 = math.rsqrt %348 : vector<2x1xf32>
    %350 = vector.broadcast %349 : vector<2x1xf32> to vector<2x32xf32>
    %351 = arith.mulf %341, %350 : vector<2x32xf32>
    %c17_176 = arith.constant 17 : index
    %c0_177 = arith.constant 0 : index
    %352 = vector.load %arg3[%c17_176, %c0_177] : memref<56x128xf32, #tpu.memory_space<vmem>>, vector<1x32xf32>
    %353 = vector.broadcast %352 : vector<1x32xf32> to vector<2x32xf32>
    %354 = arith.mulf %351, %353 : vector<2x32xf32>
    %c18_178 = arith.constant 18 : index
    %c0_179 = arith.constant 0 : index
    %355 = vector.load %arg3[%c18_178, %c0_179] : memref<56x128xf32, #tpu.memory_space<vmem>>, vector<1x32xf32>
    %356 = vector.broadcast %355 : vector<1x32xf32> to vector<2x32xf32>
    %357 = arith.addf %354, %356 : vector<2x32xf32>
    %c24_180 = arith.constant 24 : index
    %c0_181 = arith.constant 0 : index
    %358 = vector.load %arg3[%c24_180, %c0_181] : memref<56x128xf32, #tpu.memory_space<vmem>>, vector<32x8xf32>
    %cst_182 = arith.constant dense<0.000000e+00> : vector<2x8xf32>
    %359 = tpu.matmul %357, %358, %cst_182 {dimension_numbers = #tpu.dot_dimension_numbers<[1], [0], [0], [1], [0, 0, 1, 1], [], []>} : vector<2x32xf32>, vector<32x8xf32>, vector<2x8xf32> -> vector<2x8xf32>
    %c19_183 = arith.constant 19 : index
    %c0_184 = arith.constant 0 : index
    %360 = vector.load %arg3[%c19_183, %c0_184] : memref<56x128xf32, #tpu.memory_space<vmem>>, vector<1x8xf32>
    %361 = vector.broadcast %360 : vector<1x8xf32> to vector<2x8xf32>
    %362 = arith.addf %359, %361 : vector<2x8xf32>
    %c0_185 = arith.constant 0 : index
    %c0_186 = arith.constant 0 : index
    %363 = vector.load %arg4[%c0_185, %c0_186] : memref<2x8xf32, #tpu.memory_space<vmem>>, vector<2x8xf32>
    tpu.vector_store %arg4[%c0_185, %c0_186], %362 {strides = array<i32>} : memref<2x8xf32, #tpu.memory_space<vmem>>, vector<2x8xf32>,
    return
  }
  func.func @transform_0(%arg0: i32) -> (i32, i32) {
    %c0_i32 = arith.constant 0 : i32
    %c0_i32_0 = arith.constant 0 : i32
    return %arg0, %c0_i32 : i32, i32
  }
  func.func @transform_1(%arg0: i32) -> (i32, i32) {
    %c0_i32 = arith.constant 0 : i32
    %c0_i32_0 = arith.constant 0 : i32
    %c0_i32_1 = arith.constant 0 : i32
    return %c0_i32, %c0_i32_0 : i32, i32
  }
  func.func @transform_2(%arg0: i32) -> (i32, i32) {
    %c0_i32 = arith.constant 0 : i32
    %c0_i32_0 = arith.constant 0 : i32
    %c0_i32_1 = arith.constant 0 : i32
    return %c0_i32, %c0_i32_0 : i32, i32
  }
  func.func @transform_3(%arg0: i32) -> (i32, i32) {
    %c0_i32 = arith.constant 0 : i32
    %c0_i32_0 = arith.constant 0 : i32
    return %arg0, %c0_i32 : i32, i32
  }
}

</mosaic_0001>

<bundles_post_ra>
// kernel: tpu_custom_call.1
= control target key start
LH: loop header
LB: loop body
LE: loop exit
PB: predicated region body
PF: predicated region fallthrough
CT: control target
= control target key end

     0   :  { %8 = vsyncpa [#allocation4], 0  ;;  %s4364_s0 = inlined_call_operand.hbm [shape: f32[2,128], index: 0, kind: input, shape index: {}]   ;;  %s4365_s1 = inlined_call_operand.hbm [shape: bf16[256,2048], index: 1, kind: input, shape index: {}]   ;;  %s4366_s2 = inlined_call_operand.hbm [shape: f32[56,128], index: 2, kind: input, shape index: {}]   ;;  %s4367_s3 = inlined_call_operand.hbm [shape: f32[2,8], index: 3, kind: output, shape index: {}]  }
   0x1   :  { %9 = vsyncpa [#allocation7], 0 }
   0x2   :  { %10 = vsyncpa [#allocation5], 0  ;;  %s3588_s12 = smov [#allocation6]   ;;  %s3494_s16 = scalar_lea.hbm %s4365_s1, 32768 }
   0x3   :  { %s26_s13 = sshll.u32 %s3588_s12, 4  ;;  %p3495_p0 = scmp.ne.s32.totalorder %s4365_s1, %s3494_s16  ;;  %s27_s13 = int_to_ptr.vmem [resolvable:$true] %s26_s13 }
   0x4   :  { %p3498_p1 = scmp.lt.u32.totalorder %s3494_s16, %s4365_s1 }
   0x6   :  { %p3500_p2 = pnand %p3498_p1, %p3495_p0 }
   0x8   :  { %3503 = shalt.err (!%p3500_p2)
}
   0x9   :  { %s3504_s21 = scalar_lea.vmem %s27_s13, 32768  ;;  %p3509_p4 = scmp.lt.s32.totalorder %s27_s13, %s27_s13 }
   0xa   :  { %p3505_p3 = scmp.ne.s32.totalorder %s27_s13, %s3504_s21  ;;  %p3510_p5 = scmp.lt.s32.totalorder %s3504_s21, %s3504_s21 }
   0xc   :  { %p3511_p6 = por %p3510_p5, %p3509_p4 }
   0xe   :  { %p3512_p7 = pnand %p3511_p6, %p3505_p3 }
  0x10   :  { %3515 = shalt.err (!%p3512_p7)
}
  0x11   :  { %s3589_s22 = smov 1024   ;;  %s3590_s23 = smov 64  }
  0x12   :  { %32 = dma.hbm_to_vmem [thread:$0]  %s4365_s1, 32768, %s27_s13, [#allocation7], %s3589_s22, %s3589_s22, %s3590_s23  }
  0x13   :  { %s3591_s26 = smov [#allocation3]   ;;  %s3592_s28 = smov [#allocation8]  }
  0x14   :  { %s17_s27 = sshll.u32 %s3591_s26, 4  ;;  %s38_s29 = sshll.u32 %s3592_s28, 4  ;;  %s18_s27 = int_to_ptr.vmem [resolvable:$true] %s17_s27  ;;  %s39_s29 = int_to_ptr.vmem [resolvable:$true] %s38_s29 }
  0x15   :  { %s3516_s5 = scalar_lea.hbm %s4364_s0, 32 }
  0x16   :  { %p3517_p8 = scmp.ne.s32.totalorder %s4364_s0, %s3516_s5  ;;  %p3520_p9 = scmp.lt.u32.totalorder %s3516_s5, %s4364_s0 }
  0x18   :  { %p3522_p10 = pnand %p3520_p9, %p3517_p8 }
  0x1a   :  { %3525 = shalt.err (!%p3522_p10)
}
  0x1b   :  { %s3526_s1 = scalar_lea.vmem %s18_s27, 32  ;;  %p3531_p12 = scmp.lt.s32.totalorder %s18_s27, %s18_s27 }
  0x1c   :  { %p3527_p11 = scmp.ne.s32.totalorder %s18_s27, %s3526_s1  ;;  %p3532_p13 = scmp.lt.s32.totalorder %s3526_s1, %s3526_s1 }
  0x1e   :  { %p3533_p0 = por %p3532_p13, %p3531_p12 }
  0x20   :  { %p3534_p1 = pnand %p3533_p0, %p3527_p11 }
  0x22   :  { %3537 = shalt.err (!%p3534_p1)
}
  0x23   :  { %20 = dma.hbm_to_vmem [thread:$0]  %s4364_s0, 32, %s18_s27, [#allocation4]  }
  0x24   :  { %s3538_s14 = scalar_lea.hbm %s4366_s2, 896 }
  0x25   :  { %p3539_p2 = scmp.ne.s32.totalorder %s4366_s2, %s3538_s14  ;;  %p3542_p3 = scmp.lt.u32.totalorder %s3538_s14, %s4366_s2 }
  0x27   :  { %p3544_p4 = pnand %p3542_p3, %p3539_p2 }
  0x29   :  { %3547 = shalt.err (!%p3544_p4)
}
  0x2a   :  { %s3548_s19 = scalar_lea.vmem %s39_s29, 896  ;;  %p3553_p6 = scmp.lt.s32.totalorder %s39_s29, %s39_s29 }
  0x2b   :  { %p3549_p5 = scmp.ne.s32.totalorder %s39_s29, %s3548_s19  ;;  %p3554_p7 = scmp.lt.s32.totalorder %s3548_s19, %s3548_s19 }
  0x2d   :  { %p3555_p8 = por %p3554_p7, %p3553_p6 }
  0x2f   :  { %p3556_p9 = pnand %p3555_p8, %p3549_p5 }
  0x31   :  { %3559 = shalt.err (!%p3556_p9)
}
  0x32   :  { %s3593_s0 = smov 128   ;;  %s3594_s20 = smov 8  }
  0x33   :  { %44 = dma.hbm_to_vmem [thread:$0]  %s4366_s2, 896, %s39_s29, [#allocation7], %s3593_s0, %s3593_s0, %s3594_s20  }
  0x34   :  { %3582 = dma.done.wait [#allocation4], 32  }
  0x35   :  { %3583 = vsyncadd [#allocation4], 4294967264 }
  0x36   :  { %3584 = dma.done.wait [#allocation7], 33664  }
  0x37   :  { %3585 = vsyncadd [#allocation7], 4294933632  ;;  %v4368_v0 = vmov 0   ;;  %v188_v1 = vld [vmem:[#allocation6 + $0x400] sm:$0xff]  ;;  %v189_v3 = vld [vmem:[#allocation6 + $0x408] sm:$0xff]  ;;  %vm2603_vm6 = vcmask 1041408  }
  0x38   :  { %988 = vmatprep.mubr.bf16.mxu0 %v4368_v0  ;;  %1029 = vmatprep.mubr.bf16.mxu1 %v4368_v0  ;;  %v196_v2 = vld [vmem:[#allocation6 + $0x440] sm:$0xff]  ;;  %v197_v5 = vld [vmem:[#allocation6 + $0x448] sm:$0xff]  ;;  %v190_v63 = vld [vmem:[#allocation6 + $0x410] sm:$0xff]  ;;  %s3599_s2 = smov [#allocation9]  }
  0x39   :  { %v3133_v4 = vcombine.high %v188_v1, %v196_v2  ;;  %v3132_v6 = vcombine.low %v188_v1, %v196_v2  ;;  %v204_v7 = vld [vmem:[#allocation6 + $0x480] sm:$0xff]  ;;  %v3135_v9 = vcombine.high %v189_v3, %v197_v5  ;;  %v3134_v10 = vcombine.low %v189_v3, %v197_v5  ;;  %v205_v12 = vld [vmem:[#allocation6 + $0x488] sm:$0xff]  ;;  %v198_v1 = vld [vmem:[#allocation6 + $0x450] sm:$0xff]  ;;  %s3122_s23 = sshll.u32 %s3599_s2, 4  ;;  %s3123_s23 = int_to_ptr.vmem [resolvable:$true] %s3122_s23 }
  0x3a   :  { %v212_v8 = vld [vmem:[#allocation6 + $0x4c0] sm:$0xff]  ;;  %v213_v13 = vld [vmem:[#allocation6 + $0x4c8] sm:$0xff]  ;;  %v191_v2 = vld [vmem:[#allocation6 + $0x418] sm:$0xff]  ;;  %s3560_s24 = scalar_lea.vmem %s3123_s23, 32  ;;  %p3565_p11 = scmp.lt.s32.totalorder %s3123_s23, %s3123_s23 }
  0x3b   :  { %v3149_v11 = vcombine.high %v204_v7, %v212_v8  ;;  %v220_v14 = vld [vmem:[#allocation6 + $0x500] sm:$0xff]  ;;  %956 = vmatprep.subr.bf16.mxu0 %v3133_v4  ;;  %v3151_v15 = vcombine.high %v205_v12, %v213_v13  ;;  %v221_v17 = vld [vmem:[#allocation6 + $0x508] sm:$0xff]  ;;  %997 = vmatprep.subr.bf16.mxu1 %v3135_v9  ;;  %v3148_v19 = vcombine.low %v204_v7, %v212_v8  ;;  %v199_v3 = vld [vmem:[#allocation6 + $0x458] sm:$0xff]  ;;  %p3561_p10 = scmp.ne.s32.totalorder %s3123_s23, %s3560_s24  ;;  %p3566_p12 = scmp.lt.s32.totalorder %s3560_s24, %s3560_s24 }
  0x3c   :  { %v228_v16 = vld [vmem:[#allocation6 + $0x540] sm:$0xff]  ;;  %v229_v18 = vld [vmem:[#allocation6 + $0x548] sm:$0xff]  ;;  %957 = vmatpush1.bf16.msra.mxu0 %v3132_v6  ;;  %998 = vmatpush1.bf16.msra.mxu1 %v3134_v10  ;;  %v3150_v20 = vcombine.low %v205_v12, %v213_v13  ;;  %v55_v5 = vld [vmem:[#allocation3] sm:$0x3]  ;;  %v3137_v7 = vcombine.high %v190_v63, %v198_v1  ;;  %v3139_v8 = vcombine.high %v191_v2, %v199_v3 }
  0x3d   :  { %958 = vmatprep.subr.bf16.mxu0 %v3149_v11  ;;  %v3165_v21 = vcombine.high %v220_v14, %v228_v16  ;;  %999 = vmatprep.subr.bf16.mxu1 %v3151_v15  ;;  %v3167_v22 = vcombine.high %v221_v17, %v229_v18  ;;  %v236_v23 = vld [vmem:[#allocation6 + $0x580] sm:$0xff]  ;;  %v237_v25 = vld [vmem:[#allocation6 + $0x588] sm:$0xff]  ;;  %v3164_v27 = vcombine.low %v220_v14, %v228_v16  ;;  %v206_v9 = vld [vmem:[#allocation6 + $0x490] sm:$0xff]  ;;  %p3567_p13 = por %p3566_p12, %p3565_p11 }
  0x3e   :  { %v244_v24 = vld [vmem:[#allocation6 + $0x5c0] sm:$0xff]  ;;  %v245_v26 = vld [vmem:[#allocation6 + $0x5c8] sm:$0xff]  ;;  %v3166_v28 = vcombine.low %v221_v17, %v229_v18  ;;  %v214_v10 = vld [vmem:[#allocation6 + $0x4d0] sm:$0xff]  ;;  %v3658_v11 = vpack.c.bf16 %v55_v5, %v55_v5  ;;  %v3136_v14 = vcombine.low %v190_v63, %v198_v1  ;;  %v3138_v15 = vcombine.low %v191_v2, %v199_v3 }
  0x3f   :  { %v3181_v29 = vcombine.high %v236_v23, %v244_v24  ;;  %v3183_v30 = vcombine.high %v237_v25, %v245_v26  ;;  %v252_v31 = vld [vmem:[#allocation6 + $0x600] sm:$0xff]  ;;  %v253_v33 = vld [vmem:[#allocation6 + $0x608] sm:$0xff]  ;;  %v3180_v35 = vcombine.low %v236_v23, %v244_v24  ;;  %v3182_v36 = vcombine.low %v237_v25, %v245_v26  ;;  %v207_v12 = vld [vmem:[#allocation6 + $0x498] sm:$0xff]  ;;  %p3568_p0 = pnand %p3567_p13, %p3561_p10 }
  0x40   :  { %959 = vmatpush1.bf16.msra.mxu0 %v3148_v19  ;;  %1000 = vmatpush1.bf16.msra.mxu1 %v3150_v20  ;;  %v260_v32 = vld [vmem:[#allocation6 + $0x640] sm:$0xff]  ;;  %v261_v34 = vld [vmem:[#allocation6 + $0x648] sm:$0xff]  ;;  %v215_v13 = vld [vmem:[#allocation6 + $0x4d8] sm:$0xff]  ;;  %v3153_v16 = vcombine.high %v206_v9, %v214_v10 }
  0x41   :  { %960 = vmatprep.subr.bf16.mxu0 %v3165_v21  ;;  %1001 = vmatprep.subr.bf16.mxu1 %v3167_v22  ;;  %v3197_v37 = vcombine.high %v252_v31, %v260_v32  ;;  %v3199_v38 = vcombine.high %v253_v33, %v261_v34  ;;  %v268_v39 = vld [vmem:[#allocation6 + $0x680] sm:$0xff]  ;;  %v269_v41 = vld [vmem:[#allocation6 + $0x688] sm:$0xff]  ;;  %v3196_v43 = vcombine.low %v252_v31, %v260_v32  ;;  %v222_v18 = vld [vmem:[#allocation6 + $0x510] sm:$0xff] }
  0x42   :  { %v276_v40 = vld [vmem:[#allocation6 + $0x6c0] sm:$0xff]  ;;  %v277_v42 = vld [vmem:[#allocation6 + $0x6c8] sm:$0xff]  ;;  %v3198_v44 = vcombine.low %v253_v33, %v261_v34  ;;  %v3155_v17 = vcombine.high %v207_v12, %v215_v13  ;;  %v230_v19 = vld [vmem:[#allocation6 + $0x550] sm:$0xff]  ;;  %v3152_v22 = vcombine.low %v206_v9, %v214_v10  ;;  %v3154_v23 = vcombine.low %v207_v12, %v215_v13 }
  0x43   :  { %v3213_v45 = vcombine.high %v268_v39, %v276_v40  ;;  %v3215_v46 = vcombine.high %v269_v41, %v277_v42  ;;  %v284_v47 = vld [vmem:[#allocation6 + $0x700] sm:$0xff]  ;;  %v285_v49 = vld [vmem:[#allocation6 + $0x708] sm:$0xff]  ;;  %v3212_v51 = vcombine.low %v268_v39, %v276_v40  ;;  %v3214_v52 = vcombine.low %v269_v41, %v277_v42  ;;  %v223_v20 = vld [vmem:[#allocation6 + $0x518] sm:$0xff] }
  0x44   :  { %961 = vmatpush1.bf16.msra.mxu0 %v3164_v27  ;;  %1002 = vmatpush1.bf16.msra.mxu1 %v3166_v28  ;;  %v292_v48 = vld [vmem:[#allocation6 + $0x740] sm:$0xff]  ;;  %v293_v50 = vld [vmem:[#allocation6 + $0x748] sm:$0xff]  ;;  %v231_v21 = vld [vmem:[#allocation6 + $0x558] sm:$0xff]  ;;  %v3169_v24 = vcombine.high %v222_v18, %v230_v19 }
  0x45   :  { %962 = vmatprep.subr.bf16.mxu0 %v3181_v29  ;;  %1003 = vmatprep.subr.bf16.mxu1 %v3183_v30  ;;  %v3229_v53 = vcombine.high %v284_v47, %v292_v48  ;;  %v3231_v54 = vcombine.high %v285_v49, %v293_v50  ;;  %v300_v55 = vld [vmem:[#allocation6 + $0x780] sm:$0xff]  ;;  %v301_v57 = vld [vmem:[#allocation6 + $0x788] sm:$0xff]  ;;  %v3228_v59 = vcombine.low %v284_v47, %v292_v48  ;;  %v238_v26 = vld [vmem:[#allocation6 + $0x590] sm:$0xff] }
  0x46   :  { %v308_v56 = vld [vmem:[#allocation6 + $0x7c0] sm:$0xff]  ;;  %v309_v58 = vld [vmem:[#allocation6 + $0x7c8] sm:$0xff]  ;;  %v3230_v60 = vcombine.low %v285_v49, %v293_v50  ;;  %v3171_v25 = vcombine.high %v223_v20, %v231_v21  ;;  %v246_v27 = vld [vmem:[#allocation6 + $0x5d0] sm:$0xff]  ;;  %v3168_v30 = vcombine.low %v222_v18, %v230_v19  ;;  %v3170_v31 = vcombine.low %v223_v20, %v231_v21 }
  0x47   :  { %v3245_v61 = vcombine.high %v300_v55, %v308_v56  ;;  %v3247_v62 = vcombine.high %v301_v57, %v309_v58  ;;  %v3244_v4 = vcombine.low %v300_v55, %v308_v56  ;;  %v3246_v6 = vcombine.low %v301_v57, %v309_v58  ;;  %v239_v28 = vld [vmem:[#allocation6 + $0x598] sm:$0xff]  ;;  %v254_v34 = vld [vmem:[#allocation6 + $0x610] sm:$0xff]  ;;  %v192_v3 = vld [vmem:[#allocation6 + $0x420] sm:$0xff] }
  0x48   :  { %963 = vmatpush1.bf16.msra.mxu0 %v3180_v35  ;;  %1004 = vmatpush1.bf16.msra.mxu1 %v3182_v36  ;;  %v247_v29 = vld [vmem:[#allocation6 + $0x5d8] sm:$0xff]  ;;  %v3185_v32 = vcombine.high %v238_v26, %v246_v27  ;;  %v262_v35 = vld [vmem:[#allocation6 + $0x650] sm:$0xff]  ;;  %v193_v5 = vld [vmem:[#allocation6 + $0x428] sm:$0xff] }
  0x49   :  { %964 = vmatprep.subr.bf16.mxu0 %v3197_v37  ;;  %1005 = vmatprep.subr.bf16.mxu1 %v3199_v38  ;;  %v3187_v33 = vcombine.high %v239_v28, %v247_v29  ;;  %v255_v36 = vld [vmem:[#allocation6 + $0x618] sm:$0xff]  ;;  %v3184_v38 = vcombine.low %v238_v26, %v246_v27  ;;  %v3186_v39 = vcombine.low %v239_v28, %v247_v29  ;;  %v270_v42 = vld [vmem:[#allocation6 + $0x690] sm:$0xff]  ;;  %v208_v12 = vld [vmem:[#allocation6 + $0x4a0] sm:$0xff] }
  0x4a   :  { %v263_v37 = vld [vmem:[#allocation6 + $0x658] sm:$0xff]  ;;  %v3201_v40 = vcombine.high %v254_v34, %v262_v35  ;;  %v286_v50 = vld [vmem:[#allocation6 + $0x710] sm:$0xff]  ;;  %v216_v13 = vld [vmem:[#allocation6 + $0x4e0] sm:$0xff] }
  0x4b   :  { %v3203_v41 = vcombine.high %v255_v36, %v263_v37  ;;  %v3202_v47 = vcombine.low %v255_v36, %v263_v37  ;;  %v302_v58 = vld [vmem:[#allocation6 + $0x790] sm:$0xff]  ;;  %v3157_v18 = vcombine.high %v208_v12, %v216_v13  ;;  %v224_v20 = vld [vmem:[#allocation6 + $0x520] sm:$0xff] }
  0x4c   :  { %965 = vmatpush1.bf16.msra.mxu0 %v3196_v43  ;;  %1006 = vmatpush1.bf16.msra.mxu1 %v3198_v44  ;;  %v278_v43 = vld [vmem:[#allocation6 + $0x6d0] sm:$0xff]  ;;  %v271_v44 = vld [vmem:[#allocation6 + $0x698] sm:$0xff]  ;;  %v232_v21 = vld [vmem:[#allocation6 + $0x560] sm:$0xff] }
  0x4d   :  { %966 = vmatprep.subr.bf16.mxu0 %v3213_v45  ;;  %1007 = vmatprep.subr.bf16.mxu1 %v3215_v46  ;;  %v279_v45 = vld [vmem:[#allocation6 + $0x6d8] sm:$0xff]  ;;  %v3200_v46 = vcombine.low %v254_v34, %v262_v35  ;;  %v3217_v48 = vcombine.high %v270_v42, %v278_v43  ;;  %v3173_v26 = vcombine.high %v224_v20, %v232_v21  ;;  %v240_v28 = vld [vmem:[#allocation6 + $0x5a0] sm:$0xff] }
  0x4e   :  { %v3219_v49 = vcombine.high %v271_v44, %v279_v45  ;;  %v3218_v55 = vcombine.low %v271_v44, %v279_v45  ;;  %v248_v29 = vld [vmem:[#allocation6 + $0x5e0] sm:$0xff] }
  0x4f   :  { %v3189_v34 = vcombine.high %v240_v28, %v248_v29  ;;  %v256_v36 = vld [vmem:[#allocation6 + $0x620] sm:$0xff] }
  0x50   :  { %967 = vmatpush1.bf16.msra.mxu0 %v3212_v51  ;;  %1008 = vmatpush1.bf16.msra.mxu1 %v3214_v52  ;;  %v294_v51 = vld [vmem:[#allocation6 + $0x750] sm:$0xff]  ;;  %v287_v52 = vld [vmem:[#allocation6 + $0x718] sm:$0xff]  ;;  %v264_v37 = vld [vmem:[#allocation6 + $0x660] sm:$0xff] }
  0x51   :  { %968 = vmatprep.subr.bf16.mxu0 %v3229_v53  ;;  %1009 = vmatprep.subr.bf16.mxu1 %v3231_v54  ;;  %v295_v53 = vld [vmem:[#allocation6 + $0x758] sm:$0xff]  ;;  %v3216_v54 = vcombine.low %v270_v42, %v278_v43  ;;  %v3233_v56 = vcombine.high %v286_v50, %v294_v51  ;;  %v3205_v42 = vcombine.high %v256_v36, %v264_v37  ;;  %v272_v44 = vld [vmem:[#allocation6 + $0x6a0] sm:$0xff] }
  0x52   :  { %v3235_v57 = vcombine.high %v287_v52, %v295_v53  ;;  %v3234_v63 = vcombine.low %v287_v52, %v295_v53  ;;  %v280_v45 = vld [vmem:[#allocation6 + $0x6e0] sm:$0xff] }
  0x53   :  { %v288_v52 = vld [vmem:[#allocation6 + $0x720] sm:$0xff] }
  0x54   :  { %969 = vmatpush1.bf16.msra.mxu0 %v3228_v59  ;;  %1010 = vmatpush1.bf16.msra.mxu1 %v3230_v60  ;;  %v310_v59 = vld [vmem:[#allocation6 + $0x7d0] sm:$0xff]  ;;  %v303_v60 = vld [vmem:[#allocation6 + $0x798] sm:$0xff]  ;;  %v296_v53 = vld [vmem:[#allocation6 + $0x760] sm:$0xff] }
  0x55   :  { %970 = vmatprep.subr.bf16.mxu0 %v3245_v61  ;;  %1011 = vmatprep.subr.bf16.mxu1 %v3247_v62  ;;  %v311_v61 = vld [vmem:[#allocation6 + $0x7d8] sm:$0xff]  ;;  %v3232_v62 = vcombine.low %v286_v50, %v294_v51  ;;  %v3249_v1 = vcombine.high %v302_v58, %v310_v59  ;;  %v3221_v50 = vcombine.high %v272_v44, %v280_v45 }
  0x56   :  { %v3251_v2 = vcombine.high %v303_v60, %v311_v61 }
  0x58   :  { %971 = vmatpush1.bf16.msra.mxu0 %v3244_v4  ;;  %1012 = vmatpush1.bf16.msra.mxu1 %v3246_v6  ;;  %v200_v4 = vld [vmem:[#allocation6 + $0x460] sm:$0xff]  ;;  %v201_v6 = vld [vmem:[#allocation6 + $0x468] sm:$0xff] }
  0x59   :  { %1038 = vmatprep.subr.bf16.mxu0 %v3137_v7  ;;  %1079 = vmatprep.subr.bf16.mxu1 %v3139_v8  ;;  %v3248_v7 = vcombine.low %v302_v58, %v310_v59  ;;  %v3250_v8 = vcombine.low %v303_v60, %v311_v61  ;;  %v3141_v9 = vcombine.high %v192_v3, %v200_v4  ;;  %v304_v60 = vld [vmem:[#allocation6 + $0x7a0] sm:$0xff] }
  0x5a   :  { %v3143_v10 = vcombine.high %v193_v5, %v201_v6  ;;  %v3237_v58 = vcombine.high %v288_v52, %v296_v53  ;;  %v312_v61 = vld [vmem:[#allocation6 + $0x7e0] sm:$0xff] }
  0x5b   :  { %989 = vmatmul.mubr.bf16.vlgmr.msra.gmra.mrb[0].mxu0 %v3658_v11  ;;  %1030 = vmatmul.mubr.bf16.vlgmr.msra.gmra.mrb[0].mxu1 %v3658_v11 }
  0x5c   :  { %1039 = vmatpush1.bf16.msra.mxu0 %v3136_v14  ;;  %1080 = vmatpush1.bf16.msra.mxu1 %v3138_v15  ;;  %v209_v14 = vld [vmem:[#allocation6 + $0x4a8] sm:$0xff] }
  0x5d   :  { %1040 = vmatprep.subr.bf16.mxu0 %v3153_v16  ;;  %1081 = vmatprep.subr.bf16.mxu1 %v3155_v17  ;;  %v217_v15 = vld [vmem:[#allocation6 + $0x4e8] sm:$0xff]  ;;  %v3140_v16 = vcombine.low %v192_v3, %v200_v4  ;;  %v3142_v17 = vcombine.low %v193_v5, %v201_v6  ;;  %v3253_v3 = vcombine.high %v304_v60, %v312_v61  ;;  %v194_v5 = vld [vmem:[#allocation6 + $0x430] sm:$0xff] }
  0x5e   :  { %1070 = vmatprep.mubr.bf16.mxu0 %v4368_v0  ;;  %1111 = vmatprep.mubr.bf16.mxu1 %v4368_v0  ;;  %v3159_v19 = vcombine.high %v209_v14, %v217_v15  ;;  %v202_v6 = vld [vmem:[#allocation6 + $0x470] sm:$0xff] }
  0x60   :  { %1041 = vmatpush1.bf16.msra.mxu0 %v3152_v22  ;;  %1082 = vmatpush1.bf16.msra.mxu1 %v3154_v23  ;;  %v225_v22 = vld [vmem:[#allocation6 + $0x528] sm:$0xff] }
  0x61   :  { %1042 = vmatprep.subr.bf16.mxu0 %v3169_v24  ;;  %1083 = vmatprep.subr.bf16.mxu1 %v3171_v25  ;;  %v233_v23 = vld [vmem:[#allocation6 + $0x568] sm:$0xff]  ;;  %v3156_v24 = vcombine.low %v208_v12, %v216_v13  ;;  %v3158_v25 = vcombine.low %v209_v14, %v217_v15  ;;  %v3145_v12 = vcombine.high %v194_v5, %v202_v6  ;;  %v210_v14 = vld [vmem:[#allocation6 + $0x4b0] sm:$0xff] }
  0x62   :  { %v3175_v27 = vcombine.high %v225_v22, %v233_v23  ;;  %v218_v15 = vld [vmem:[#allocation6 + $0x4f0] sm:$0xff] }
  0x64   :  { %1043 = vmatpush1.bf16.msra.mxu0 %v3168_v30  ;;  %1084 = vmatpush1.bf16.msra.mxu1 %v3170_v31  ;;  %v241_v30 = vld [vmem:[#allocation6 + $0x5a8] sm:$0xff] }
  0x65   :  { %1044 = vmatprep.subr.bf16.mxu0 %v3185_v32  ;;  %1085 = vmatprep.subr.bf16.mxu1 %v3187_v33  ;;  %v249_v31 = vld [vmem:[#allocation6 + $0x5e8] sm:$0xff]  ;;  %v3172_v32 = vcombine.low %v224_v20, %v232_v21  ;;  %v3174_v33 = vcombine.low %v225_v22, %v233_v23  ;;  %v3161_v20 = vcombine.high %v210_v14, %v218_v15  ;;  %v226_v22 = vld [vmem:[#allocation6 + $0x530] sm:$0xff] }
  0x66   :  { %v3191_v35 = vcombine.high %v241_v30, %v249_v31  ;;  %v234_v23 = vld [vmem:[#allocation6 + $0x570] sm:$0xff] }
  0x68   :  { %1045 = vmatpush1.bf16.msra.mxu0 %v3184_v38  ;;  %1086 = vmatpush1.bf16.msra.mxu1 %v3186_v39  ;;  %v257_v38 = vld [vmem:[#allocation6 + $0x628] sm:$0xff] }
  0x69   :  { %1046 = vmatprep.subr.bf16.mxu0 %v3201_v40  ;;  %1087 = vmatprep.subr.bf16.mxu1 %v3203_v41  ;;  %v265_v39 = vld [vmem:[#allocation6 + $0x668] sm:$0xff]  ;;  %v3188_v40 = vcombine.low %v240_v28, %v248_v29  ;;  %v3190_v41 = vcombine.low %v241_v30, %v249_v31  ;;  %v3177_v28 = vcombine.high %v226_v22, %v234_v23  ;;  %v242_v30 = vld [vmem:[#allocation6 + $0x5b0] sm:$0xff] }
  0x6a   :  { %v3207_v43 = vcombine.high %v257_v38, %v265_v39  ;;  %v250_v31 = vld [vmem:[#allocation6 + $0x5f0] sm:$0xff] }
  0x6c   :  { %1047 = vmatpush1.bf16.msra.mxu0 %v3200_v46  ;;  %1088 = vmatpush1.bf16.msra.mxu1 %v3202_v47  ;;  %v273_v46 = vld [vmem:[#allocation6 + $0x6a8] sm:$0xff] }
  0x6d   :  { %1048 = vmatprep.subr.bf16.mxu0 %v3217_v48  ;;  %1089 = vmatprep.subr.bf16.mxu1 %v3219_v49  ;;  %v281_v47 = vld [vmem:[#allocation6 + $0x6e8] sm:$0xff]  ;;  %v3204_v48 = vcombine.low %v256_v36, %v264_v37  ;;  %v3206_v49 = vcombine.low %v257_v38, %v265_v39  ;;  %v3193_v36 = vcombine.high %v242_v30, %v250_v31  ;;  %v258_v38 = vld [vmem:[#allocation6 + $0x630] sm:$0xff] }
  0x6e   :  { %v3223_v51 = vcombine.high %v273_v46, %v281_v47  ;;  %v266_v39 = vld [vmem:[#allocation6 + $0x670] sm:$0xff] }
  0x70   :  { %1049 = vmatpush1.bf16.msra.mxu0 %v3216_v54  ;;  %1090 = vmatpush1.bf16.msra.mxu1 %v3218_v55  ;;  %v289_v54 = vld [vmem:[#allocation6 + $0x728] sm:$0xff] }
  0x71   :  { %1050 = vmatprep.subr.bf16.mxu0 %v3233_v56  ;;  %1091 = vmatprep.subr.bf16.mxu1 %v3235_v57  ;;  %v297_v55 = vld [vmem:[#allocation6 + $0x768] sm:$0xff]  ;;  %v3220_v56 = vcombine.low %v272_v44, %v280_v45  ;;  %v3222_v57 = vcombine.low %v273_v46, %v281_v47  ;;  %v3209_v44 = vcombine.high %v258_v38, %v266_v39  ;;  %v274_v46 = vld [vmem:[#allocation6 + $0x6b0] sm:$0xff] }
  0x72   :  { %v3239_v59 = vcombine.high %v289_v54, %v297_v55  ;;  %v282_v47 = vld [vmem:[#allocation6 + $0x6f0] sm:$0xff] }
  0x74   :  { %1051 = vmatpush1.bf16.msra.mxu0 %v3232_v62  ;;  %1092 = vmatpush1.bf16.msra.mxu1 %v3234_v63  ;;  %v305_v62 = vld [vmem:[#allocation6 + $0x7a8] sm:$0xff] }
  0x75   :  { %1052 = vmatprep.subr.bf16.mxu0 %v3249_v1  ;;  %1093 = vmatprep.subr.bf16.mxu1 %v3251_v2  ;;  %v313_v63 = vld [vmem:[#allocation6 + $0x7e8] sm:$0xff]  ;;  %v3236_v1 = vcombine.low %v288_v52, %v296_v53  ;;  %v3238_v2 = vcombine.low %v289_v54, %v297_v55  ;;  %v3225_v52 = vcombine.high %v274_v46, %v282_v47  ;;  %v290_v54 = vld [vmem:[#allocation6 + $0x730] sm:$0xff] }
  0x76   :  { %v3255_v4 = vcombine.high %v305_v62, %v313_v63  ;;  %v298_v55 = vld [vmem:[#allocation6 + $0x770] sm:$0xff] }
  0x78   :  { %1053 = vmatpush1.bf16.msra.mxu0 %v3248_v7  ;;  %1094 = vmatpush1.bf16.msra.mxu1 %v3250_v8  ;;  %v195_v7 = vld [vmem:[#allocation6 + $0x438] sm:$0xff] }
  0x79   :  { %1120 = vmatprep.subr.bf16.mxu0 %v3141_v9  ;;  %1161 = vmatprep.subr.bf16.mxu1 %v3143_v10  ;;  %v203_v8 = vld [vmem:[#allocation6 + $0x478] sm:$0xff]  ;;  %v3252_v9 = vcombine.low %v304_v60, %v312_v61  ;;  %v3254_v10 = vcombine.low %v305_v62, %v313_v63  ;;  %v3241_v60 = vcombine.high %v290_v54, %v298_v55  ;;  %v306_v62 = vld [vmem:[#allocation6 + $0x7b0] sm:$0xff] }
  0x7a   :  { %v3147_v13 = vcombine.high %v195_v7, %v203_v8  ;;  %v314_v63 = vld [vmem:[#allocation6 + $0x7f0] sm:$0xff] }
  0x7b   :  { %1071 = vmatmul.mubr.bf16.vlgmr.msra.gmra.mrb[4].mxu0 %v3658_v11  ;;  %1112 = vmatmul.mubr.bf16.vlgmr.msra.gmra.mrb[4].mxu1 %v3658_v11 }
  0x7c   :  { %1121 = vmatpush1.bf16.msra.mxu0 %v3140_v16  ;;  %1162 = vmatpush1.bf16.msra.mxu1 %v3142_v17  ;;  %v211_v16 = vld [vmem:[#allocation6 + $0x4b8] sm:$0xff] }
  0x7d   :  { %1122 = vmatprep.subr.bf16.mxu0 %v3157_v18  ;;  %1163 = vmatprep.subr.bf16.mxu1 %v3159_v19  ;;  %v219_v17 = vld [vmem:[#allocation6 + $0x4f8] sm:$0xff]  ;;  %v3144_v18 = vcombine.low %v194_v5, %v202_v6  ;;  %v3146_v19 = vcombine.low %v195_v7, %v203_v8  ;;  %v3257_v5 = vcombine.high %v306_v62, %v314_v63  ;;  %v60_v7 = vld [vmem:[#allocation6] sm:$0xff] }
  0x7e   :  { %1152 = vmatprep.mubr.bf16.mxu0 %v4368_v0  ;;  %1193 = vmatprep.mubr.bf16.mxu1 %v4368_v0  ;;  %v3163_v21 = vcombine.high %v211_v16, %v219_v17  ;;  %v68_v8 = vld [vmem:[#allocation6 + $0x40] sm:$0xff] }
  0x80   :  { %1123 = vmatpush1.bf16.msra.mxu0 %v3156_v24  ;;  %1164 = vmatpush1.bf16.msra.mxu1 %v3158_v25  ;;  %v227_v24 = vld [vmem:[#allocation6 + $0x538] sm:$0xff] }
  0x81   :  { %1124 = vmatprep.subr.bf16.mxu0 %v3173_v26  ;;  %1165 = vmatprep.subr.bf16.mxu1 %v3175_v27  ;;  %v235_v25 = vld [vmem:[#allocation6 + $0x578] sm:$0xff]  ;;  %v3160_v26 = vcombine.low %v210_v14, %v218_v15  ;;  %v3162_v27 = vcombine.low %v211_v16, %v219_v17  ;;  %v3672_v14 = vcombine.high %v60_v7, %v68_v8  ;;  %v76_v16 = vld [vmem:[#allocation6 + $0x80] sm:$0xff] }
  0x82   :  { %v3179_v29 = vcombine.high %v227_v24, %v235_v25  ;;  %v84_v17 = vld [vmem:[#allocation6 + $0xc0] sm:$0xff] }
  0x84   :  { %1125 = vmatpush1.bf16.msra.mxu0 %v3172_v32  ;;  %1166 = vmatpush1.bf16.msra.mxu1 %v3174_v33  ;;  %v243_v32 = vld [vmem:[#allocation6 + $0x5b8] sm:$0xff] }
  0x85   :  { %1126 = vmatprep.subr.bf16.mxu0 %v3189_v34  ;;  %1167 = vmatprep.subr.bf16.mxu1 %v3191_v35  ;;  %v251_v33 = vld [vmem:[#allocation6 + $0x5f8] sm:$0xff]  ;;  %v3176_v34 = vcombine.low %v226_v22, %v234_v23  ;;  %v3178_v35 = vcombine.low %v227_v24, %v235_v25  ;;  %v3681_v22 = vcombine.high %v76_v16, %v84_v17  ;;  %v92_v24 = vld [vmem:[#allocation6 + $0x100] sm:$0xff] }
  0x86   :  { %v3195_v37 = vcombine.high %v243_v32, %v251_v33  ;;  %v100_v25 = vld [vmem:[#allocation6 + $0x140] sm:$0xff] }
  0x88   :  { %1127 = vmatpush1.bf16.msra.mxu0 %v3188_v40  ;;  %1168 = vmatpush1.bf16.msra.mxu1 %v3190_v41  ;;  %v259_v40 = vld [vmem:[#allocation6 + $0x638] sm:$0xff] }
  0x89   :  { %1128 = vmatprep.subr.bf16.mxu0 %v3205_v42  ;;  %1169 = vmatprep.subr.bf16.mxu1 %v3207_v43  ;;  %v267_v41 = vld [vmem:[#allocation6 + $0x678] sm:$0xff]  ;;  %v3192_v42 = vcombine.low %v242_v30, %v250_v31  ;;  %v3194_v43 = vcombine.low %v243_v32, %v251_v33  ;;  %v3695_v30 = vcombine.high %v92_v24, %v100_v25  ;;  %v108_v32 = vld [vmem:[#allocation6 + $0x180] sm:$0xff] }
  0x8a   :  { %v3211_v45 = vcombine.high %v259_v40, %v267_v41  ;;  %v116_v33 = vld [vmem:[#allocation6 + $0x1c0] sm:$0xff] }
  0x8c   :  { %1129 = vmatpush1.bf16.msra.mxu0 %v3204_v48  ;;  %1170 = vmatpush1.bf16.msra.mxu1 %v3206_v49  ;;  %v275_v48 = vld [vmem:[#allocation6 + $0x6b8] sm:$0xff] }
  0x8d   :  { %1130 = vmatprep.subr.bf16.mxu0 %v3221_v50  ;;  %1171 = vmatprep.subr.bf16.mxu1 %v3223_v51  ;;  %v283_v49 = vld [vmem:[#allocation6 + $0x6f8] sm:$0xff]  ;;  %v3208_v50 = vcombine.low %v258_v38, %v266_v39  ;;  %v3210_v51 = vcombine.low %v259_v40, %v267_v41  ;;  %v3709_v38 = vcombine.high %v108_v32, %v116_v33  ;;  %v124_v40 = vld [vmem:[#allocation6 + $0x200] sm:$0xff] }
  0x8e   :  { %v3227_v53 = vcombine.high %v275_v48, %v283_v49  ;;  %v132_v41 = vld [vmem:[#allocation6 + $0x240] sm:$0xff] }
  0x90   :  { %1131 = vmatpush1.bf16.msra.mxu0 %v3220_v56  ;;  %1172 = vmatpush1.bf16.msra.mxu1 %v3222_v57  ;;  %v291_v56 = vld [vmem:[#allocation6 + $0x738] sm:$0xff] }
  0x91   :  { %1132 = vmatprep.subr.bf16.mxu0 %v3237_v58  ;;  %1173 = vmatprep.subr.bf16.mxu1 %v3239_v59  ;;  %v299_v57 = vld [vmem:[#allocation6 + $0x778] sm:$0xff]  ;;  %v3224_v58 = vcombine.low %v274_v46, %v282_v47  ;;  %v3226_v59 = vcombine.low %v275_v48, %v283_v49  ;;  %v3721_v46 = vcombine.high %v124_v40, %v132_v41  ;;  %v140_v48 = vld [vmem:[#allocation6 + $0x280] sm:$0xff] }
  0x92   :  { %v3243_v61 = vcombine.high %v291_v56, %v299_v57  ;;  %v148_v49 = vld [vmem:[#allocation6 + $0x2c0] sm:$0xff] }
  0x94   :  { %1133 = vmatpush1.bf16.msra.mxu0 %v3236_v1  ;;  %1174 = vmatpush1.bf16.msra.mxu1 %v3238_v2  ;;  %v307_v1 = vld [vmem:[#allocation6 + $0x7b8] sm:$0xff] }
  0x95   :  { %1134 = vmatprep.subr.bf16.mxu0 %v3253_v3  ;;  %1175 = vmatprep.subr.bf16.mxu1 %v3255_v4  ;;  %v315_v2 = vld [vmem:[#allocation6 + $0x7f8] sm:$0xff]  ;;  %v3240_v3 = vcombine.low %v290_v54, %v298_v55  ;;  %v3242_v4 = vcombine.low %v291_v56, %v299_v57  ;;  %v3733_v54 = vcombine.high %v140_v48, %v148_v49  ;;  %v156_v56 = vld [vmem:[#allocation6 + $0x300] sm:$0xff] }
  0x96   :  { %v3259_v6 = vcombine.high %v307_v1, %v315_v2  ;;  %v164_v57 = vld [vmem:[#allocation6 + $0x340] sm:$0xff] }
  0x98   :  { %1135 = vmatpush1.bf16.msra.mxu0 %v3252_v9  ;;  %1176 = vmatpush1.bf16.msra.mxu1 %v3254_v10  ;;  %v61_v9 = vld [vmem:[#allocation6 + $0x8] sm:$0xff] }
  0x99   :  { %1202 = vmatprep.subr.bf16.mxu0 %v3145_v12  ;;  %1243 = vmatprep.subr.bf16.mxu1 %v3147_v13  ;;  %v69_v10 = vld [vmem:[#allocation6 + $0x48] sm:$0xff]  ;;  %v3256_v12 = vcombine.low %v306_v62, %v314_v63  ;;  %v3258_v13 = vcombine.low %v307_v1, %v315_v2  ;;  %v3745_v62 = vcombine.high %v156_v56, %v164_v57  ;;  %v172_v1 = vld [vmem:[#allocation6 + $0x380] sm:$0xff] }
  0x9a   :  { %v3674_v15 = vcombine.high %v61_v9, %v69_v10  ;;  %v180_v2 = vld [vmem:[#allocation6 + $0x3c0] sm:$0xff] }
  0x9b   :  { %1153 = vmatmul.mubr.bf16.vlgmr.msra.gmra.mrb[8].mxu0 %v3658_v11  ;;  %1194 = vmatmul.mubr.bf16.vlgmr.msra.gmra.mrb[8].mxu1 %v3658_v11 }
  0x9c   :  { %1203 = vmatpush1.bf16.msra.mxu0 %v3144_v18  ;;  %1244 = vmatpush1.bf16.msra.mxu1 %v3146_v19  ;;  %v77_v18 = vld [vmem:[#allocation6 + $0x88] sm:$0xff] }
  0x9d   :  { %1204 = vmatprep.subr.bf16.mxu0 %v3161_v20  ;;  %1245 = vmatprep.subr.bf16.mxu1 %v3163_v21  ;;  %v85_v19 = vld [vmem:[#allocation6 + $0xc8] sm:$0xff]  ;;  %v3676_v20 = vcombine.low %v60_v7, %v68_v8  ;;  %v3679_v21 = vcombine.low %v61_v9, %v69_v10  ;;  %v3757_v7 = vcombine.high %v172_v1, %v180_v2  ;;  %v62_v9 = vld [vmem:[#allocation6 + $0x10] sm:$0xff] }
  0x9e   :  { %1234 = vmatprep.mubr.bf16.mxu0 %v4368_v0  ;;  %1275 = vmatprep.mubr.bf16.mxu1 %v4368_v0  ;;  %v3684_v23 = vcombine.high %v77_v18, %v85_v19  ;;  %v70_v10 = vld [vmem:[#allocation6 + $0x50] sm:$0xff] }
  0xa0   :  { %1205 = vmatpush1.bf16.msra.mxu0 %v3160_v26  ;;  %1246 = vmatpush1.bf16.msra.mxu1 %v3162_v27  ;;  %v93_v26 = vld [vmem:[#allocation6 + $0x108] sm:$0xff] }
  0xa1   :  { %1206 = vmatprep.subr.bf16.mxu0 %v3177_v28  ;;  %1247 = vmatprep.subr.bf16.mxu1 %v3179_v29  ;;  %v101_v27 = vld [vmem:[#allocation6 + $0x148] sm:$0xff]  ;;  %v3689_v28 = vcombine.low %v76_v16, %v84_v17  ;;  %v3693_v29 = vcombine.low %v77_v18, %v85_v19  ;;  %v3763_v16 = vcombine.low %v172_v1, %v180_v2 }
  0xa2   :  { %v3698_v31 = vcombine.high %v93_v26, %v101_v27  ;;  %v3769_v18 = vcombine.high %v62_v9, %v70_v10 }
  0xa4   :  { %1207 = vmatpush1.bf16.msra.mxu0 %v3176_v34  ;;  %1248 = vmatpush1.bf16.msra.mxu1 %v3178_v35  ;;  %v109_v34 = vld [vmem:[#allocation6 + $0x188] sm:$0xff] }
  0xa5   :  { %1208 = vmatprep.subr.bf16.mxu0 %v3193_v36  ;;  %1249 = vmatprep.subr.bf16.mxu1 %v3195_v37  ;;  %v117_v35 = vld [vmem:[#allocation6 + $0x1c8] sm:$0xff]  ;;  %v3703_v36 = vcombine.low %v92_v24, %v100_v25  ;;  %v3707_v37 = vcombine.low %v93_v26, %v101_v27  ;;  %v78_v24 = vld [vmem:[#allocation6 + $0x90] sm:$0xff]  ;;  %v79_v26 = vld [vmem:[#allocation6 + $0x98] sm:$0xff] }
  0xa6   :  { %v3712_v39 = vcombine.high %v109_v34, %v117_v35  ;;  %v86_v25 = vld [vmem:[#allocation6 + $0xd0] sm:$0xff]  ;;  %v87_v27 = vld [vmem:[#allocation6 + $0xd8] sm:$0xff] }
  0xa8   :  { %1209 = vmatpush1.bf16.msra.mxu0 %v3192_v42  ;;  %1250 = vmatpush1.bf16.msra.mxu1 %v3194_v43  ;;  %v125_v42 = vld [vmem:[#allocation6 + $0x208] sm:$0xff] }
  0xa9   :  { %1210 = vmatprep.subr.bf16.mxu0 %v3209_v44  ;;  %1251 = vmatprep.subr.bf16.mxu1 %v3211_v45  ;;  %v133_v43 = vld [vmem:[#allocation6 + $0x248] sm:$0xff]  ;;  %v3715_v44 = vcombine.low %v108_v32, %v116_v33  ;;  %v3719_v45 = vcombine.low %v109_v34, %v117_v35  ;;  %v3775_v32 = vcombine.low %v62_v9, %v70_v10  ;;  %v126_v9 = vld [vmem:[#allocation6 + $0x210] sm:$0xff] }
  0xaa   :  { %v3724_v47 = vcombine.high %v125_v42, %v133_v43  ;;  %v3781_v34 = vcombine.high %v78_v24, %v86_v25  ;;  %v3784_v35 = vcombine.high %v79_v26, %v87_v27  ;;  %v134_v10 = vld [vmem:[#allocation6 + $0x250] sm:$0xff] }
  0xac   :  { %1211 = vmatpush1.bf16.msra.mxu0 %v3208_v50  ;;  %1252 = vmatpush1.bf16.msra.mxu1 %v3210_v51  ;;  %v141_v50 = vld [vmem:[#allocation6 + $0x288] sm:$0xff] }
  0xad   :  { %1212 = vmatprep.subr.bf16.mxu0 %v3225_v52  ;;  %1253 = vmatprep.subr.bf16.mxu1 %v3227_v53  ;;  %v149_v51 = vld [vmem:[#allocation6 + $0x2c8] sm:$0xff]  ;;  %v3727_v52 = vcombine.low %v124_v40, %v132_v41  ;;  %v3731_v53 = vcombine.low %v125_v42, %v133_v43  ;;  %v94_v40 = vld [vmem:[#allocation6 + $0x110] sm:$0xff]  ;;  %v95_v42 = vld [vmem:[#allocation6 + $0x118] sm:$0xff] }
  0xae   :  { %v3736_v55 = vcombine.high %v141_v50, %v149_v51  ;;  %v102_v41 = vld [vmem:[#allocation6 + $0x150] sm:$0xff]  ;;  %v103_v43 = vld [vmem:[#allocation6 + $0x158] sm:$0xff] }
  0xaf   :  { %v3803_v1 = vcombine.low %v94_v40, %v102_v41  ;;  %v3807_v2 = vcombine.low %v95_v42, %v103_v43 }
  0xb0   :  { %1213 = vmatpush1.bf16.msra.mxu0 %v3224_v58  ;;  %1254 = vmatpush1.bf16.msra.mxu1 %v3226_v59  ;;  %v157_v58 = vld [vmem:[#allocation6 + $0x308] sm:$0xff] }
  0xb1   :  { %1214 = vmatprep.subr.bf16.mxu0 %v3241_v60  ;;  %1255 = vmatprep.subr.bf16.mxu1 %v3243_v61  ;;  %v165_v59 = vld [vmem:[#allocation6 + $0x348] sm:$0xff]  ;;  %v3739_v60 = vcombine.low %v140_v48, %v148_v49  ;;  %v3743_v61 = vcombine.low %v141_v50, %v149_v51  ;;  %v3789_v48 = vcombine.low %v78_v24, %v86_v25 }
  0xb2   :  { %v3748_v63 = vcombine.high %v157_v58, %v165_v59  ;;  %v3793_v49 = vcombine.low %v79_v26, %v87_v27  ;;  %v3795_v50 = vcombine.high %v94_v40, %v102_v41  ;;  %v3798_v51 = vcombine.high %v95_v42, %v103_v43  ;;  %4443 = vst [vmem:[#allocation13_spill] sm:$0xff] %v3803_v1  ;;  %v142_v40 = vld [vmem:[#allocation6 + $0x290] sm:$0xff]  ;;  %v143_v42 = vld [vmem:[#allocation6 + $0x298] sm:$0xff] }
  0xb3   :  { %4444 = vst [vmem:[#allocation14_spill] sm:$0xff] %v3807_v2  ;;  %v3821_v26 = vcombine.high %v126_v9, %v134_v10  ;;  %v150_v41 = vld [vmem:[#allocation6 + $0x2d0] sm:$0xff]  ;;  %v151_v43 = vld [vmem:[#allocation6 + $0x2d8] sm:$0xff] }
  0xb4   :  { %1215 = vmatpush1.bf16.msra.mxu0 %v3240_v3  ;;  %1256 = vmatpush1.bf16.msra.mxu1 %v3242_v4  ;;  %v173_v3 = vld [vmem:[#allocation6 + $0x388] sm:$0xff] }
  0xb5   :  { %1216 = vmatprep.subr.bf16.mxu0 %v3257_v5  ;;  %1257 = vmatprep.subr.bf16.mxu1 %v3259_v6  ;;  %v181_v4 = vld [vmem:[#allocation6 + $0x3c8] sm:$0xff]  ;;  %v3751_v5 = vcombine.low %v156_v56, %v164_v57  ;;  %v3755_v6 = vcombine.low %v157_v58, %v165_v59  ;;  %v110_v56 = vld [vmem:[#allocation6 + $0x190] sm:$0xff]  ;;  %v111_v58 = vld [vmem:[#allocation6 + $0x198] sm:$0xff]  ;;  %4449 = vst [vmem:[#allocation19_spill] sm:$0xff] %v3821_v26 }
  0xb6   :  { %v3760_v8 = vcombine.high %v173_v3, %v181_v4  ;;  %v3767_v17 = vcombine.low %v173_v3, %v181_v4  ;;  %v118_v57 = vld [vmem:[#allocation6 + $0x1d0] sm:$0xff]  ;;  %v119_v59 = vld [vmem:[#allocation6 + $0x1d8] sm:$0xff] }
  0xb7   :  { %v3809_v3 = vcombine.high %v110_v56, %v118_v57  ;;  %v3812_v4 = vcombine.high %v111_v58, %v119_v59  ;;  %v3815_v24 = vcombine.low %v110_v56, %v118_v57  ;;  %v3819_v25 = vcombine.low %v111_v58, %v119_v59 }
  0xb8   :  { %1217 = vmatpush1.bf16.msra.mxu0 %v3256_v12  ;;  %1258 = vmatpush1.bf16.msra.mxu1 %v3258_v13  ;;  %v63_v12 = vld [vmem:[#allocation6 + $0x18] sm:$0xff]  ;;  %v3827_v56 = vcombine.low %v126_v9, %v134_v10  ;;  %v3833_v58 = vcombine.high %v142_v40, %v150_v41  ;;  %v3836_v59 = vcombine.high %v143_v42, %v151_v43 }
  0xb9   :  { %1924 = vmatprep.subr.bf16.mxu0 %v3672_v14  ;;  %1965 = vmatprep.subr.bf16.mxu1 %v3674_v15  ;;  %v71_v13 = vld [vmem:[#allocation6 + $0x58] sm:$0xff]  ;;  %4445 = vst [vmem:[#allocation15_spill] sm:$0xff] %v3809_v3  ;;  %4446 = vst [vmem:[#allocation16_spill] sm:$0xff] %v3812_v4  ;;  %v3839_v9 = vcombine.low %v142_v40, %v150_v41  ;;  %v3843_v10 = vcombine.low %v143_v42, %v151_v43 }
  0xba   :  { %v3772_v19 = vcombine.high %v63_v12, %v71_v13  ;;  %v3779_v33 = vcombine.low %v63_v12, %v71_v13  ;;  %v127_v12 = vld [vmem:[#allocation6 + $0x218] sm:$0xff]  ;;  %4447 = vst [vmem:[#allocation17_spill] sm:$0xff] %v3815_v24  ;;  %4448 = vst [vmem:[#allocation18_spill] sm:$0xff] %v3819_v25 }
  0xbb   :  { %1235 = vmatmul.mubr.bf16.vlgmr.msra.gmra.mrb[12].mxu0 %v3658_v11  ;;  %1276 = vmatmul.mubr.bf16.vlgmr.msra.gmra.mrb[12].mxu1 %v3658_v11  ;;  %v135_v13 = vld [vmem:[#allocation6 + $0x258] sm:$0xff]  ;;  %4451 = vst [vmem:[#allocation21_spill] sm:$0xff] %v3827_v56  ;;  %4453 = vst [vmem:[#allocation23_spill] sm:$0xff] %v3833_v58 }
  0xbc   :  { %1925 = vmatpush1.bf16.msra.mxu0 %v3676_v20  ;;  %1966 = vmatpush1.bf16.msra.mxu1 %v3679_v21  ;;  %v3824_v27 = vcombine.high %v127_v12, %v135_v13  ;;  %v3831_v57 = vcombine.low %v127_v12, %v135_v13  ;;  %4454 = vst [vmem:[#allocation24_spill] sm:$0xff] %v3836_v59  ;;  %4455 = vst [vmem:[#allocation25_spill] sm:$0xff] %v3839_v9 }
  0xbd   :  { %1926 = vmatprep.subr.bf16.mxu0 %v3681_v22  ;;  %1967 = vmatprep.subr.bf16.mxu1 %v3684_v23  ;;  %4456 = vst [vmem:[#allocation26_spill] sm:$0xff] %v3843_v10 }
  0xbe   :  { %1956 = vmatprep.mubr.bf16.mxu0 %v4368_v0  ;;  %1997 = vmatprep.mubr.bf16.mxu1 %v4368_v0  ;;  %4450 = vst [vmem:[#allocation20_spill] sm:$0xff] %v3824_v27  ;;  %4452 = vst [vmem:[#allocation22_spill] sm:$0xff] %v3831_v57 }
  0xc0   :  { %1927 = vmatpush1.bf16.msra.mxu0 %v3689_v28  ;;  %1968 = vmatpush1.bf16.msra.mxu1 %v3693_v29 }
  0xc1   :  { %1928 = vmatprep.subr.bf16.mxu0 %v3695_v30  ;;  %1969 = vmatprep.subr.bf16.mxu1 %v3698_v31 }
  0xc4   :  { %1929 = vmatpush1.bf16.msra.mxu0 %v3703_v36  ;;  %1970 = vmatpush1.bf16.msra.mxu1 %v3707_v37 }
  0xc5   :  { %1930 = vmatprep.subr.bf16.mxu0 %v3709_v38  ;;  %1971 = vmatprep.subr.bf16.mxu1 %v3712_v39 }
  0xc8   :  { %1931 = vmatpush1.bf16.msra.mxu0 %v3715_v44  ;;  %1972 = vmatpush1.bf16.msra.mxu1 %v3719_v45 }
  0xc9   :  { %1932 = vmatprep.subr.bf16.mxu0 %v3721_v46  ;;  %1973 = vmatprep.subr.bf16.mxu1 %v3724_v47 }
  0xcc   :  { %1933 = vmatpush1.bf16.msra.mxu0 %v3727_v52  ;;  %1974 = vmatpush1.bf16.msra.mxu1 %v3731_v53 }
  0xcd   :  { %1934 = vmatprep.subr.bf16.mxu0 %v3733_v54  ;;  %1975 = vmatprep.subr.bf16.mxu1 %v3736_v55 }
  0xd0   :  { %1935 = vmatpush1.bf16.msra.mxu0 %v3739_v60  ;;  %1976 = vmatpush1.bf16.msra.mxu1 %v3743_v61 }
  0xd1   :  { %1936 = vmatprep.subr.bf16.mxu0 %v3745_v62  ;;  %1977 = vmatprep.subr.bf16.mxu1 %v3748_v63 }
  0xd4   :  { %1937 = vmatpush1.bf16.msra.mxu0 %v3751_v5  ;;  %1978 = vmatpush1.bf16.msra.mxu1 %v3755_v6 }
  0xd5   :  { %1938 = vmatprep.subr.bf16.mxu0 %v3757_v7  ;;  %1979 = vmatprep.subr.bf16.mxu1 %v3760_v8 }
  0xd8   :  { %1939 = vmatpush1.bf16.msra.mxu0 %v3763_v16  ;;  %1980 = vmatpush1.bf16.msra.mxu1 %v3767_v17 }
  0xd9   :  { %2006 = vmatprep.subr.bf16.mxu0 %v3769_v18  ;;  %2047 = vmatprep.subr.bf16.mxu1 %v3772_v19 }
  0xdb   :  { %1957 = vmatmul.mubr.bf16.vlgmr.msra.gmra.mrb[0].mxu0 %v3658_v11  ;;  %1998 = vmatmul.mubr.bf16.vlgmr.msra.gmra.mrb[0].mxu1 %v3658_v11 }
  0xdc   :  { %2007 = vmatpush1.bf16.msra.mxu0 %v3775_v32  ;;  %2048 = vmatpush1.bf16.msra.mxu1 %v3779_v33 }
  0xdd   :  { %2008 = vmatprep.subr.bf16.mxu0 %v3781_v34  ;;  %2049 = vmatprep.subr.bf16.mxu1 %v3784_v35 }
  0xde   :  { %2038 = vmatprep.mubr.bf16.mxu0 %v4368_v0  ;;  %2079 = vmatprep.mubr.bf16.mxu1 %v4368_v0  ;;  %v158_v0 = vld [vmem:[#allocation6 + $0x310] sm:$0xff] }
  0xe0   :  { %2009 = vmatpush1.bf16.msra.mxu0 %v3789_v48  ;;  %2050 = vmatpush1.bf16.msra.mxu1 %v3793_v49 }
  0xe1   :  { %2010 = vmatprep.subr.bf16.mxu0 %v3795_v50  ;;  %2051 = vmatprep.subr.bf16.mxu1 %v3798_v51 }
  0xe4   :  { %2011 = vmatpush1.bf16.msra.mxu0 %v3803_v1  ;;  %2052 = vmatpush1.bf16.msra.mxu1 %v3807_v2  ;;  %v167_v2 = vld [vmem:[#allocation6 + $0x358] sm:$0xff]  ;;  %v137_v1 = vld [vmem:[#allocation6 + $0x268] sm:$0xff] }
  0xe5   :  { %2012 = vmatprep.subr.bf16.mxu0 %v3809_v3  ;;  %2053 = vmatprep.subr.bf16.mxu1 %v3812_v4  ;;  %v166_v4 = vld [vmem:[#allocation6 + $0x350] sm:$0xff]  ;;  %v159_v3 = vld [vmem:[#allocation6 + $0x318] sm:$0xff] }
  0xe6   :  { %v3845_v12 = vcombine.high %v158_v0, %v166_v4  ;;  %v3848_v13 = vcombine.high %v159_v3, %v167_v2  ;;  %v3851_v40 = vcombine.low %v158_v0, %v166_v4  ;;  %v3855_v41 = vcombine.low %v159_v3, %v167_v2 }
  0xe8   :  { %2013 = vmatpush1.bf16.msra.mxu0 %v3815_v24  ;;  %2054 = vmatpush1.bf16.msra.mxu1 %v3819_v25  ;;  %4457 = vst [vmem:[#allocation27_spill] sm:$0xff] %v3845_v12  ;;  %4458 = vst [vmem:[#allocation28_spill] sm:$0xff] %v3848_v13  ;;  %v175_v25 = vld [vmem:[#allocation6 + $0x398] sm:$0xff] }
  0xe9   :  { %2014 = vmatprep.subr.bf16.mxu0 %v3821_v26  ;;  %2055 = vmatprep.subr.bf16.mxu1 %v3824_v27  ;;  %v174_v27 = vld [vmem:[#allocation6 + $0x390] sm:$0xff]  ;;  %v183_v24 = vld [vmem:[#allocation6 + $0x3d8] sm:$0xff]  ;;  %4459 = vst [vmem:[#allocation29_spill] sm:$0xff] %v3851_v40  ;;  %4460 = vst [vmem:[#allocation30_spill] sm:$0xff] %v3855_v41 }
  0xea   :  { %v182_v26 = vld [vmem:[#allocation6 + $0x3d0] sm:$0xff]  ;;  %v3860_v43 = vcombine.high %v175_v25, %v183_v24  ;;  %v3867_v2 = vcombine.low %v175_v25, %v183_v24 }
  0xeb   :  { %v3857_v42 = vcombine.high %v174_v27, %v182_v26  ;;  %v3863_v0 = vcombine.low %v174_v27, %v182_v26 }
  0xec   :  { %2015 = vmatpush1.bf16.msra.mxu0 %v3827_v56  ;;  %2056 = vmatpush1.bf16.msra.mxu1 %v3831_v57  ;;  %4462 = vst [vmem:[#allocation32_spill] sm:$0xff] %v3860_v43  ;;  %v65_v57 = vld [vmem:[#allocation6 + $0x28] sm:$0xff]  ;;  %4464 = vst [vmem:[#allocation34_spill] sm:$0xff] %v3867_v2 }
  0xed   :  { %2016 = vmatprep.subr.bf16.mxu0 %v3833_v58  ;;  %2057 = vmatprep.subr.bf16.mxu1 %v3836_v59  ;;  %4461 = vst [vmem:[#allocation31_spill] sm:$0xff] %v3857_v42  ;;  %v64_v59 = vld [vmem:[#allocation6 + $0x20] sm:$0xff]  ;;  %v73_v56 = vld [vmem:[#allocation6 + $0x68] sm:$0xff]  ;;  %4463 = vst [vmem:[#allocation33_spill] sm:$0xff] %v3863_v0 }
  0xee   :  { %v72_v58 = vld [vmem:[#allocation6 + $0x60] sm:$0xff]  ;;  %v3872_v4 = vcombine.high %v65_v57, %v73_v56  ;;  %v3879_v24 = vcombine.low %v65_v57, %v73_v56 }
  0xef   :  { %v3869_v3 = vcombine.high %v64_v59, %v72_v58  ;;  %v3875_v26 = vcombine.low %v64_v59, %v72_v58 }
  0xf0   :  { %2017 = vmatpush1.bf16.msra.mxu0 %v3839_v9  ;;  %2058 = vmatpush1.bf16.msra.mxu1 %v3843_v10  ;;  %4466 = vst [vmem:[#allocation36_spill] sm:$0xff] %v3872_v4  ;;  %v81_v10 = vld [vmem:[#allocation6 + $0xa8] sm:$0xff]  ;;  %4468 = vst [vmem:[#allocation38_spill] sm:$0xff] %v3879_v24 }
  0xf1   :  { %2018 = vmatprep.subr.bf16.mxu0 %v3845_v12  ;;  %2059 = vmatprep.subr.bf16.mxu1 %v3848_v13  ;;  %4465 = vst [vmem:[#allocation35_spill] sm:$0xff] %v3869_v3  ;;  %v80_v13 = vld [vmem:[#allocation6 + $0xa0] sm:$0xff]  ;;  %v89_v9 = vld [vmem:[#allocation6 + $0xe8] sm:$0xff]  ;;  %4467 = vst [vmem:[#allocation37_spill] sm:$0xff] %v3875_v26 }
  0xf2   :  { %v88_v12 = vld [vmem:[#allocation6 + $0xe0] sm:$0xff]  ;;  %v3884_v27 = vcombine.high %v81_v10, %v89_v9  ;;  %v3893_v56 = vcombine.low %v81_v10, %v89_v9 }
  0xf3   :  { %v3881_v25 = vcombine.high %v80_v13, %v88_v12  ;;  %v3889_v58 = vcombine.low %v80_v13, %v88_v12 }
  0xf4   :  { %2019 = vmatpush1.bf16.msra.mxu0 %v3851_v40  ;;  %2060 = vmatpush1.bf16.msra.mxu1 %v3855_v41  ;;  %4470 = vst [vmem:[#allocation40_spill] sm:$0xff] %v3884_v27  ;;  %v97_v41 = vld [vmem:[#allocation6 + $0x128] sm:$0xff]  ;;  %4472 = vst [vmem:[#allocation42_spill] sm:$0xff] %v3893_v56 }
  0xf5   :  { %2020 = vmatprep.subr.bf16.mxu0 %v3857_v42  ;;  %2061 = vmatprep.subr.bf16.mxu1 %v3860_v43  ;;  %4469 = vst [vmem:[#allocation39_spill] sm:$0xff] %v3881_v25  ;;  %v96_v43 = vld [vmem:[#allocation6 + $0x120] sm:$0xff]  ;;  %4471 = vst [vmem:[#allocation41_spill] sm:$0xff] %v3889_v58  ;;  %v113_v40 = vld [vmem:[#allocation6 + $0x1a8] sm:$0xff] }
  0xf6   :  { %v104_v42 = vld [vmem:[#allocation6 + $0x160] sm:$0xff] }
  0xf7   :  { %v3895_v57 = vcombine.high %v96_v43, %v104_v42  ;;  %v3903_v12 = vcombine.low %v96_v43, %v104_v42 }
  0xf8   :  { %2021 = vmatpush1.bf16.msra.mxu0 %v3863_v0  ;;  %2062 = vmatpush1.bf16.msra.mxu1 %v3867_v2  ;;  %v105_v0 = vld [vmem:[#allocation6 + $0x168] sm:$0xff]  ;;  %v4475_v2 = vmov 0  }
  0xf9   :  { %2088 = vmatprep.subr.bf16.mxu0 %v3869_v3  ;;  %2129 = vmatprep.subr.bf16.mxu1 %v3872_v4  ;;  %4473 = vst [vmem:[#allocation43_spill] sm:$0xff] %v3895_v57  ;;  %v3898_v59 = vcombine.high %v97_v41, %v105_v0  ;;  %v112_v4 = vld [vmem:[#allocation6 + $0x1a0] sm:$0xff]  ;;  %4476 = vst [vmem:[#allocation45_spill] sm:$0xff] %v3903_v12  ;;  %v3907_v9 = vcombine.low %v97_v41, %v105_v0 }
  0xfa   :  { %v120_v3 = vld [vmem:[#allocation6 + $0x1e0] sm:$0xff] }
  0xfb   :  { %2039 = vmatmul.mubr.bf16.vlgmr.msra.gmra.mrb[4].mxu0 %v3658_v11  ;;  %2080 = vmatmul.mubr.bf16.vlgmr.msra.gmra.mrb[4].mxu1 %v3658_v11  ;;  %4474 = vst [vmem:[#allocation44_spill] sm:$0xff] %v3898_v59  ;;  %4477 = vst [vmem:[#allocation46_spill] sm:$0xff] %v3907_v9  ;;  %v3909_v10 = vcombine.high %v112_v4, %v120_v3  ;;  %v3915_v42 = vcombine.low %v112_v4, %v120_v3 }
  0xfc   :  { %2089 = vmatpush1.bf16.msra.mxu0 %v3875_v26  ;;  %2130 = vmatpush1.bf16.msra.mxu1 %v3879_v24  ;;  %v121_v26 = vld [vmem:[#allocation6 + $0x1e8] sm:$0xff] }
  0xfd   :  { %2090 = vmatprep.subr.bf16.mxu0 %v3881_v25  ;;  %2131 = vmatprep.subr.bf16.mxu1 %v3884_v27  ;;  %4478 = vst [vmem:[#allocation47_spill] sm:$0xff] %v3909_v10  ;;  %v3912_v13 = vcombine.high %v113_v40, %v121_v26  ;;  %v128_v27 = vld [vmem:[#allocation6 + $0x220] sm:$0xff]  ;;  %v129_v24 = vld [vmem:[#allocation6 + $0x228] sm:$0xff]  ;;  %4480 = vst [vmem:[#allocation49_spill] sm:$0xff] %v3915_v42  ;;  %v3919_v41 = vcombine.low %v113_v40, %v121_v26 }
  0xfe   :  { %2120 = vmatprep.mubr.bf16.mxu0 %v4475_v2  ;;  %2161 = vmatprep.mubr.bf16.mxu1 %v4475_v2  ;;  %v136_v25 = vld [vmem:[#allocation6 + $0x260] sm:$0xff]  ;;  %v3924_v0 = vcombine.high %v129_v24, %v137_v1  ;;  %v3931_v40 = vcombine.low %v129_v24, %v137_v1 }
  0xff   :  { %4479 = vst [vmem:[#allocation48_spill] sm:$0xff] %v3912_v13  ;;  %4481 = vst [vmem:[#allocation50_spill] sm:$0xff] %v3919_v41  ;;  %v3921_v43 = vcombine.high %v128_v27, %v136_v25  ;;  %v3927_v3 = vcombine.low %v128_v27, %v136_v25 }
 0x100   :  { %2091 = vmatpush1.bf16.msra.mxu0 %v3889_v58  ;;  %2132 = vmatpush1.bf16.msra.mxu1 %v3893_v56  ;;  %4483 = vst [vmem:[#allocation52_spill] sm:$0xff] %v3924_v0  ;;  %v145_v56 = vld [vmem:[#allocation6 + $0x2a8] sm:$0xff]  ;;  %4485 = vst [vmem:[#allocation54_spill] sm:$0xff] %v3931_v40 }
 0x101   :  { %2092 = vmatprep.subr.bf16.mxu0 %v3895_v57  ;;  %2133 = vmatprep.subr.bf16.mxu1 %v3898_v59  ;;  %4482 = vst [vmem:[#allocation51_spill] sm:$0xff] %v3921_v43  ;;  %v144_v59 = vld [vmem:[#allocation6 + $0x2a0] sm:$0xff]  ;;  %v153_v58 = vld [vmem:[#allocation6 + $0x2e8] sm:$0xff]  ;;  %4484 = vst [vmem:[#allocation53_spill] sm:$0xff] %v3927_v3 }
 0x102   :  { %v152_v57 = vld [vmem:[#allocation6 + $0x2e0] sm:$0xff]  ;;  %v3936_v26 = vcombine.high %v145_v56, %v153_v58  ;;  %v3943_v1 = vcombine.low %v145_v56, %v153_v58 }
 0x103   :  { %v3933_v4 = vcombine.high %v144_v59, %v152_v57  ;;  %v3939_v25 = vcombine.low %v144_v59, %v152_v57 }
 0x104   :  { %2093 = vmatpush1.bf16.msra.mxu0 %v3903_v12  ;;  %2134 = vmatpush1.bf16.msra.mxu1 %v3907_v9  ;;  %4487 = vst [vmem:[#allocation56_spill] sm:$0xff] %v3936_v26  ;;  %v161_v9 = vld [vmem:[#allocation6 + $0x328] sm:$0xff]  ;;  %4489 = vst [vmem:[#allocation58_spill] sm:$0xff] %v3943_v1 }
 0x105   :  { %2094 = vmatprep.subr.bf16.mxu0 %v3909_v10  ;;  %2135 = vmatprep.subr.bf16.mxu1 %v3912_v13  ;;  %4486 = vst [vmem:[#allocation55_spill] sm:$0xff] %v3933_v4  ;;  %v160_v13 = vld [vmem:[#allocation6 + $0x320] sm:$0xff]  ;;  %v169_v12 = vld [vmem:[#allocation6 + $0x368] sm:$0xff]  ;;  %4488 = vst [vmem:[#allocation57_spill] sm:$0xff] %v3939_v25 }
 0x106   :  { %v168_v10 = vld [vmem:[#allocation6 + $0x360] sm:$0xff]  ;;  %v3948_v27 = vcombine.high %v161_v9, %v169_v12  ;;  %v3955_v58 = vcombine.low %v161_v9, %v169_v12 }
 0x107   :  { %v3945_v24 = vcombine.high %v160_v13, %v168_v10  ;;  %v3951_v57 = vcombine.low %v160_v13, %v168_v10 }
 0x108   :  { %2095 = vmatpush1.bf16.msra.mxu0 %v3915_v42  ;;  %2136 = vmatpush1.bf16.msra.mxu1 %v3919_v41  ;;  %4491 = vst [vmem:[#allocation60_spill] sm:$0xff] %v3948_v27  ;;  %v177_v41 = vld [vmem:[#allocation6 + $0x3a8] sm:$0xff]  ;;  %4493 = vst [vmem:[#allocation62_spill] sm:$0xff] %v3955_v58 }
 0x109   :  { %2096 = vmatprep.subr.bf16.mxu0 %v3921_v43  ;;  %2137 = vmatprep.subr.bf16.mxu1 %v3924_v0  ;;  %4490 = vst [vmem:[#allocation59_spill] sm:$0xff] %v3945_v24  ;;  %v176_v0 = vld [vmem:[#allocation6 + $0x3a0] sm:$0xff]  ;;  %v185_v42 = vld [vmem:[#allocation6 + $0x3e8] sm:$0xff]  ;;  %4492 = vst [vmem:[#allocation61_spill] sm:$0xff] %v3951_v57 }
 0x10a   :  { %v184_v43 = vld [vmem:[#allocation6 + $0x3e0] sm:$0xff]  ;;  %v3960_v59 = vcombine.high %v177_v41, %v185_v42  ;;  %v3967_v12 = vcombine.low %v177_v41, %v185_v42 }
 0x10b   :  { %v3957_v56 = vcombine.high %v176_v0, %v184_v43  ;;  %v3963_v10 = vcombine.low %v176_v0, %v184_v43 }
 0x10c   :  { %2097 = vmatpush1.bf16.msra.mxu0 %v3927_v3  ;;  %2138 = vmatpush1.bf16.msra.mxu1 %v3931_v40  ;;  %4495 = vst [vmem:[#allocation64_spill] sm:$0xff] %v3960_v59  ;;  %v67_v40 = vld [vmem:[#allocation6 + $0x38] sm:$0xff]  ;;  %4497 = vst [vmem:[#allocation66_spill] sm:$0xff] %v3967_v12 }
 0x10d   :  { %2098 = vmatprep.subr.bf16.mxu0 %v3933_v4  ;;  %2139 = vmatprep.subr.bf16.mxu1 %v3936_v26  ;;  %4494 = vst [vmem:[#allocation63_spill] sm:$0xff] %v3957_v56  ;;  %v66_v26 = vld [vmem:[#allocation6 + $0x30] sm:$0xff]  ;;  %v75_v3 = vld [vmem:[#allocation6 + $0x78] sm:$0xff]  ;;  %4496 = vst [vmem:[#allocation65_spill] sm:$0xff] %v3963_v10 }
 0x10e   :  { %v74_v4 = vld [vmem:[#allocation6 + $0x70] sm:$0xff]  ;;  %v3972_v13 = vcombine.high %v67_v40, %v75_v3  ;;  %v3979_v42 = vcombine.low %v67_v40, %v75_v3 }
 0x10f   :  { %v3969_v9 = vcombine.high %v66_v26, %v74_v4  ;;  %v3975_v43 = vcombine.low %v66_v26, %v74_v4 }
 0x110   :  { %2099 = vmatpush1.bf16.msra.mxu0 %v3939_v25  ;;  %2140 = vmatpush1.bf16.msra.mxu1 %v3943_v1  ;;  %4499 = vst [vmem:[#allocation68_spill] sm:$0xff] %v3972_v13  ;;  %v83_v1 = vld [vmem:[#allocation6 + $0xb8] sm:$0xff]  ;;  %4501 = vst [vmem:[#allocation70_spill] sm:$0xff] %v3979_v42 }
 0x111   :  { %2100 = vmatprep.subr.bf16.mxu0 %v3945_v24  ;;  %2141 = vmatprep.subr.bf16.mxu1 %v3948_v27  ;;  %4498 = vst [vmem:[#allocation67_spill] sm:$0xff] %v3969_v9  ;;  %v82_v27 = vld [vmem:[#allocation6 + $0xb0] sm:$0xff]  ;;  %v91_v25 = vld [vmem:[#allocation6 + $0xf8] sm:$0xff]  ;;  %4500 = vst [vmem:[#allocation69_spill] sm:$0xff] %v3975_v43 }
 0x112   :  { %v90_v24 = vld [vmem:[#allocation6 + $0xf0] sm:$0xff]  ;;  %v3984_v0 = vcombine.high %v83_v1, %v91_v25  ;;  %v3993_v3 = vcombine.low %v83_v1, %v91_v25 }
 0x113   :  { %v3981_v41 = vcombine.high %v82_v27, %v90_v24  ;;  %v3989_v4 = vcombine.low %v82_v27, %v90_v24 }
 0x114   :  { %2101 = vmatpush1.bf16.msra.mxu0 %v3951_v57  ;;  %2142 = vmatpush1.bf16.msra.mxu1 %v3955_v58  ;;  %4503 = vst [vmem:[#allocation72_spill] sm:$0xff] %v3984_v0  ;;  %v99_v58 = vld [vmem:[#allocation6 + $0x138] sm:$0xff]  ;;  %4505 = vst [vmem:[#allocation74_spill] sm:$0xff] %v3993_v3 }
 0x115   :  { %2102 = vmatprep.subr.bf16.mxu0 %v3957_v56  ;;  %2143 = vmatprep.subr.bf16.mxu1 %v3960_v59  ;;  %4502 = vst [vmem:[#allocation71_spill] sm:$0xff] %v3981_v41  ;;  %v98_v59 = vld [vmem:[#allocation6 + $0x130] sm:$0xff]  ;;  %4504 = vst [vmem:[#allocation73_spill] sm:$0xff] %v3989_v4  ;;  %v139_v57 = vld [vmem:[#allocation6 + $0x278] sm:$0xff] }
 0x116   :  { %v106_v56 = vld [vmem:[#allocation6 + $0x170] sm:$0xff] }
 0x117   :  { %v3995_v40 = vcombine.high %v98_v59, %v106_v56  ;;  %v4003_v24 = vcombine.low %v98_v59, %v106_v56 }
 0x118   :  { %2103 = vmatpush1.bf16.msra.mxu0 %v3963_v10  ;;  %2144 = vmatpush1.bf16.msra.mxu1 %v3967_v12  ;;  %v107_v10 = vld [vmem:[#allocation6 + $0x178] sm:$0xff] }
 0x119   :  { %2170 = vmatprep.subr.bf16.mxu0 %v3969_v9  ;;  %2211 = vmatprep.subr.bf16.mxu1 %v3972_v13  ;;  %4506 = vst [vmem:[#allocation75_spill] sm:$0xff] %v3995_v40  ;;  %v3998_v26 = vcombine.high %v99_v58, %v107_v10  ;;  %v114_v13 = vld [vmem:[#allocation6 + $0x1b0] sm:$0xff]  ;;  %v115_v12 = vld [vmem:[#allocation6 + $0x1b8] sm:$0xff]  ;;  %4508 = vst [vmem:[#allocation77_spill] sm:$0xff] %v4003_v24  ;;  %v4007_v25 = vcombine.low %v99_v58, %v107_v10 }
 0x11a   :  { %v122_v9 = vld [vmem:[#allocation6 + $0x1f0] sm:$0xff] }
 0x11b   :  { %2121 = vmatmul.mubr.bf16.vlgmr.msra.gmra.mrb[8].mxu0 %v3658_v11  ;;  %2162 = vmatmul.mubr.bf16.vlgmr.msra.gmra.mrb[8].mxu1 %v3658_v11  ;;  %4507 = vst [vmem:[#allocation76_spill] sm:$0xff] %v3998_v26  ;;  %4509 = vst [vmem:[#allocation78_spill] sm:$0xff] %v4007_v25  ;;  %v4009_v1 = vcombine.high %v114_v13, %v122_v9  ;;  %v4015_v56 = vcombine.low %v114_v13, %v122_v9 }
 0x11c   :  { %2171 = vmatpush1.bf16.msra.mxu0 %v3975_v43  ;;  %2212 = vmatpush1.bf16.msra.mxu1 %v3979_v42  ;;  %v123_v43 = vld [vmem:[#allocation6 + $0x1f8] sm:$0xff] }
 0x11d   :  { %2172 = vmatprep.subr.bf16.mxu0 %v3981_v41  ;;  %2213 = vmatprep.subr.bf16.mxu1 %v3984_v0  ;;  %4510 = vst [vmem:[#allocation79_spill] sm:$0xff] %v4009_v1  ;;  %v4012_v27 = vcombine.high %v115_v12, %v123_v43  ;;  %v130_v0 = vld [vmem:[#allocation6 + $0x230] sm:$0xff]  ;;  %v131_v42 = vld [vmem:[#allocation6 + $0x238] sm:$0xff]  ;;  %4512 = vst [vmem:[#allocation81_spill] sm:$0xff] %v4015_v56  ;;  %v4019_v58 = vcombine.low %v115_v12, %v123_v43 }
 0x11e   :  { %2202 = vmatprep.mubr.bf16.mxu0 %v4475_v2  ;;  %2243 = vmatprep.mubr.bf16.mxu1 %v4475_v2  ;;  %v138_v41 = vld [vmem:[#allocation6 + $0x270] sm:$0xff]  ;;  %v4024_v10 = vcombine.high %v131_v42, %v139_v57  ;;  %v4031_v12 = vcombine.low %v131_v42, %v139_v57 }
 0x11f   :  { %4511 = vst [vmem:[#allocation80_spill] sm:$0xff] %v4012_v27  ;;  %4513 = vst [vmem:[#allocation82_spill] sm:$0xff] %v4019_v58  ;;  %v4021_v59 = vcombine.high %v130_v0, %v138_v41  ;;  %v4027_v9 = vcombine.low %v130_v0, %v138_v41 }
 0x120   :  { %2173 = vmatpush1.bf16.msra.mxu0 %v3989_v4  ;;  %2214 = vmatpush1.bf16.msra.mxu1 %v3993_v3  ;;  %4515 = vst [vmem:[#allocation84_spill] sm:$0xff] %v4024_v10  ;;  %v147_v3 = vld [vmem:[#allocation6 + $0x2b8] sm:$0xff] }
 0x121   :  { %2174 = vmatprep.subr.bf16.mxu0 %v3995_v40  ;;  %2215 = vmatprep.subr.bf16.mxu1 %v3998_v26  ;;  %4514 = vst [vmem:[#allocation83_spill] sm:$0xff] %v4021_v59  ;;  %v146_v26 = vld [vmem:[#allocation6 + $0x2b0] sm:$0xff]  ;;  %v155_v4 = vld [vmem:[#allocation6 + $0x2f8] sm:$0xff] }
 0x122   :  { %v154_v40 = vld [vmem:[#allocation6 + $0x2f0] sm:$0xff]  ;;  %v4036_v43 = vcombine.high %v147_v3, %v155_v4  ;;  %v4043_v57 = vcombine.low %v147_v3, %v155_v4 }
 0x123   :  { %v4033_v13 = vcombine.high %v146_v26, %v154_v40  ;;  %v4039_v41 = vcombine.low %v146_v26, %v154_v40 }
 0x124   :  { %2175 = vmatpush1.bf16.msra.mxu0 %v4003_v24  ;;  %2216 = vmatpush1.bf16.msra.mxu1 %v4007_v25  ;;  %4516 = vst [vmem:[#allocation85_spill] sm:$0xff] %v4036_v43  ;;  %v163_v25 = vld [vmem:[#allocation6 + $0x338] sm:$0xff] }
 0x125   :  { %2176 = vmatprep.subr.bf16.mxu0 %v4009_v1  ;;  %2217 = vmatprep.subr.bf16.mxu1 %v4012_v27  ;;  %v162_v27 = vld [vmem:[#allocation6 + $0x330] sm:$0xff]  ;;  %v171_v24 = vld [vmem:[#allocation6 + $0x378] sm:$0xff] }
 0x126   :  { %v170_v1 = vld [vmem:[#allocation6 + $0x370] sm:$0xff]  ;;  %v4048_v0 = vcombine.high %v163_v25, %v171_v24  ;;  %v4055_v4 = vcombine.low %v163_v25, %v171_v24  ;;  %v4557_v25 = vld [vmem:[#allocation53_spill] sm:$0xff] }
 0x127   :  { %v4045_v42 = vcombine.high %v162_v27, %v170_v1  ;;  %v4051_v40 = vcombine.low %v162_v27, %v170_v1  ;;  %v4556_v24 = vld [vmem:[#allocation52_spill] sm:$0xff]  ;;  %v4558_v27 = vld [vmem:[#allocation54_spill] sm:$0xff] }
 0x128   :  { %2177 = vmatpush1.bf16.msra.mxu0 %v4015_v56  ;;  %2218 = vmatpush1.bf16.msra.mxu1 %v4019_v58  ;;  %v179_v58 = vld [vmem:[#allocation6 + $0x3b8] sm:$0xff] }
 0x129   :  { %2178 = vmatprep.subr.bf16.mxu0 %v4021_v59  ;;  %2219 = vmatprep.subr.bf16.mxu1 %v4024_v10  ;;  %v178_v10 = vld [vmem:[#allocation6 + $0x3b0] sm:$0xff]  ;;  %v187_v56 = vld [vmem:[#allocation6 + $0x3f8] sm:$0xff] }
 0x12a   :  { %v186_v59 = vld [vmem:[#allocation6 + $0x3f0] sm:$0xff]  ;;  %v4060_v26 = vcombine.high %v179_v58, %v187_v56  ;;  %v4067_v1 = vcombine.low %v179_v58, %v187_v56 }
 0x12b   :  { %v4057_v3 = vcombine.high %v178_v10, %v186_v59  ;;  %v4559_v56 = vld [vmem:[#allocation55_spill] sm:$0xff]  ;;  %v4560_v58 = vld [vmem:[#allocation56_spill] sm:$0xff] }
 0x12c   :  { %2179 = vmatpush1.bf16.msra.mxu0 %v4027_v9  ;;  %2220 = vmatpush1.bf16.msra.mxu1 %v4031_v12 }
 0x12d   :  { %2180 = vmatprep.subr.bf16.mxu0 %v4033_v13  ;;  %2221 = vmatprep.subr.bf16.mxu1 %v4036_v43  ;;  %v4063_v43 = vcombine.low %v178_v10, %v186_v59  ;;  %v4561_v59 = vld [vmem:[#allocation57_spill] sm:$0xff]  ;;  %v4562_v10 = vld [vmem:[#allocation58_spill] sm:$0xff] }
 0x130   :  { %2181 = vmatpush1.bf16.msra.mxu0 %v4039_v41  ;;  %2222 = vmatpush1.bf16.msra.mxu1 %v4043_v57 }
 0x131   :  { %2182 = vmatprep.subr.bf16.mxu0 %v4045_v42  ;;  %2223 = vmatprep.subr.bf16.mxu1 %v4048_v0 }
 0x134   :  { %2183 = vmatpush1.bf16.msra.mxu0 %v4051_v40  ;;  %2224 = vmatpush1.bf16.msra.mxu1 %v4055_v4 }
 0x135   :  { %2184 = vmatprep.subr.bf16.mxu0 %v4057_v3  ;;  %2225 = vmatprep.subr.bf16.mxu1 %v4060_v26 }
 0x138   :  { %2185 = vmatpush1.bf16.msra.mxu0 %v4063_v43  ;;  %2226 = vmatpush1.bf16.msra.mxu1 %v4067_v1 }
 0x139   :  { %2252 = vmatprep.subr.bf16.mxu0 %v3672_v14  ;;  %2293 = vmatprep.subr.bf16.mxu1 %v3674_v15  ;;  %v57_v14 = vunpack.c.l.bf16 %v3658_v11  ;;  %v3493_v15 = vld [vmem:[#allocation3] sm:$0x3] }
 0x13b   :  { %2203 = vmatmul.mubr.bf16.vlgmr.msra.gmra.mrb[12].mxu0 %v3658_v11  ;;  %2244 = vmatmul.mubr.bf16.vlgmr.msra.gmra.mrb[12].mxu1 %v3658_v11  ;;  %v4517_v11 = vld [vmem:[#allocation13_spill] sm:$0xff] }
 0x13c   :  { %2253 = vmatpush1.bf16.msra.mxu0 %v3676_v20  ;;  %2294 = vmatpush1.bf16.msra.mxu1 %v3679_v21  ;;  %v58_v20 = vsub.f32 %v3493_v15, %v57_v14  ;;  %v4563_v14 = vld [vmem:[#allocation59_spill] sm:$0xff]  ;;  %v4564_v15 = vld [vmem:[#allocation60_spill] sm:$0xff] }
 0x13d   :  { %2254 = vmatprep.subr.bf16.mxu0 %v3681_v22  ;;  %2295 = vmatprep.subr.bf16.mxu1 %v3684_v23  ;;  %v4518_v22 = vld [vmem:[#allocation14_spill] sm:$0xff]  ;;  %v4519_v23 = vld [vmem:[#allocation15_spill] sm:$0xff] }
 0x13e   :  { %2284 = vmatprep.mubr.bf16.mxu0 %v4475_v2  ;;  %2325 = vmatprep.mubr.bf16.mxu1 %v4475_v2  ;;  %v4107_v21 = vpack.c.bf16 %v58_v20, %v58_v20  ;;  %v4565_v20 = vld [vmem:[#allocation61_spill] sm:$0xff] }
 0x140   :  { %2255 = vmatpush1.bf16.msra.mxu0 %v3689_v28  ;;  %2296 = vmatpush1.bf16.msra.mxu1 %v3693_v29  ;;  %v4520_v28 = vld [vmem:[#allocation16_spill] sm:$0xff]  ;;  %v4521_v29 = vld [vmem:[#allocation17_spill] sm:$0xff] }
 0x141   :  { %2256 = vmatprep.subr.bf16.mxu0 %v3695_v30  ;;  %2297 = vmatprep.subr.bf16.mxu1 %v3698_v31  ;;  %v4522_v30 = vld [vmem:[#allocation18_spill] sm:$0xff]  ;;  %v4523_v31 = vld [vmem:[#allocation19_spill] sm:$0xff] }
 0x144   :  { %2257 = vmatpush1.bf16.msra.mxu0 %v3703_v36  ;;  %2298 = vmatpush1.bf16.msra.mxu1 %v3707_v37  ;;  %v4524_v36 = vld [vmem:[#allocation20_spill] sm:$0xff]  ;;  %v4525_v37 = vld [vmem:[#allocation21_spill] sm:$0xff] }
 0x145   :  { %2258 = vmatprep.subr.bf16.mxu0 %v3709_v38  ;;  %2299 = vmatprep.subr.bf16.mxu1 %v3712_v39  ;;  %v4526_v38 = vld [vmem:[#allocation22_spill] sm:$0xff]  ;;  %v4527_v39 = vld [vmem:[#allocation23_spill] sm:$0xff] }
 0x148   :  { %2259 = vmatpush1.bf16.msra.mxu0 %v3715_v44  ;;  %2300 = vmatpush1.bf16.msra.mxu1 %v3719_v45  ;;  %v4528_v44 = vld [vmem:[#allocation24_spill] sm:$0xff]  ;;  %v4529_v45 = vld [vmem:[#allocation25_spill] sm:$0xff] }
 0x149   :  { %2260 = vmatprep.subr.bf16.mxu0 %v3721_v46  ;;  %2301 = vmatprep.subr.bf16.mxu1 %v3724_v47  ;;  %v4530_v46 = vld [vmem:[#allocation26_spill] sm:$0xff]  ;;  %v4531_v47 = vld [vmem:[#allocation27_spill] sm:$0xff] }
 0x14c   :  { %2261 = vmatpush1.bf16.msra.mxu0 %v3727_v52  ;;  %2302 = vmatpush1.bf16.msra.mxu1 %v3731_v53  ;;  %v4532_v52 = vld [vmem:[#allocation28_spill] sm:$0xff]  ;;  %v4533_v53 = vld [vmem:[#allocation29_spill] sm:$0xff] }
 0x14d   :  { %2262 = vmatprep.subr.bf16.mxu0 %v3733_v54  ;;  %2303 = vmatprep.subr.bf16.mxu1 %v3736_v55  ;;  %v4534_v54 = vld [vmem:[#allocation30_spill] sm:$0xff]  ;;  %v4535_v55 = vld [vmem:[#allocation31_spill] sm:$0xff] }
 0x150   :  { %2263 = vmatpush1.bf16.msra.mxu0 %v3739_v60  ;;  %2304 = vmatpush1.bf16.msra.mxu1 %v3743_v61  ;;  %v4536_v60 = vld [vmem:[#allocation32_spill] sm:$0xff]  ;;  %v4537_v61 = vld [vmem:[#allocation33_spill] sm:$0xff] }
 0x151   :  { %2264 = vmatprep.subr.bf16.mxu0 %v3745_v62  ;;  %2305 = vmatprep.subr.bf16.mxu1 %v3748_v63  ;;  %v4538_v62 = vld [vmem:[#allocation34_spill] sm:$0xff]  ;;  %v4539_v63 = vld [vmem:[#allocation35_spill] sm:$0xff] }
 0x154   :  { %2265 = vmatpush1.bf16.msra.mxu0 %v3751_v5  ;;  %2306 = vmatpush1.bf16.msra.mxu1 %v3755_v6  ;;  %v4540_v5 = vld [vmem:[#allocation36_spill] sm:$0xff]  ;;  %v4541_v6 = vld [vmem:[#allocation37_spill] sm:$0xff] }
 0x155   :  { %2266 = vmatprep.subr.bf16.mxu0 %v3757_v7  ;;  %2307 = vmatprep.subr.bf16.mxu1 %v3760_v8  ;;  %v4542_v7 = vld [vmem:[#allocation38_spill] sm:$0xff]  ;;  %v4543_v8 = vld [vmem:[#allocation39_spill] sm:$0xff] }
 0x158   :  { %2267 = vmatpush1.bf16.msra.mxu0 %v3763_v16  ;;  %2308 = vmatpush1.bf16.msra.mxu1 %v3767_v17  ;;  %v4544_v16 = vld [vmem:[#allocation40_spill] sm:$0xff]  ;;  %v4545_v17 = vld [vmem:[#allocation41_spill] sm:$0xff] }
 0x159   :  { %2334 = vmatprep.subr.bf16.mxu0 %v3769_v18  ;;  %2375 = vmatprep.subr.bf16.mxu1 %v3772_v19  ;;  %v4546_v18 = vld [vmem:[#allocation42_spill] sm:$0xff]  ;;  %v4547_v19 = vld [vmem:[#allocation43_spill] sm:$0xff] }
 0x15b   :  { %2285 = vmatmul.mubr.bf16.vlgmr.msra.gmra.mrb[0].mxu0 %v4107_v21  ;;  %2326 = vmatmul.mubr.bf16.vlgmr.msra.gmra.mrb[0].mxu1 %v4107_v21 }
 0x15c   :  { %2335 = vmatpush1.bf16.msra.mxu0 %v3775_v32  ;;  %2376 = vmatpush1.bf16.msra.mxu1 %v3779_v33  ;;  %v4548_v32 = vld [vmem:[#allocation44_spill] sm:$0xff]  ;;  %v4549_v33 = vld [vmem:[#allocation45_spill] sm:$0xff] }
 0x15d   :  { %2336 = vmatprep.subr.bf16.mxu0 %v3781_v34  ;;  %2377 = vmatprep.subr.bf16.mxu1 %v3784_v35  ;;  %v4550_v34 = vld [vmem:[#allocation46_spill] sm:$0xff]  ;;  %v4551_v35 = vld [vmem:[#allocation47_spill] sm:$0xff] }
 0x15e   :  { %2366 = vmatprep.mubr.bf16.mxu0 %v4475_v2  ;;  %2407 = vmatprep.mubr.bf16.mxu1 %v4475_v2 }
 0x160   :  { %2337 = vmatpush1.bf16.msra.mxu0 %v3789_v48  ;;  %2378 = vmatpush1.bf16.msra.mxu1 %v3793_v49  ;;  %v4552_v48 = vld [vmem:[#allocation48_spill] sm:$0xff]  ;;  %v4553_v49 = vld [vmem:[#allocation49_spill] sm:$0xff] }
 0x161   :  { %2338 = vmatprep.subr.bf16.mxu0 %v3795_v50  ;;  %2379 = vmatprep.subr.bf16.mxu1 %v3798_v51  ;;  %v4554_v50 = vld [vmem:[#allocation50_spill] sm:$0xff]  ;;  %v4555_v51 = vld [vmem:[#allocation51_spill] sm:$0xff] }
 0x164   :  { %2339 = vmatpush1.bf16.msra.mxu0 %v4517_v11  ;;  %2380 = vmatpush1.bf16.msra.mxu1 %v4518_v22  ;;  %v4566_v11 = vld [vmem:[#allocation62_spill] sm:$0xff]  ;;  %v4567_v22 = vld [vmem:[#allocation63_spill] sm:$0xff] }
 0x165   :  { %2340 = vmatprep.subr.bf16.mxu0 %v4519_v23  ;;  %2381 = vmatprep.subr.bf16.mxu1 %v4520_v28  ;;  %v4568_v23 = vld [vmem:[#allocation64_spill] sm:$0xff]  ;;  %v4569_v28 = vld [vmem:[#allocation65_spill] sm:$0xff] }
 0x168   :  { %2341 = vmatpush1.bf16.msra.mxu0 %v4521_v29  ;;  %2382 = vmatpush1.bf16.msra.mxu1 %v4522_v30  ;;  %v4570_v29 = vld [vmem:[#allocation66_spill] sm:$0xff]  ;;  %v4571_v30 = vld [vmem:[#allocation67_spill] sm:$0xff] }
 0x169   :  { %2342 = vmatprep.subr.bf16.mxu0 %v4523_v31  ;;  %2383 = vmatprep.subr.bf16.mxu1 %v4524_v36  ;;  %v4572_v31 = vld [vmem:[#allocation68_spill] sm:$0xff]  ;;  %v4573_v36 = vld [vmem:[#allocation69_spill] sm:$0xff] }
 0x16c   :  { %2343 = vmatpush1.bf16.msra.mxu0 %v4525_v37  ;;  %2384 = vmatpush1.bf16.msra.mxu1 %v4526_v38  ;;  %v4574_v37 = vld [vmem:[#allocation70_spill] sm:$0xff]  ;;  %v4575_v38 = vld [vmem:[#allocation71_spill] sm:$0xff] }
 0x16d   :  { %2344 = vmatprep.subr.bf16.mxu0 %v4527_v39  ;;  %2385 = vmatprep.subr.bf16.mxu1 %v4528_v44  ;;  %v4576_v39 = vld [vmem:[#allocation72_spill] sm:$0xff]  ;;  %v4577_v44 = vld [vmem:[#allocation73_spill] sm:$0xff] }
 0x170   :  { %2345 = vmatpush1.bf16.msra.mxu0 %v4529_v45  ;;  %2386 = vmatpush1.bf16.msra.mxu1 %v4530_v46  ;;  %v4578_v45 = vld [vmem:[#allocation74_spill] sm:$0xff]  ;;  %v4579_v46 = vld [vmem:[#allocation75_spill] sm:$0xff] }
 0x171   :  { %2346 = vmatprep.subr.bf16.mxu0 %v4531_v47  ;;  %2387 = vmatprep.subr.bf16.mxu1 %v4532_v52  ;;  %v4580_v47 = vld [vmem:[#allocation76_spill] sm:$0xff]  ;;  %v4581_v52 = vld [vmem:[#allocation77_spill] sm:$0xff] }
 0x174   :  { %2347 = vmatpush1.bf16.msra.mxu0 %v4533_v53  ;;  %2388 = vmatpush1.bf16.msra.mxu1 %v4534_v54  ;;  %v4582_v53 = vld [vmem:[#allocation78_spill] sm:$0xff]  ;;  %v4583_v54 = vld [vmem:[#allocation79_spill] sm:$0xff] }
 0x175   :  { %2348 = vmatprep.subr.bf16.mxu0 %v4535_v55  ;;  %2389 = vmatprep.subr.bf16.mxu1 %v4536_v60  ;;  %v4584_v55 = vld [vmem:[#allocation80_spill] sm:$0xff]  ;;  %v4585_v60 = vld [vmem:[#allocation81_spill] sm:$0xff] }
 0x178   :  { %2349 = vmatpush1.bf16.msra.mxu0 %v4537_v61  ;;  %2390 = vmatpush1.bf16.msra.mxu1 %v4538_v62  ;;  %v4586_v61 = vld [vmem:[#allocation82_spill] sm:$0xff]  ;;  %v4587_v62 = vld [vmem:[#allocation83_spill] sm:$0xff] }
 0x179   :  { %2416 = vmatprep.subr.bf16.mxu0 %v4539_v63  ;;  %2457 = vmatprep.subr.bf16.mxu1 %v4540_v5  ;;  %v4588_v63 = vld [vmem:[#allocation84_spill] sm:$0xff]  ;;  %v4589_v5 = vld [vmem:[#allocation85_spill] sm:$0xff] }
 0x17b   :  { %2367 = vmatmul.mubr.bf16.vlgmr.msra.gmra.mrb[4].mxu0 %v4107_v21  ;;  %2408 = vmatmul.mubr.bf16.vlgmr.msra.gmra.mrb[4].mxu1 %v4107_v21 }
 0x17c   :  { %2417 = vmatpush1.bf16.msra.mxu0 %v4541_v6  ;;  %2458 = vmatpush1.bf16.msra.mxu1 %v4542_v7 }
 0x17d   :  { %2418 = vmatprep.subr.bf16.mxu0 %v4543_v8  ;;  %2459 = vmatprep.subr.bf16.mxu1 %v4544_v16 }
 0x17e   :  { %2448 = vmatprep.mubr.bf16.mxu0 %v4475_v2  ;;  %2489 = vmatprep.mubr.bf16.mxu1 %v4475_v2 }
 0x180   :  { %2419 = vmatpush1.bf16.msra.mxu0 %v4545_v17  ;;  %2460 = vmatpush1.bf16.msra.mxu1 %v4546_v18 }
 0x181   :  { %2420 = vmatprep.subr.bf16.mxu0 %v4547_v19  ;;  %2461 = vmatprep.subr.bf16.mxu1 %v4548_v32 }
 0x184   :  { %2421 = vmatpush1.bf16.msra.mxu0 %v4549_v33  ;;  %2462 = vmatpush1.bf16.msra.mxu1 %v4550_v34 }
 0x185   :  { %2422 = vmatprep.subr.bf16.mxu0 %v4551_v35  ;;  %2463 = vmatprep.subr.bf16.mxu1 %v4552_v48 }
 0x188   :  { %2423 = vmatpush1.bf16.msra.mxu0 %v4553_v49  ;;  %2464 = vmatpush1.bf16.msra.mxu1 %v4554_v50 }
 0x189   :  { %2424 = vmatprep.subr.bf16.mxu0 %v4555_v51  ;;  %2465 = vmatprep.subr.bf16.mxu1 %v4556_v24 }
 0x18c   :  { %2425 = vmatpush1.bf16.msra.mxu0 %v4557_v25  ;;  %2466 = vmatpush1.bf16.msra.mxu1 %v4558_v27 }
 0x18d   :  { %2426 = vmatprep.subr.bf16.mxu0 %v4559_v56  ;;  %2467 = vmatprep.subr.bf16.mxu1 %v4560_v58 }
 0x190   :  { %2427 = vmatpush1.bf16.msra.mxu0 %v4561_v59  ;;  %2468 = vmatpush1.bf16.msra.mxu1 %v4562_v10 }
 0x191   :  { %2428 = vmatprep.subr.bf16.mxu0 %v4563_v14  ;;  %2469 = vmatprep.subr.bf16.mxu1 %v4564_v15 }
 0x194   :  { %2429 = vmatpush1.bf16.msra.mxu0 %v4565_v20  ;;  %2470 = vmatpush1.bf16.msra.mxu1 %v4566_v11 }
 0x195   :  { %2430 = vmatprep.subr.bf16.mxu0 %v4567_v22  ;;  %2471 = vmatprep.subr.bf16.mxu1 %v4568_v23 }
 0x198   :  { %2431 = vmatpush1.bf16.msra.mxu0 %v4569_v28  ;;  %2472 = vmatpush1.bf16.msra.mxu1 %v4570_v29 }
 0x199   :  { %2498 = vmatprep.subr.bf16.mxu0 %v4571_v30  ;;  %2539 = vmatprep.subr.bf16.mxu1 %v4572_v31  ;;  %v2697_v31 = vld [vmem:[#allocation8 + $0x4] sm:$0x1] }
 0x19a   :  { %vm2709_vm13 = vcmp.gt.f32.partialorder %v2697_v31, 0.0 }
 0x19b   :  { %2449 = vmatmul.mubr.bf16.vlgmr.msra.gmra.mrb[8].mxu0 %v4107_v21  ;;  %2490 = vmatmul.mubr.bf16.vlgmr.msra.gmra.mrb[8].mxu1 %v4107_v21 }
 0x19c   :  { %2499 = vmatpush1.bf16.msra.mxu0 %v4573_v36  ;;  %2540 = vmatpush1.bf16.msra.mxu1 %v4574_v37  ;;  %v2747_v36 = vld [vmem:[#allocation8 + $0x6] sm:$0x1]  ;;  %v2710_v37 = vsel %vm2709_vm13, 1, %v4475_v2 }
 0x19d   :  { %2500 = vmatprep.subr.bf16.mxu0 %v4575_v38  ;;  %2541 = vmatprep.subr.bf16.mxu1 %v4576_v39  ;;  %vm2759_vm14 = vcmp.gt.f32.partialorder %v2747_v36, 0.0  ;;  %v2722_v38 = vld [vmem:[#allocation8 + $0x5] sm:$0x1] }
 0x19e   :  { %2530 = vmatprep.mubr.bf16.mxu0 %v4475_v2  ;;  %2571 = vmatprep.mubr.bf16.mxu1 %v4475_v2  ;;  %v2760_v39 = vsel %vm2759_vm14, 1, %v4475_v2  ;;  %vm2734_vm15 = vcmp.gt.f32.partialorder %v2722_v38, 0.0 }
 0x1a0   :  { %2501 = vmatpush1.bf16.msra.mxu0 %v4577_v44  ;;  %2542 = vmatpush1.bf16.msra.mxu1 %v4578_v45  ;;  %v2772_v45 = vld [vmem:[#allocation8 + $0x7] sm:$0x1] }
 0x1a1   :  { %2502 = vmatprep.subr.bf16.mxu0 %v4579_v46  ;;  %2543 = vmatprep.subr.bf16.mxu1 %v4580_v47  ;;  %v2735_v47 = vsel %vm2734_vm15, 1, %v4475_v2 }
 0x1a4   :  { %2503 = vmatpush1.bf16.msra.mxu0 %v4581_v52  ;;  %2544 = vmatpush1.bf16.msra.mxu1 %v4582_v53 }
 0x1a5   :  { %2504 = vmatprep.subr.bf16.mxu0 %v4583_v54  ;;  %2545 = vmatprep.subr.bf16.mxu1 %v4584_v55 }
 0x1a8   :  { %2505 = vmatpush1.bf16.msra.mxu0 %v4585_v60  ;;  %2546 = vmatpush1.bf16.msra.mxu1 %v4586_v61 }
 0x1a9   :  { %2506 = vmatprep.subr.bf16.mxu0 %v4587_v62  ;;  %2547 = vmatprep.subr.bf16.mxu1 %v4588_v63 }
 0x1ac   :  { %2507 = vmatpush1.bf16.msra.mxu0 %v4027_v9  ;;  %2548 = vmatpush1.bf16.msra.mxu1 %v4031_v12  ;;  %v2598_v9 = vlaneseq  ;;  %v2596_v12 = vld [vmem:[#allocation8] sm:$0x1] }
 0x1ad   :  { %2508 = vmatprep.subr.bf16.mxu0 %v4033_v13  ;;  %2549 = vmatprep.subr.bf16.mxu1 %v4589_v5  ;;  %vm2609_vm0 = vcmp.gt.f32.partialorder %v2596_v12, 0.0 }
 0x1ae   :  { %v2599_v13 = vshrl.u32 %v2598_v9, 7 }
 0x1b0   :  { %2509 = vmatpush1.bf16.msra.mxu0 %v4039_v41  ;;  %2550 = vmatpush1.bf16.msra.mxu1 %v4043_v57  ;;  %v2647_v41 = vld [vmem:[#allocation8 + $0x2] sm:$0x1]  ;;  %v2622_v57 = vld [vmem:[#allocation8 + $0x1] sm:$0x1] }
 0x1b1   :  { %2510 = vmatprep.subr.bf16.mxu0 %v4045_v42  ;;  %2551 = vmatprep.subr.bf16.mxu1 %v4048_v0  ;;  %vm2659_vm1 = vcmp.gt.f32.partialorder %v2647_v41, 0.0  ;;  %v4221_v42 = vsub.s32 0, %v2599_v13  ;;  %v2610_v0 = vsel %vm2609_vm0, 1, %v4475_v2  ;;  %vm2634_vm2 = vcmp.gt.f32.partialorder %v2622_v57, 0.0 }
 0x1b3   :  { %v2601_v8 = vrot.slane %v2596_v12, %v4221_v42  ;;  %v2652_v56 = vrot.slane %v2647_v41, %v4221_v42  ;;  %v2627_v20 = vrot.slane %v2622_v57, %v4221_v42  ;;  %v2714_v44 = vrot.slane %v2710_v37, %v4221_v42 }
 0x1b4   :  { %2511 = vmatpush1.bf16.msra.mxu0 %v4051_v40  ;;  %2552 = vmatpush1.bf16.msra.mxu1 %v4055_v4  ;;  %v2672_v40 = vld [vmem:[#allocation8 + $0x3] sm:$0x1]  ;;  %v2614_v4 = vrot.slane %v2610_v0, %v4221_v42  ;;  %v2764_v46 = vrot.slane %v2760_v39, %v4221_v42  ;;  %v2702_v53 = vrot.slane %v2697_v31, %v4221_v42 }
 0x1b5   :  { %2512 = vmatprep.subr.bf16.mxu0 %v4057_v3  ;;  %2553 = vmatprep.subr.bf16.mxu1 %v4060_v26  ;;  %v2635_v3 = vsel %vm2634_vm2, 1, %v4475_v2  ;;  %vm2684_vm3 = vcmp.gt.f32.partialorder %v2672_v40, 0.0  ;;  %v2677_v15 = vrot.slane %v2672_v40, %v4221_v42  ;;  %vm4261_vm0 = vcmp.eq.s32.totalorder %v2714_v44, 1 }
 0x1b6   :  { %vm4229_vm4 = vcmp.eq.s32.totalorder %v2614_v4, 1  ;;  %v2685_v6 = vsel %vm2684_vm3, 1, %v4475_v2  ;;  %vm4266_vm2 = vcmp.eq.s32.totalorder %v2764_v46, 1  ;;  %v2752_v60 = vrot.slane %v2747_v36, %v4221_v42 }
 0x1b7   :  { %v2689_v32 = vrot.slane %v2685_v6, %v4221_v42  ;;  %v2739_v61 = vrot.slane %v2735_v47, %v4221_v42 }
 0x1b8   :  { %2513 = vmatpush1.bf16.msra.mxu0 %v4063_v43  ;;  %2554 = vmatpush1.bf16.msra.mxu1 %v4067_v1  ;;  %v2660_v43 = vsel %vm2659_vm1, 1, %v4475_v2  ;;  %v2639_v1 = vrot.slane %v2635_v3, %v4221_v42  ;;  %vm2784_vm1 = vcmp.gt.f32.partialorder %v2772_v45, 0.0 }
 0x1b9   :  { %v2664_v26 = vrot.slane %v2660_v43, %v4221_v42  ;;  %vm2690_vm10 = vcmp.eq.s32.totalorder %v2689_v32, 1  ;;  %v2785_v9 = vsel %vm2784_vm1, 1, %v4475_v2 }
 0x1ba   :  { %vm4237_vm8 = vcmp.eq.s32.totalorder %v2639_v1, 1  ;;  %v2727_v1 = vrot.slane %v2722_v38, %v4221_v42 }
 0x1bb   :  { %2531 = vmatmul.mubr.bf16.vlgmr.msra.gmra.mrb[12].mxu0 %v4107_v21  ;;  %2572 = vmatmul.mubr.bf16.vlgmr.msra.gmra.mrb[12].mxu1 %v4107_v21  ;;  %vm2665_vm5 = vcmp.eq.s32.totalorder %v2664_v26, 1  ;;  %v2789_v21 = vrot.slane %v2785_v9, %v4221_v42 }
 0x22e   :  { %v2286_v7 = vpop.f32.mrb[0].mxu0  ;;  %v2327_v16 = vpop.f32.mrb[0].mxu1 }
 0x22f   :  { %vm2597_vm7 = vcmp.gt.f32.partialorder %v2286_v7, 0.0  ;;  %v2288_v17 = vpop.f32.mrb[1].mxu0  ;;  %v2616_v18 = vsel %vm4229_vm4, %v2286_v7, -3e+38  ;;  %v2329_v33 = vpop.f32.mrb[1].mxu1  ;;  %vm2648_vm9 = vcmp.gt.f32.partialorder %v2327_v16, 0.0 }
 0x230   :  { %v2290_v34 = vpop.f32.mrb[2].mxu0  ;;  %v2666_v35 = vsel %vm2665_vm5, %v2327_v16, -3e+38  ;;  %v2331_v48 = vpop.f32.mrb[2].mxu1  ;;  %v2617_v50 = vsel %vm2603_vm6, %v2616_v18, -inf  ;;  %v2602_v25 = vsel %vm2597_vm7, %v2601_v8, 0.0 }
 0x231   :  { %v2667_v49 = vsel %vm2603_vm6, %v2666_v35, -inf  ;;  %v2291_v51 = vpop.f32.mrb[3].mxu0  ;;  %v2332_v24 = vpop.f32.mrb[3].mxu1  ;;  %2618 = vmax.xlane.f32.xlu0 %v2617_v50  ;;  %v2641_v27 = vsel %vm4237_vm8, %v2288_v17, -3e+38  ;;  %v2604_v58 = vsel %vm2603_vm6, %v2602_v25, 0.0 }
 0x232   :  { %2668 = vmax.xlane.f32.xlu1 %v2667_v49  ;;  %v2642_v59 = vsel %vm2603_vm6, %v2641_v27, -inf  ;;  %v2653_v10 = vsel %vm2648_vm9, %v2652_v56, 0.0  ;;  %v2691_v14 = vsel %vm2690_vm10, %v2329_v33, -3e+38  ;;  %vm2623_vm11 = vcmp.gt.f32.partialorder %v2288_v17, 0.0 }
 0x233   :  { %vm2673_vm12 = vcmp.gt.f32.partialorder %v2329_v33, 0.0  ;;  %v2654_v11 = vsel %vm2603_vm6, %v2653_v10, 0.0  ;;  %v2692_v22 = vsel %vm2603_vm6, %v2691_v14, -inf  ;;  %v2628_v28 = vsel %vm2623_vm11, %v2627_v20, 0.0  ;;  %v2797_v48 = vld [vmem:[#allocation8 + $0x8] sm:$0x1] }
 0x234   :  { %v2678_v23 = vsel %vm2673_vm12, %v2677_v15, 0.0  ;;  %v2629_v30 = vsel %vm2603_vm6, %v2628_v28, 0.0  ;;  %vm2740_vm5 = vcmp.eq.s32.totalorder %v2739_v61, 1  ;;  %vm2790_vm8 = vcmp.eq.s32.totalorder %v2789_v21, 1  ;;  %v2847_v49 = vld [vmem:[#allocation8 + $0xa] sm:$0x1] }
 0x235   :  { %2605 = vadd.xlane.f32.xlu0 %v2604_v58  ;;  %v2679_v29 = vsel %vm2603_vm6, %v2678_v23, 0.0  ;;  %v2777_v17 = vrot.slane %v2772_v45, %v4221_v42  ;;  %vm2809_vm10 = vcmp.gt.f32.partialorder %v2797_v48, 0.0  ;;  %vm2859_vm11 = vcmp.gt.f32.partialorder %v2847_v49, 0.0  ;;  %v2822_v51 = vld [vmem:[#allocation8 + $0x9] sm:$0x1] }
 0x236   :  { %2643 = vmax.xlane.f32.xlu1 %v2642_v59  ;;  %v2810_v50 = vsel %vm2809_vm10, 1, %v4475_v2  ;;  %v2860_v24 = vsel %vm2859_vm11, 1, %v4475_v2  ;;  %vm2834_vm12 = vcmp.gt.f32.partialorder %v2822_v51, 0.0  ;;  %v2872_v27 = vld [vmem:[#allocation8 + $0xb] sm:$0x1]  ;;  %v2802_v10 = vrot.slane %v2797_v48, %v4221_v42 }
 0x237   :  { %v2814_v25 = vrot.slane %v2810_v50, %v4221_v42  ;;  %v2864_v56 = vrot.slane %v2860_v24, %v4221_v42  ;;  %v2835_v58 = vsel %vm2834_vm12, 1, %v4475_v2  ;;  %vm2884_vm14 = vcmp.gt.f32.partialorder %v2872_v27, 0.0 }
 0x238   :  { %v2852_v20 = vrot.slane %v2847_v49, %v4221_v42  ;;  %v2827_v52 = vrot.slane %v2822_v51, %v4221_v42 }
 0x239   :  { %2655 = vadd.xlane.f32.xlu0 %v2654_v11  ;;  %vm4293_vm13 = vcmp.eq.s32.totalorder %v2814_v25, 1  ;;  %vm4298_vm15 = vcmp.eq.s32.totalorder %v2864_v56, 1  ;;  %v2839_v11 = vrot.slane %v2835_v58, %v4221_v42 }
 0x23a   :  { %2693 = vmax.xlane.f32.xlu1 %v2692_v22 }
 0x23d   :  { %2680 = vadd.xlane.f32.xlu0 %v2679_v29  ;;  %v2885_v29 = vsel %vm2884_vm14, 1, %v4475_v2 }
 0x23e   :  { %2630 = vadd.xlane.f32.xlu1 %v2629_v30 }
 0x24e   :  { %v2368_v54 = vpop.f32.mrb[4].mxu0  ;;  %v2409_v62 = vpop.f32.mrb[4].mxu1 }
 0x24f   :  { %vm2698_vm3 = vcmp.gt.f32.partialorder %v2368_v54, 0.0  ;;  %v2370_v63 = vpop.f32.mrb[5].mxu0  ;;  %v2716_v5 = vsel %vm4261_vm0, %v2368_v54, -3e+38  ;;  %vm2748_vm4 = vcmp.gt.f32.partialorder %v2409_v62, 0.0  ;;  %v2411_v12 = vpop.f32.mrb[5].mxu1 }
 0x250   :  { %v2372_v13 = vpop.f32.mrb[6].mxu0  ;;  %v2717_v41 = vsel %vm2603_vm6, %v2716_v5, -inf  ;;  %v2703_v57 = vsel %vm2698_vm3, %v2702_v53, 0.0  ;;  %v2413_v0 = vpop.f32.mrb[6].mxu1  ;;  %v2766_v4 = vsel %vm4266_vm2, %v2409_v62, -3e+38  ;;  %v2889_v53 = vrot.slane %v2885_v29, %v4221_v42 }
 0x251   :  { %2718 = vmax.xlane.f32.xlu1 %v2717_v41  ;;  %v2373_v43 = vpop.f32.mrb[7].mxu0  ;;  %v2704_v40 = vsel %vm2603_vm6, %v2703_v57, 0.0  ;;  %v2414_v3 = vpop.f32.mrb[7].mxu1  ;;  %v2753_v26 = vsel %vm2748_vm4, %v2752_v60, 0.0  ;;  %vm2723_vm7 = vcmp.gt.f32.partialorder %v2370_v63, 0.0  ;;  %v2767_v6 = vsel %vm2603_vm6, %v2766_v4, -inf }
 0x252   :  { %2705 = vadd.xlane.f32.xlu0 %v2704_v40  ;;  %v2754_v7 = vsel %vm2603_vm6, %v2753_v26, 0.0  ;;  %v2741_v8 = vsel %vm2740_vm5, %v2370_v63, -3e+38  ;;  %v2728_v16 = vsel %vm2723_vm7, %v2727_v1, 0.0  ;;  %vm2773_vm9 = vcmp.gt.f32.partialorder %v2411_v12, 0.0 }
 0x253   :  { %v2742_v18 = vsel %vm2603_vm6, %v2741_v8, -inf  ;;  %v2729_v19 = vsel %vm2603_vm6, %v2728_v16, 0.0  ;;  %v2791_v32 = vsel %vm2790_vm8, %v2411_v12, -3e+38  ;;  %v2778_v33 = vsel %vm2773_vm9, %v2777_v17, 0.0 }
 0x254   :  { %v2792_v34 = vsel %vm2603_vm6, %v2791_v32, -inf  ;;  %v2779_v35 = vsel %vm2603_vm6, %v2778_v33, 0.0  ;;  %vm2840_vm2 = vcmp.eq.s32.totalorder %v2839_v11, 1  ;;  %vm2890_vm4 = vcmp.eq.s32.totalorder %v2889_v53, 1  ;;  %v2897_v57 = vld [vmem:[#allocation8 + $0xc] sm:$0x1] }
 0x255   :  { %2768 = vmax.xlane.f32.xlu1 %v2767_v6  ;;  %v2877_v62 = vrot.slane %v2872_v27, %v4221_v42  ;;  %v2947_v0 = vld [vmem:[#allocation8 + $0xe] sm:$0x1]  ;;  %vm2909_vm7 = vcmp.gt.f32.partialorder %v2897_v57, 0.0  ;;  %v2922_v40 = vld [vmem:[#allocation8 + $0xd] sm:$0x1] }
 0x256   :  { %2755 = vadd.xlane.f32.xlu0 %v2754_v7  ;;  %vm2959_vm8 = vcmp.gt.f32.partialorder %v2947_v0, 0.0  ;;  %v2910_v43 = vsel %vm2909_vm7, 1, %v4475_v2  ;;  %vm2934_vm9 = vcmp.gt.f32.partialorder %v2922_v40, 0.0  ;;  %v2972_v26 = vld [vmem:[#allocation8 + $0xf] sm:$0x1]  ;;  %v2902_v7 = vrot.slane %v2897_v57, %v4221_v42 }
 0x257   :  { %v2960_v4 = vsel %vm2959_vm8, 1, %v4475_v2  ;;  %v2914_v3 = vrot.slane %v2910_v43, %v4221_v42  ;;  %v2935_v21 = vsel %vm2934_vm9, 1, %v4475_v2  ;;  %vm2984_vm11 = vcmp.gt.f32.partialorder %v2972_v26, 0.0 }
 0x258   :  { %v2964_v1 = vrot.slane %v2960_v4, %v4221_v42  ;;  %v2952_v17 = vrot.slane %v2947_v0, %v4221_v42  ;;  %v2977_v11 = vrot.slane %v2972_v26, %v4221_v42  ;;  %vm2645_vm7 = vcmask 140424  }
 0x259   :  { %2743 = vmax.xlane.f32.xlu1 %v2742_v18  ;;  %vm4325_vm10 = vcmp.eq.s32.totalorder %v2914_v3, 1  ;;  %v2939_v18 = vrot.slane %v2935_v21, %v4221_v42  ;;  %vm2657_vm8 = vcmask 17424   ;;  %vm2670_vm9 = vcmask 148624  }
 0x25a   :  { %2730 = vadd.xlane.f32.xlu0 %v2729_v19  ;;  %vm4330_vm12 = vcmp.eq.s32.totalorder %v2964_v1, 1 }
 0x25d   :  { %2793 = vmax.xlane.f32.xlu1 %v2792_v34  ;;  %v2985_v34 = vsel %vm2984_vm11, 1, %v4475_v2  ;;  %v2927_v2 = vrot.slane %v2922_v40, %v4221_v42  ;;  %vm2707_vm11 = vcmask 33824  }
 0x25e   :  { %2780 = vadd.xlane.f32.xlu0 %v2779_v35  ;;  %v2989_v59 = vrot.slane %v2985_v34, %v4221_v42 }
 0x26e   :  { %v2450_v14 = vpop.f32.mrb[8].mxu0  ;;  %v2491_v22 = vpop.f32.mrb[8].mxu1 }
 0x26f   :  { %vm2798_vm0 = vcmp.gt.f32.partialorder %v2450_v14, 0.0  ;;  %v2452_v23 = vpop.f32.mrb[9].mxu0  ;;  %v2816_v28 = vsel %vm4293_vm13, %v2450_v14, -3e+38  ;;  %vm2848_vm1 = vcmp.gt.f32.partialorder %v2491_v22, 0.0  ;;  %v2493_v30 = vpop.f32.mrb[9].mxu1 }
 0x270   :  { %v2454_v31 = vpop.f32.mrb[10].mxu0  ;;  %v2817_v36 = vsel %vm2603_vm6, %v2816_v28, -inf  ;;  %v2803_v37 = vsel %vm2798_vm0, %v2802_v10, 0.0  ;;  %v2495_v38 = vpop.f32.mrb[10].mxu1  ;;  %v2866_v45 = vsel %vm4298_vm15, %v2491_v22, -3e+38 }
 0x271   :  { %2818 = vmax.xlane.f32.xlu1 %v2817_v36  ;;  %v2455_v39 = vpop.f32.mrb[11].mxu0  ;;  %v2804_v44 = vsel %vm2603_vm6, %v2803_v37, 0.0  ;;  %v2496_v46 = vpop.f32.mrb[11].mxu1  ;;  %v2853_v47 = vsel %vm2848_vm1, %v2852_v20, 0.0  ;;  %vm2823_vm3 = vcmp.gt.f32.partialorder %v2452_v23, 0.0  ;;  %v2867_v54 = vsel %vm2603_vm6, %v2866_v45, -inf }
 0x272   :  { %2805 = vadd.xlane.f32.xlu0 %v2804_v44  ;;  %v2854_v55 = vsel %vm2603_vm6, %v2853_v47, 0.0  ;;  %v2841_v60 = vsel %vm2840_vm2, %v2452_v23, -3e+38  ;;  %v2828_v61 = vsel %vm2823_vm3, %v2827_v52, 0.0  ;;  %vm2873_vm5 = vcmp.gt.f32.partialorder %v2493_v30, 0.0 }
 0x273   :  { %v2842_v63 = vsel %vm2603_vm6, %v2841_v60, -inf  ;;  %v2829_v5 = vsel %vm2603_vm6, %v2828_v61, 0.0  ;;  %v2891_v9 = vsel %vm2890_vm4, %v2493_v30, -3e+38  ;;  %v2878_v12 = vsel %vm2873_vm5, %v2877_v62, 0.0 }
 0x274   :  { %v2892_v13 = vsel %vm2603_vm6, %v2891_v9, -inf  ;;  %v2879_v41 = vsel %vm2603_vm6, %v2878_v12, 0.0  ;;  %vm2940_vm15 = vcmp.eq.s32.totalorder %v2939_v18, 1  ;;  %vm2990_vm1 = vcmp.eq.s32.totalorder %v2989_v59, 1 }
 0x275   :  { %2868 = vmax.xlane.f32.xlu1 %v2867_v54  ;;  %vm2607_vm3 = vcmask 1024   ;;  %vm2620_vm4 = vcmask 132224   ;;  %vm2632_vm5 = vcmask 9224  }
 0x276   :  { %2855 = vadd.xlane.f32.xlu0 %v2854_v55 }
 0x279   :  { %2843 = vmax.xlane.f32.xlu1 %v2842_v63 }
 0x27a   :  { %2830 = vadd.xlane.f32.xlu0 %v2829_v5 }
 0x27d   :  { %2893 = vmax.xlane.f32.xlu1 %v2892_v13 }
 0x27e   :  { %2880 = vadd.xlane.f32.xlu0 %v2879_v41 }
 0x28e   :  { %v2532_v8 = vpop.f32.mrb[12].mxu0  ;;  %v2573_v19 = vpop.f32.mrb[12].mxu1 }
 0x28f   :  { %vm2898_vm13 = vcmp.gt.f32.partialorder %v2532_v8, 0.0  ;;  %v2534_v32 = vpop.f32.mrb[13].mxu0  ;;  %v2916_v33 = vsel %vm4325_vm10, %v2532_v8, -3e+38  ;;  %vm2948_vm14 = vcmp.gt.f32.partialorder %v2573_v19, 0.0  ;;  %v2575_v35 = vpop.f32.mrb[13].mxu1 }
 0x290   :  { %v2536_v48 = vpop.f32.mrb[14].mxu0  ;;  %v2917_v49 = vsel %vm2603_vm6, %v2916_v33, -inf  ;;  %v2903_v50 = vsel %vm2898_vm13, %v2902_v7, 0.0  ;;  %v2577_v51 = vpop.f32.mrb[14].mxu1  ;;  %v2966_v27 = vsel %vm4330_vm12, %v2573_v19, -3e+38 }
 0x291   :  { %2918 = vmax.xlane.f32.xlu1 %v2917_v49  ;;  %v2537_v24 = vpop.f32.mrb[15].mxu0  ;;  %v2904_v25 = vsel %vm2603_vm6, %v2903_v50, 0.0  ;;  %v2578_v56 = vpop.f32.mrb[15].mxu1  ;;  %v2953_v58 = vsel %vm2948_vm14, %v2952_v17, 0.0  ;;  %vm2923_vm0 = vcmp.gt.f32.partialorder %v2534_v32, 0.0  ;;  %v2967_v10 = vsel %vm2603_vm6, %v2966_v27, -inf }
 0x292   :  { %2905 = vadd.xlane.f32.xlu0 %v2904_v25  ;;  %v2954_v14 = vsel %vm2603_vm6, %v2953_v58, 0.0  ;;  %v2941_v15 = vsel %vm2940_vm15, %v2534_v32, -3e+38  ;;  %v2928_v20 = vsel %vm2923_vm0, %v2927_v2, 0.0  ;;  %vm2973_vm2 = vcmp.gt.f32.partialorder %v2575_v35, 0.0  ;;  %v3032_v48 = vld [vmem:[#allocation8 + $0x20] sm:$0xff] }
 0x293   :  { %v2942_v22 = vsel %vm2603_vm6, %v2941_v15, -inf  ;;  %v2929_v23 = vsel %vm2603_vm6, %v2928_v20, 0.0  ;;  %v2991_v28 = vsel %vm2990_vm1, %v2575_v35, -3e+38  ;;  %v2978_v29 = vsel %vm2973_vm2, %v2977_v11, 0.0  ;;  %v3031_v35 = vld [vmem:[#allocation8 + $0x18] sm:$0xff] }
 0x294   :  { %v2992_v30 = vsel %vm2603_vm6, %v2991_v28, -inf  ;;  %v2979_v31 = vsel %vm2603_vm6, %v2978_v29, 0.0  ;;  %vm2682_vm10 = vcmask 25624   ;;  %vm2695_vm6 = vcmask 156824   ;;  %v3388_v7 = vld [vmem:[#allocation8 + $0x10] ss:$0 sm:$0xff] }
 0x295   :  { %2968 = vmax.xlane.f32.xlu1 %v2967_v10  ;;  %vm2720_vm12 = vcmask 165024   ;;  %vm2732_vm13 = vcmask 42024   ;;  %vm2745_vm14 = vcmask 173224   ;;  %vm2757_vm15 = vcmask 50224   ;;  %v3033_v51 = vld [vmem:[#allocation8 + $0x28] sm:$0xff]  ;;  %v3034_v24 = vld [vmem:[#allocation8 + $0x30] sm:$0xff] }
 0x296   :  { %2955 = vadd.xlane.f32.xlu0 %v2954_v14  ;;  %vm2770_vm0 = vcmask 181424   ;;  %vm2782_vm1 = vcmask 58424   ;;  %vm2795_vm2 = vcmask 189624   ;;  %v3410_v49 = vpack.c.bf16 %v3032_v48, %v3031_v35  ;;  %v3389_v10 = vld [vmem:[#allocation8 + $0x11] ss:$0 sm:$0xff] }
 0x297   :  { %v3596_v50 = vmov 0.0|0.0   ;;  %v3413_v25 = vpack.c.bf16 %v3034_v24, %v3033_v51  ;;  %v3598_v27 = vmov 0.0   ;;  %v3390_v15 = vld [vmem:[#allocation8 + $0x12] ss:$0 sm:$0xff] }
 0x298   :  { %3409 = vmatprep.subr.bf16.mxu0 %v3596_v50 }
 0x299   :  { %2943 = vmax.xlane.f32.xlu1 %v2942_v22  ;;  %3411 = vmatpush3.bf16.msra.mxu0 %v3410_v49  ;;  %v3391_v22 = vld [vmem:[#allocation8 + $0x13] ss:$0 sm:$0xff] }
 0x29a   :  { %2930 = vadd.xlane.f32.xlu0 %v2929_v23  ;;  %3412 = vmatprep.subr.bf16.mxu0 %v3596_v50 }
 0x29d   :  { %2993 = vmax.xlane.f32.xlu1 %v2992_v30  ;;  %3414 = vmatpush3.bf16.msra.mxu0 %v3413_v25 }
 0x29e   :  { %2980 = vadd.xlane.f32.xlu0 %v2979_v31 }
 0x2be   :  { %v2619_v37 = vpop.xlane.xlu0 %2618 }
 0x2bf   :  { %v2669_v36 = vpop.xlane.xlu1 %2668 }
 0x2c2   :  { %v2606_v42 = vpop.xlane.xlu0 %2605 }
 0x2c3   :  { %v2644_v38 = vpop.xlane.xlu1 %2643  ;;  %2608 = vst.msk [vmem:[#allocation2] sm:$0x3] %vm2607_vm3, %v2606_v42  ;;  %vm2807_vm3 = vcmask 66624  }
 0x2c4   :  { %2621 = vst.msk [vmem:[#allocation2] sm:$0x3] %vm2620_vm4, %v2619_v37  ;;  %vm2820_vm4 = vcmask 197824  }
 0x2c6   :  { %v2656_v44 = vpop.xlane.xlu0 %2655 }
 0x2c7   :  { %v2694_v39 = vpop.xlane.xlu1 %2693 }
 0x2ca   :  { %v2681_v46 = vpop.xlane.xlu0 %2680 }
 0x2cb   :  { %v2631_v45 = vpop.xlane.xlu1 %2630 }
 0x2cc   :  { %2633 = vst.msk [vmem:[#allocation2] sm:$0x3] %vm2632_vm5, %v2631_v45  ;;  %vm2832_vm5 = vcmask 74824  }
 0x2cd   :  { %2646 = vst.msk [vmem:[#allocation2] sm:$0x3] %vm2645_vm7, %v2644_v38  ;;  %vm2845_vm7 = vcmask 206024  }
 0x2ce   :  { %2658 = vst.msk [vmem:[#allocation2] sm:$0x3] %vm2657_vm8, %v2656_v44  ;;  %vm2857_vm8 = vcmask 83024  }
 0x2cf   :  { %2671 = vst.msk [vmem:[#allocation2] sm:$0x3] %vm2670_vm9, %v2669_v36  ;;  %vm2870_vm9 = vcmask 214224  }
 0x2d0   :  { %2683 = vst.msk [vmem:[#allocation2] sm:$0x3] %vm2682_vm10, %v2681_v46  ;;  %vm2882_vm10 = vcmask 91224  }
 0x2d1   :  { %2696 = vst.msk [vmem:[#allocation2] sm:$0x3] %vm2695_vm6, %v2694_v39  ;;  %vm2895_vm6 = vcmask 222424  }
 0x2de   :  { %v2719_v47 = vpop.xlane.xlu1 %2718 }
 0x2df   :  { %v2706_v52 = vpop.xlane.xlu0 %2705 }
 0x2e0   :  { %2708 = vst.msk [vmem:[#allocation2] sm:$0x3] %vm2707_vm11, %v2706_v52  ;;  %vm2907_vm11 = vcmask 99424  }
 0x2e1   :  { %2721 = vst.msk [vmem:[#allocation2] sm:$0x3] %vm2720_vm12, %v2719_v47  ;;  %vm2920_vm12 = vcmask 230624  }
 0x2e2   :  { %v2769_v53 = vpop.xlane.xlu1 %2768 }
 0x2e3   :  { %v2756_v54 = vpop.xlane.xlu0 %2755 }
 0x2e6   :  { %v2744_v55 = vpop.xlane.xlu1 %2743 }
 0x2e7   :  { %v2731_v60 = vpop.xlane.xlu0 %2730 }
 0x2e8   :  { %2733 = vst.msk [vmem:[#allocation2] sm:$0x3] %vm2732_vm13, %v2731_v60  ;;  %vm2932_vm13 = vcmask 107624  }
 0x2e9   :  { %2746 = vst.msk [vmem:[#allocation2] sm:$0x3] %vm2745_vm14, %v2744_v55  ;;  %vm2945_vm14 = vcmask 238824  }
 0x2ea   :  { %2758 = vst.msk [vmem:[#allocation2] sm:$0x3] %vm2757_vm15, %v2756_v54  ;;  %v2794_v62 = vpop.xlane.xlu1 %2793  ;;  %vm2957_vm15 = vcmask 115824  }
 0x2eb   :  { %2771 = vst.msk [vmem:[#allocation2] sm:$0x3] %vm2770_vm0, %v2769_v53  ;;  %v2781_v61 = vpop.xlane.xlu0 %2780  ;;  %vm2970_vm0 = vcmask 247024  }
 0x2ec   :  { %2783 = vst.msk [vmem:[#allocation2] sm:$0x3] %vm2782_vm1, %v2781_v61  ;;  %vm2982_vm1 = vcmask 124024  }
 0x2ed   :  { %2796 = vst.msk [vmem:[#allocation2] sm:$0x3] %vm2795_vm2, %v2794_v62  ;;  %vm2995_vm2 = vcmask 255224  }
 0x2fe   :  { %v2819_v63 = vpop.xlane.xlu1 %2818 }
 0x2ff   :  { %v2806_v5 = vpop.xlane.xlu0 %2805 }
 0x300   :  { %2808 = vst.msk [vmem:[#allocation2] sm:$0x3] %vm2807_vm3, %v2806_v5  ;;  %vm3004_vm3 = vcmask 254976  }
 0x301   :  { %2821 = vst.msk [vmem:[#allocation2] sm:$0x3] %vm2820_vm4, %v2819_v63  ;;  %vm3597_vm4 = vmmov 0  }
 0x302   :  { %v2869_v9 = vpop.xlane.xlu1 %2868  ;;  %3406 = vmatprep.mubr.msk.f32.mxu0 %vm3597_vm4, %v3598_v27 }
 0x303   :  { %v2856_v12 = vpop.xlane.xlu0 %2855 }
 0x306   :  { %v2844_v13 = vpop.xlane.xlu1 %2843 }
 0x307   :  { %v2831_v41 = vpop.xlane.xlu0 %2830 }
 0x308   :  { %2833 = vst.msk [vmem:[#allocation2] sm:$0x3] %vm2832_vm5, %v2831_v41  ;;  %vm3040_vm5 = vcmask 261120  }
 0x309   :  { %2846 = vst.msk [vmem:[#allocation2] sm:$0x3] %vm2845_vm7, %v2844_v13  ;;  %vm3114_vm7 = vcmask 58368  }
 0x30a   :  { %2858 = vst.msk [vmem:[#allocation2] sm:$0x3] %vm2857_vm8, %v2856_v12  ;;  %v2894_v0 = vpop.xlane.xlu1 %2893 }
 0x30b   :  { %2871 = vst.msk [vmem:[#allocation2] sm:$0x3] %vm2870_vm9, %v2869_v9  ;;  %v2881_v57 = vpop.xlane.xlu0 %2880 }
 0x30c   :  { %2883 = vst.msk [vmem:[#allocation2] sm:$0x3] %vm2882_vm10, %v2881_v57 }
 0x30d   :  { %2896 = vst.msk [vmem:[#allocation2] sm:$0x3] %vm2895_vm6, %v2894_v0 }
 0x31e   :  { %v2919_v43 = vpop.xlane.xlu1 %2918 }
 0x31f   :  { %v2906_v40 = vpop.xlane.xlu0 %2905 }
 0x320   :  { %2908 = vst.msk [vmem:[#allocation2] sm:$0x3] %vm2907_vm11, %v2906_v40 }
 0x321   :  { %2921 = vst.msk [vmem:[#allocation2] sm:$0x3] %vm2920_vm12, %v2919_v43 }
 0x322   :  { %v2969_v4 = vpop.xlane.xlu1 %2968 }
 0x323   :  { %v2956_v3 = vpop.xlane.xlu0 %2955 }
 0x326   :  { %v2944_v26 = vpop.xlane.xlu1 %2943 }
 0x327   :  { %v2931_v1 = vpop.xlane.xlu0 %2930 }
 0x328   :  { %2933 = vst.msk [vmem:[#allocation2] sm:$0x3] %vm2932_vm13, %v2931_v1 }
 0x329   :  { %2946 = vst.msk [vmem:[#allocation2] sm:$0x3] %vm2945_vm14, %v2944_v26 }
 0x32a   :  { %2958 = vst.msk [vmem:[#allocation2] sm:$0x3] %vm2957_vm15, %v2956_v3  ;;  %v2994_v6 = vpop.xlane.xlu1 %2993 }
 0x32b   :  { %2971 = vst.msk [vmem:[#allocation2] sm:$0x3] %vm2970_vm0, %v2969_v4  ;;  %v2981_v21 = vpop.xlane.xlu0 %2980 }
 0x32c   :  { %2983 = vst.msk [vmem:[#allocation2] sm:$0x3] %vm2982_vm1, %v2981_v21 }
 0x32d   :  { %2996 = vst.msk [vmem:[#allocation2] sm:$0x3] %vm2995_vm2, %v2994_v6 }
 0x334   :  { %v2997_v8 = vld [vmem:[#allocation2] sm:$0x3] }
 0x335   :  { %v3003_v16 = vmul.f32 %v3388_v7, %v2997_v8 }
 0x337   :  { %v3005_v17 = vsel %vm3004_vm3, %v3003_v16, 0.0 }
 0x338   :  { %3006 = vadd.xlane.f32.xlu0 %v3005_v17 }
 0x3c5   :  { %v3007_v18 = vpop.xlane.xlu0 %3006 }
 0x3c6   :  { %v3009_v19 = vmul.f32 0.03125, %v3007_v18 }
 0x3c8   :  { %v3010_v32 = vsub.f32 %v3003_v16, %v3009_v19 }
 0x3ca   :  { %v3011_v33 = vmul.f32 %v3010_v32, %v3010_v32 }
 0x3cc   :  { %v3012_v34 = vsel %vm3004_vm3, %v3011_v33, 0.0 }
 0x3cd   :  { %3013 = vadd.xlane.f32.xlu1 %v3012_v34 }
 0x45a   :  { %v3014_v56 = vpop.xlane.xlu1 %3013 }
 0x45b   :  { %v3015_v58 = vmul.f32 0.03125, %v3014_v56 }
 0x45d   :  { %v3016_v2 = vadd.f32 1e-05, %v3015_v58 }
 0x45f   :  { %3491 = vrsqrt.f32 %v3016_v2 }
 0x469   :  { %v3492_v59 = vpop.eup %3491 }
 0x46a   :  { %v3018_v14 = vmul.f32 %v3492_v59, %v3010_v32 }
 0x46c   :  { %v3024_v20 = vmul.f32 %v3389_v10, %v3018_v14 }
 0x46e   :  { %v3030_v11 = vadd.f32 %v3390_v15, %v3024_v20 }
 0x470   :  { %3407 = vmatmul.mubr.msk.f32.vlgmr.msra.gmra.mrb[16].mxu0 %vm3040_vm5, %v3030_v11 }
 0x543   :  { %v3110_v23 = vpop.f32.mrb[16].mxu0 }
 0x544   :  { %v3111_v28 = vadd.f32 %v3391_v22, %v3110_v23  ;;  %v3408_v29 = vpop.f32.mrb[17].mxu0 }
 0x546   :  { %3115 = vst.msk [vmem:[#allocation9] sm:$0x3] %vm3114_vm7, %v3111_v28 }
 0x547   :  { %3571 = shalt.err (!%p3568_p0)
}
 0x548   :  { %s3572_s27 = scalar_lea.hbm %s4367_s3, 32 }
 0x549   :  { %p3573_p1 = scmp.ne.s32.totalorder %s4367_s3, %s3572_s27  ;;  %p3576_p2 = scmp.lt.u32.totalorder %s3572_s27, %s4367_s3 }
 0x54b   :  { %p3578_p3 = pnand %p3576_p2, %p3573_p1 }
 0x54d   :  { %3581 = shalt.err (!%p3578_p3)
}
 0x54e   :  { %3125 = dma.vmem_to_hbm [thread:$0]  %s3123_s23, 32, %s4367_s3, [#allocation5]  }
 0x54f   :  { %3586 = dma.done.wait [#allocation5], 32  }
 0x550   :  { %3587 = vsyncadd [#allocation5], 4294967264 }
 0x551   :  { %3129 = vsyncpa [#allocation4], 1 }
 0x552   :  { %3130 = vsyncpa [#allocation7], 1 }
 0x553   :  { %3131 = vsyncpa [#allocation5], 1 }

</bundles_post_ra>
